<compile_context>
chip_gen: v5e
topology: v5e:2x2
jax: 0.10.0
libtpu: 0.0.40
codegen_flags: <defaults>
</compile_context>

<pallas_src>
import functools

import numpy as np

import jax
import jax.numpy as jnp
from jax.experimental import pallas as pl
from jax.experimental.pallas import tpu as pltpu


# Fixed vision geometry implied by num_input_to_fc = 3872 = 32 * 11 * 11.
IMG_C, IMG_HW = 3, 15             # input image 3 x 15 x 15 (NCHW at the API boundary)
C1, HW1 = 16, 13                  # conv1: 3 -> 16, 15 -> 13
C2, HW2 = 32, 11                  # conv2: 16 -> 32, 13 -> 11
NUM_INPUT_TO_FC = C2 * HW2 * HW2  # 3872
SCENT_DIM = 3


def _round_up(x, m):
    return ((x + m - 1) // m) * m


# ----------------------------------------------------------------------------
# Fused forward kernel (one pallas_call, TB samples per grid step)
# ----------------------------------------------------------------------------

def _aux_fused_kernel(img_ref, ss_ref,
                      w1_ref, b1_ref, w2_ref, b2_ref, wfc_ref, bfc_ref,
                      wss_ref, bss_ref, wl_ref, bl_ref,
                      wfu_ref, bfu_ref, wh_ref, bh_ref,
                      out_ref, *, hidden, action_space, block_b):
    H, A, TB = hidden, action_space, block_b
    f32 = jnp.float32

    def mm(x, w):
        # MXU matmul: bf16 (or f32) operands, f32 accumulation.
        return jnp.dot(x.astype(w.dtype), w, preferred_element_type=f32)

    # ---- vision: conv1 as 3 shifted block-Toeplitz matmuls over (row, batch) rows ----
    img = img_ref[...]                                      # (15*TB, 45) row = i*TB + b
    acc1 = mm(img[0:HW1 * TB, :], w1_ref[0])
    for di in (1, 2):
        acc1 = acc1 + mm(img[di * TB:(di + HW1) * TB, :], w1_ref[di])
    a1 = jnp.maximum(acc1 + b1_ref[...], 0.0).astype(w2_ref.dtype)   # (13*TB, 208)

    acc2 = mm(a1[0:HW2 * TB, :], w2_ref[0])
    for di in (1, 2):
        acc2 = acc2 + mm(a1[di * TB:(di + HW2) * TB, :], w2_ref[di])
    a2 = jnp.maximum(acc2 + b2_ref[...], 0.0).astype(wfc_ref.dtype)  # (11*TB, 352)

    # ---- vision FC: 11 accumulated (TB,352)x(352,H) dots (reduction over conv rows) ----
    vis = bfc_ref[...] + mm(a2[0:TB, :], wfc_ref[0])
    for oi in range(1, HW2):
        vis = vis + mm(a2[oi * TB:(oi + 1) * TB, :], wfc_ref[oi])
    vis = jnp.maximum(vis, 0.0)                             # (TB, H)

    # ---- scent + state first-layer FCs as one block-diagonal matmul ----
    ss_act = jnp.maximum(mm(ss_ref[...], wss_ref[...]) + bss_ref[...], 0.0)  # (TB, 2H)

    # ---- three LSTM steps (h0=c0=0, f-gate dropped) fused into one block-diag matmul ----
    x3h = jnp.concatenate([vis, ss_act], axis=-1)           # (TB, 3H) order [vis|scent|state]
    g = mm(x3h, wl_ref[...]) + bl_ref[...]                  # (TB, 9H) cols [i|g|o] x [v,s,t]
    gate_i = jax.nn.sigmoid(g[:, 0:3 * H])
    cell = gate_i * jnp.tanh(g[:, 3 * H:6 * H])
    gate_o = jax.nn.sigmoid(g[:, 6 * H:9 * H])
    h = gate_o * jnp.tanh(cell)                             # (TB, 3H) = [h_v | h_s | h_t]

    # ---- fusion + merged [value | policy] head ----
    fused = jnp.maximum(mm(h, wfu_ref[...]) + bfu_ref[...], 0.0)     # (TB, H)
    out = mm(fused, wh_ref[...]) + bh_ref[...]              # (TB, 1+A)

    logits = out[:, 1:1 + A]
    m = jnp.max(logits, axis=-1, keepdims=True)
    e = jnp.exp(logits - m)
    pol = e * pl.reciprocal(jnp.sum(e, axis=-1, keepdims=True), approx=True)
    out_ref[...] = jnp.concatenate([out[:, 0:1], pol], axis=-1)


# ----------------------------------------------------------------------------
# Parameters: raw (PyTorch layout) init + one-time repack into kernel layout
# ----------------------------------------------------------------------------

def xavier_normal(key, shape, fan_in, fan_out):
    std = (2.0 / (fan_in + fan_out)) ** 0.5
    return std * jax.random.normal(key, shape, dtype=jnp.float32)


def init_raw_params(key, state_size=32, action_space=3):
    """Parameters in PyTorch layout (conv OIHW; LSTM W_ih^T with [i|f|g|o] cols)."""
    H, A = state_size, action_space
    ks = jax.random.split(key, 11)
    p = {}
    p["conv1_w"] = xavier_normal(ks[0], (C1, IMG_C, 3, 3), IMG_C * 9, C1 * 9)
    p["conv1_b"] = jnp.zeros((C1,), jnp.float32)
    p["conv2_w"] = xavier_normal(ks[1], (C2, C1, 3, 3), C1 * 9, C2 * 9)
    p["conv2_b"] = jnp.zeros((C2,), jnp.float32)
    p["vis_fc_w"] = xavier_normal(ks[2], (NUM_INPUT_TO_FC, H), NUM_INPUT_TO_FC, H)
    p["vis_fc_b"] = jnp.zeros((H,), jnp.float32)
    p["vis_lstm_w"] = xavier_normal(ks[3], (H, 4 * H), H, 4 * H)
    p["vis_lstm_b"] = jnp.zeros((4 * H,), jnp.float32)      # = b_ih + b_hh
    p["scent_fc_w"] = xavier_normal(ks[4], (SCENT_DIM, H), SCENT_DIM, H)
    p["scent_fc_b"] = jnp.zeros((H,), jnp.float32)
    p["scent_lstm_w"] = xavier_normal(ks[5], (H, 4 * H), H, 4 * H)
    p["scent_lstm_b"] = jnp.zeros((4 * H,), jnp.float32)
    p["state_fc_w"] = xavier_normal(ks[6], (H, H), H, H)
    p["state_fc_b"] = jnp.zeros((H,), jnp.float32)
    p["state_lstm_w"] = xavier_normal(ks[7], (H, 4 * H), H, 4 * H)
    p["state_lstm_b"] = jnp.zeros((4 * H,), jnp.float32)
    p["fuse_w"] = xavier_normal(ks[8], (3 * H, H), 3 * H, H)
    p["fuse_b"] = jnp.zeros((H,), jnp.float32)
    p["value_w"] = xavier_normal(ks[9], (H, 1), H, 1)
    p["value_b"] = jnp.zeros((1,), jnp.float32)
    p["policy_w"] = xavier_normal(ks[10], (H, A), H, A)
    p["policy_b"] = jnp.zeros((A,), jnp.float32)
    return p


def _conv_toeplitz(w_oihw, out_w):
    """(OC,C,3,3) -> (3, (out_w+2)*C, out_w*OC) block-Toeplitz matrices (one per di).

    acc[oi, oj*OC+oc] = sum_di x_cl[oi+di, :] @ T[di] reproduces a valid 3x3 conv when
    the activation is channels-last flattened (column = j*C + c)."""
    w = np.asarray(w_oihw, np.float32)
    OC, C, KH, KW = w.shape
    in_w = out_w + KW - 1
    mats = np.zeros((KH, in_w * C, out_w * OC), np.float32)
    for di in range(KH):
        for oj in range(out_w):
            for dj in range(KW):
                j = oj + dj
                mats[di, j * C:(j + 1) * C, oj * OC:(oj + 1) * OC] = w[:, :, di, dj].T
    return jnp.asarray(mats)


def _pack_lstm_blockdiag(ws, bs, H):
    """Three zero-state LSTM steps -> one block-diagonal [i|g|o] gate matmul.

    PyTorch gate column order is [i|f|g|o]; with c0 == 0 the f gate is dropped and W_hh
    is irrelevant.  Output columns are grouped gate-major then branch-major:
      [i_v,i_s,i_t | g_v,g_s,g_t | o_v,o_s,o_t]
    so each nonlinearity runs once on a 3H-wide slab and h comes out in branch order."""
    n = len(ws)
    W = np.zeros((n * H, 3 * n * H), np.float32)
    b = np.zeros((3 * n * H,), np.float32)
    gate_cols = ((0, H), (2 * H, 3 * H), (3 * H, 4 * H))    # i, g, o
    for br in range(n):
        wbr = np.asarray(ws[br], np.float32)
        bbr = np.asarray(bs[br], np.float32)
        for gi, (s, e) in enumerate(gate_cols):
            c0 = (gi * n + br) * H
            W[br * H:(br + 1) * H, c0:c0 + H] = wbr[:, s:e]
            b[c0:c0 + H] = bbr[s:e]
    return jnp.asarray(W), jnp.asarray(b.reshape(1, 3 * n * H))


def pack_params(raw, param_dtype=jnp.bfloat16):
    """One-time repack into the fused-kernel layout.

    Matmul weights are stored in `param_dtype` (bf16 by default -> MXU-native on
    v5e/v6e/v7x, half the VMEM); biases stay f32 (added to f32 accumulators)."""
    H = raw["state_fc_w"].shape[0]
    A = raw["policy_w"].shape[1]
    wd = param_dtype
    p = {}
    p["w1"] = _conv_toeplitz(raw["conv1_w"], HW1).astype(wd)          # (3, 45, 208)
    p["b1"] = jnp.asarray(np.tile(np.asarray(raw["conv1_b"], np.float32),
                                  HW1).reshape(1, HW1 * C1))
    p["w2"] = _conv_toeplitz(raw["conv2_w"], HW2).astype(wd)          # (3, 208, 352)
    p["b2"] = jnp.asarray(np.tile(np.asarray(raw["conv2_b"], np.float32),
                                  HW2).reshape(1, HW2 * C2))
    # Vision FC rows permuted from NCHW-flatten order (oc*121 + oi*11 + oj) to the
    # in-kernel conv-output layout (row = oi, col = oj*C2 + oc).
    wfc = np.asarray(raw["vis_fc_w"], np.float32).reshape(C2, HW2, HW2, H)
    p["wfc"] = jnp.asarray(wfc.transpose(1, 2, 0, 3).reshape(HW2, HW2 * C2, H)).astype(wd)
    p["bfc"] = jnp.asarray(np.asarray(raw["vis_fc_b"], np.float32).reshape(1, H))
    # scent + state first-layer FCs fused into one block-diagonal (3+H, 2H) matmul.
    wss = np.zeros((SCENT_DIM + H, 2 * H), np.float32)
    wss[:SCENT_DIM, :H] = np.asarray(raw["scent_fc_w"], np.float32)
    wss[SCENT_DIM:, H:] = np.asarray(raw["state_fc_w"], np.float32)
    p["wss"] = jnp.asarray(wss).astype(wd)
    p["bss"] = jnp.asarray(np.concatenate(
        [np.asarray(raw["scent_fc_b"], np.float32),
         np.asarray(raw["state_fc_b"], np.float32)]).reshape(1, 2 * H))
    # Three LSTM steps fused into one block-diagonal (3H, 9H) gate matmul.
    wl, bl = _pack_lstm_blockdiag(
        [raw["vis_lstm_w"], raw["scent_lstm_w"], raw["state_lstm_w"]],
        [raw["vis_lstm_b"], raw["scent_lstm_b"], raw["state_lstm_b"]], H)
    p["wl"] = wl.astype(wd)
    p["bl"] = bl
    p["wfu"] = jnp.asarray(np.asarray(raw["fuse_w"], np.float32)).astype(wd)  # (3H, H)
    p["bfu"] = jnp.asarray(np.asarray(raw["fuse_b"], np.float32).reshape(1, H))
    p["wh"] = jnp.asarray(np.concatenate([np.asarray(raw["value_w"], np.float32),
                                          np.asarray(raw["policy_w"], np.float32)],
                                         axis=1)).astype(wd)                   # (H, 1+A)
    p["bh"] = jnp.asarray(np.concatenate([np.asarray(raw["value_b"], np.float32),
                                          np.asarray(raw["policy_b"], np.float32)]
                                         ).reshape(1, 1 + A))
    return p


_PARAM_ORDER = ("w1", "b1", "w2", "b2", "wfc", "bfc", "wss", "bss",
                "wl", "bl", "wfu", "bfu", "wh", "bh")


def _const_spec(arr):
    nd = arr.ndim
    return pl.BlockSpec(arr.shape, lambda b, _nd=nd: (0,) * _nd)


# ----------------------------------------------------------------------------
# AuxNetwork.forward  ->  (value, policy)   (single fused, batch-tiled pallas_call)
# ----------------------------------------------------------------------------

@functools.partial(jax.jit, static_argnames=("block_b",))
def aux_network_forward(packed, image, scent, state, block_b=128):
    B = image.shape[0]
    H = packed["wfu"].shape[1]
    A = packed["wh"].shape[1] - 1
    cdt = packed["w1"].dtype

    # Batch tile: sublane multiple, capped at ceil(B/2) so the grid has >=2 steps once
    # B > 8 (keeps both v7x TensorCores busy via dimension_semantics=("parallel",)).
    tb_cap = max(8, _round_up(-(-B // 2), 8))
    TB = max(8, min(_round_up(block_b, 8), tb_cap))
    B_pad = _round_up(B, TB)
    nblk = B_pad // TB

    if B_pad != B:
        pad = B_pad - B
        image = jnp.pad(image, ((0, pad), (0, 0), (0, 0), (0, 0)))
        scent = jnp.pad(scent, ((0, pad), (0, 0)))
        state = jnp.pad(state, ((0, pad), (0, 0)))

    # Only wrapper-side glue: NCHW image -> per-block (15*TB, 45) channels-last slab
    # (row = conv_row*TB + batch, col = j*3 + c), one fused transpose+reshape in bf16.
    img = (image.astype(cdt)
           .reshape(nblk, TB, IMG_C, IMG_HW, IMG_HW)
           .transpose(0, 3, 1, 4, 2)
           .reshape(nblk * IMG_HW * TB, IMG_HW * IMG_C))
    ss = jnp.concatenate([scent.astype(jnp.float32), state.astype(jnp.float32)],
                         axis=-1)                                     # (B_pad, 3+H)

    weights = tuple(packed[k] for k in _PARAM_ORDER)
    in_specs = [
        pl.BlockSpec((IMG_HW * TB, IMG_HW * IMG_C), lambda b: (b, 0)),
        pl.BlockSpec((TB, SCENT_DIM + H), lambda b: (b, 0)),
    ] + [_const_spec(w) for w in weights]

    out = pl.pallas_call(
        functools.partial(_aux_fused_kernel, hidden=H, action_space=A, block_b=TB),
        out_shape=jax.ShapeDtypeStruct((B_pad, 1 + A), jnp.float32),
        grid=(nblk,),
        in_specs=in_specs,
        out_specs=pl.BlockSpec((TB, 1 + A), lambda b: (b, 0)),
        compiler_params=pltpu.CompilerParams(
            dimension_semantics=("parallel",)),
    )(img, ss, *weights)

    out = out[:B]
    return out[:, 0:1], out[:, 1:1 + A]


# ----------------------------------------------------------------------------
# Pure-JAX reference (for correctness checking only)
# ----------------------------------------------------------------------------

def reference_forward(raw, image, scent, state):
    H = raw["state_fc_w"].shape[0]
    hp = jax.lax.Precision.HIGHEST

    def conv_relu(x, w, b):
        y = jax.lax.conv_general_dilated(
            x, w, (1, 1), "VALID",
            dimension_numbers=("NCHW", "OIHW", "NCHW"), precision=hp)
        return jax.nn.relu(y + b.reshape(1, -1, 1, 1))

    def lstm(x, w, b):
        g = jnp.dot(x, w, precision=hp) + b
        i = jax.nn.sigmoid(g[:, 0:H])
        c = i * jnp.tanh(g[:, 2 * H:3 * H])
        o = jax.nn.sigmoid(g[:, 3 * H:4 * H])
        return o * jnp.tanh(c)

    x = conv_relu(image, raw["conv1_w"], raw["conv1_b"])
    x = conv_relu(x, raw["conv2_w"], raw["conv2_b"])
    x = x.reshape(x.shape[0], -1)
    x = jax.nn.relu(jnp.dot(x, raw["vis_fc_w"], precision=hp) + raw["vis_fc_b"])
    vis_h = lstm(x, raw["vis_lstm_w"], raw["vis_lstm_b"])
    s = jax.nn.relu(jnp.dot(scent, raw["scent_fc_w"], precision=hp) + raw["scent_fc_b"])
    scent_h = lstm(s, raw["scent_lstm_w"], raw["scent_lstm_b"])
    t = jax.nn.relu(jnp.dot(state, raw["state_fc_w"], precision=hp) + raw["state_fc_b"])
    state_h = lstm(t, raw["state_lstm_w"], raw["state_lstm_b"])
    f = jnp.concatenate([vis_h, scent_h, state_h], axis=-1)
    f = jax.nn.relu(jnp.dot(f, raw["fuse_w"], precision=hp) + raw["fuse_b"])
    value = jnp.dot(f, raw["value_w"], precision=hp) + raw["value_b"]
    policy = jax.nn.softmax(jnp.dot(f, raw["policy_w"], precision=hp) + raw["policy_b"],
                            axis=-1)
    return value, policy


if __name__ == "__main__":
    key = jax.random.PRNGKey(0)
    k_params, k_img, k_scent, k_state = jax.random.split(key, 4)

    state_size, action_space, batch = 32, 3, 2
    raw = init_raw_params(k_params, state_size=state_size, action_space=action_space)
    packed = pack_params(raw, param_dtype=jnp.bfloat16)

    # image 3x15x15 so that two 3x3 valid convs give 32*11*11 = 3872 features
    image = jax.random.uniform(k_img, (batch, IMG_C, IMG_HW, IMG_HW), dtype=jnp.float32)
    scent = jax.random.normal(k_scent, (batch, SCENT_DIM), dtype=jnp.float32)
    state = jax.random.normal(k_state, (batch, state_size), dtype=jnp.float32)

    value, policy = aux_network_forward(packed, image, scent, state)
    jax.block_until_ready((value, policy))

    assert value.shape == (batch, 1) and policy.shape == (batch, action_space)
    assert bool(jnp.all(jnp.isfinite(value))) and bool(jnp.all(jnp.isfinite(policy)))
    assert bool(jnp.allclose(jnp.sum(policy, axis=-1), 1.0, atol=2e-3))

    # Numerical check against a pure-JAX f32 reference (bf16 matmul operands in-kernel).
    v_ref, p_ref = reference_forward(raw, image, scent, state)
    assert bool(jnp.allclose(value, v_ref, atol=1.5e-2, rtol=1.5e-2))
    assert bool(jnp.allclose(policy, p_ref, atol=1e-2, rtol=1e-2))

    # Exercise the batch-tiled / padded path (multiple grid steps + ragged batch).
    batch2 = 19
    image2 = jax.random.uniform(k_img, (batch2, IMG_C, IMG_HW, IMG_HW), dtype=jnp.float32)
    scent2 = jax.random.normal(k_scent, (batch2, SCENT_DIM), dtype=jnp.float32)
    state2 = jax.random.normal(k_state, (batch2, state_size), dtype=jnp.float32)
    v2, p2 = aux_network_forward(packed, image2, scent2, state2, block_b=8)
    jax.block_until_ready((v2, p2))
    assert v2.shape == (batch2, 1) and p2.shape == (batch2, action_space)
    v2_ref, p2_ref = reference_forward(raw, image2, scent2, state2)
    assert bool(jnp.allclose(v2, v2_ref, atol=1.5e-2, rtol=1.5e-2))
    assert bool(jnp.allclose(p2, p2_ref, atol=1e-2, rtol=1e-2))

    print("KERNEL_OK")
</pallas_src>

<mosaic_0001>
module attributes {stable_mosaic.version = 11 : i64} {
  func.func @_aux_fused_kernel(%arg0: i32, %arg1: memref<120x45xbf16, #tpu.memory_space<vmem>>, %arg2: memref<8x35xf32, #tpu.memory_space<vmem>>, %arg3: memref<3x45x208xbf16, #tpu.memory_space<vmem>>, %arg4: memref<1x208xf32, #tpu.memory_space<vmem>>, %arg5: memref<3x208x352xbf16, #tpu.memory_space<vmem>>, %arg6: memref<1x352xf32, #tpu.memory_space<vmem>>, %arg7: memref<11x352x32xbf16, #tpu.memory_space<vmem>>, %arg8: memref<1x32xf32, #tpu.memory_space<vmem>>, %arg9: memref<35x64xbf16, #tpu.memory_space<vmem>>, %arg10: memref<1x64xf32, #tpu.memory_space<vmem>>, %arg11: memref<96x288xbf16, #tpu.memory_space<vmem>>, %arg12: memref<1x288xf32, #tpu.memory_space<vmem>>, %arg13: memref<96x32xbf16, #tpu.memory_space<vmem>>, %arg14: memref<1x32xf32, #tpu.memory_space<vmem>>, %arg15: memref<32x4xbf16, #tpu.memory_space<vmem>>, %arg16: memref<1x4xf32, #tpu.memory_space<vmem>>, %arg17: memref<8x4xf32, #tpu.memory_space<vmem>>) attributes {dimension_semantics = [#tpu.dimension_semantics<parallel>], iteration_bounds = array<i64: 1>, scalar_prefetch = 0 : i64, scratch_operands = 0 : i64, tpu.core_type = #tpu.core_type<tc>, window_params = [{transform_indices = @transform_0, window_bounds = array<i64: 120, 45>}, {transform_indices = @transform_1, window_bounds = array<i64: 8, 35>}, {pipeline_mode = #tpu.pipeline_mode<synchronous>, transform_indices = @transform_2, window_bounds = array<i64: 3, 45, 208>}, {pipeline_mode = #tpu.pipeline_mode<synchronous>, transform_indices = @transform_3, window_bounds = array<i64: 1, 208>}, {pipeline_mode = #tpu.pipeline_mode<synchronous>, transform_indices = @transform_4, window_bounds = array<i64: 3, 208, 352>}, {pipeline_mode = #tpu.pipeline_mode<synchronous>, transform_indices = @transform_5, window_bounds = array<i64: 1, 352>}, {pipeline_mode = #tpu.pipeline_mode<synchronous>, transform_indices = @transform_6, window_bounds = array<i64: 11, 352, 32>}, {pipeline_mode = #tpu.pipeline_mode<synchronous>, transform_indices = @transform_7, window_bounds = array<i64: 1, 32>}, {pipeline_mode = #tpu.pipeline_mode<synchronous>, transform_indices = @transform_8, window_bounds = array<i64: 35, 64>}, {pipeline_mode = #tpu.pipeline_mode<synchronous>, transform_indices = @transform_9, window_bounds = array<i64: 1, 64>}, {pipeline_mode = #tpu.pipeline_mode<synchronous>, transform_indices = @transform_10, window_bounds = array<i64: 96, 288>}, {pipeline_mode = #tpu.pipeline_mode<synchronous>, transform_indices = @transform_11, window_bounds = array<i64: 1, 288>}, {pipeline_mode = #tpu.pipeline_mode<synchronous>, transform_indices = @transform_12, window_bounds = array<i64: 96, 32>}, {pipeline_mode = #tpu.pipeline_mode<synchronous>, transform_indices = @transform_13, window_bounds = array<i64: 1, 32>}, {pipeline_mode = #tpu.pipeline_mode<synchronous>, transform_indices = @transform_14, window_bounds = array<i64: 32, 4>}, {pipeline_mode = #tpu.pipeline_mode<synchronous>, transform_indices = @transform_15, window_bounds = array<i64: 1, 4>}, {transform_indices = @transform_16, window_bounds = array<i64: 8, 4>}]} {
    %c0 = arith.constant 0 : index
    %c0_0 = arith.constant 0 : index
    %0 = vector.load %arg1[%c0, %c0_0] : memref<120x45xbf16, #tpu.memory_space<vmem>>, vector<120x45xbf16>
    %1 = vector.extract_strided_slice %0 {offsets = [0, 0], sizes = [104, 45], strides = [1, 1]} : vector<120x45xbf16> to vector<104x45xbf16>
    %c0_1 = arith.constant 0 : index
    %c0_2 = arith.constant 0 : index
    %c0_3 = arith.constant 0 : index
    %2 = vector.load %arg3[%c0_1, %c0_2, %c0_3] : memref<3x45x208xbf16, #tpu.memory_space<vmem>>, vector<1x45x208xbf16>
    %3 = vector.shape_cast %2 : vector<1x45x208xbf16> to vector<45x208xbf16>
    %cst = arith.constant dense<0.000000e+00> : vector<104x208xf32>
    %4 = tpu.matmul %1, %3, %cst {dimension_numbers = #tpu.dot_dimension_numbers<[1], [0], [0], [1], [0, 0, 1, 1], [], []>} : vector<104x45xbf16>, vector<45x208xbf16>, vector<104x208xf32> -> vector<104x208xf32>
    %5 = vector.extract_strided_slice %0 {offsets = [8, 0], sizes = [104, 45], strides = [1, 1]} : vector<120x45xbf16> to vector<104x45xbf16>
    %c1 = arith.constant 1 : index
    %c0_4 = arith.constant 0 : index
    %c0_5 = arith.constant 0 : index
    %6 = vector.load %arg3[%c1, %c0_4, %c0_5] : memref<3x45x208xbf16, #tpu.memory_space<vmem>>, vector<1x45x208xbf16>
    %7 = vector.shape_cast %6 : vector<1x45x208xbf16> to vector<45x208xbf16>
    %cst_6 = arith.constant dense<0.000000e+00> : vector<104x208xf32>
    %8 = tpu.matmul %5, %7, %cst_6 {dimension_numbers = #tpu.dot_dimension_numbers<[1], [0], [0], [1], [0, 0, 1, 1], [], []>} : vector<104x45xbf16>, vector<45x208xbf16>, vector<104x208xf32> -> vector<104x208xf32>
    %9 = arith.addf %4, %8 : vector<104x208xf32>
    %10 = vector.extract_strided_slice %0 {offsets = [16, 0], sizes = [104, 45], strides = [1, 1]} : vector<120x45xbf16> to vector<104x45xbf16>
    %c2 = arith.constant 2 : index
    %c0_7 = arith.constant 0 : index
    %c0_8 = arith.constant 0 : index
    %11 = vector.load %arg3[%c2, %c0_7, %c0_8] : memref<3x45x208xbf16, #tpu.memory_space<vmem>>, vector<1x45x208xbf16>
    %12 = vector.shape_cast %11 : vector<1x45x208xbf16> to vector<45x208xbf16>
    %cst_9 = arith.constant dense<0.000000e+00> : vector<104x208xf32>
    %13 = tpu.matmul %10, %12, %cst_9 {dimension_numbers = #tpu.dot_dimension_numbers<[1], [0], [0], [1], [0, 0, 1, 1], [], []>} : vector<104x45xbf16>, vector<45x208xbf16>, vector<104x208xf32> -> vector<104x208xf32>
    %14 = arith.addf %9, %13 : vector<104x208xf32>
    %c0_10 = arith.constant 0 : index
    %c0_11 = arith.constant 0 : index
    %15 = vector.load %arg4[%c0_10, %c0_11] : memref<1x208xf32, #tpu.memory_space<vmem>>, vector<1x208xf32>
    %16 = vector.broadcast %15 : vector<1x208xf32> to vector<104x208xf32>
    %17 = arith.addf %14, %16 : vector<104x208xf32>
    %cst_12 = arith.constant 0.000000e+00 : f32
    %18 = vector.broadcast %cst_12 : f32 to vector<104x208xf32>
    %19 = arith.maximumf %17, %18 : vector<104x208xf32>
    %20 = arith.truncf %19 : vector<104x208xf32> to vector<104x208xbf16>
    %21 = vector.extract_strided_slice %20 {offsets = [0, 0], sizes = [88, 208], strides = [1, 1]} : vector<104x208xbf16> to vector<88x208xbf16>
    %c0_13 = arith.constant 0 : index
    %c0_14 = arith.constant 0 : index
    %c0_15 = arith.constant 0 : index
    %22 = vector.load %arg5[%c0_13, %c0_14, %c0_15] : memref<3x208x352xbf16, #tpu.memory_space<vmem>>, vector<1x208x352xbf16>
    %23 = vector.shape_cast %22 : vector<1x208x352xbf16> to vector<208x352xbf16>
    %cst_16 = arith.constant dense<0.000000e+00> : vector<88x352xf32>
    %24 = tpu.matmul %21, %23, %cst_16 {dimension_numbers = #tpu.dot_dimension_numbers<[1], [0], [0], [1], [0, 0, 1, 1], [], []>} : vector<88x208xbf16>, vector<208x352xbf16>, vector<88x352xf32> -> vector<88x352xf32>
    %25 = vector.extract_strided_slice %20 {offsets = [8, 0], sizes = [88, 208], strides = [1, 1]} : vector<104x208xbf16> to vector<88x208xbf16>
    %c1_17 = arith.constant 1 : index
    %c0_18 = arith.constant 0 : index
    %c0_19 = arith.constant 0 : index
    %26 = vector.load %arg5[%c1_17, %c0_18, %c0_19] : memref<3x208x352xbf16, #tpu.memory_space<vmem>>, vector<1x208x352xbf16>
    %27 = vector.shape_cast %26 : vector<1x208x352xbf16> to vector<208x352xbf16>
    %cst_20 = arith.constant dense<0.000000e+00> : vector<88x352xf32>
    %28 = tpu.matmul %25, %27, %cst_20 {dimension_numbers = #tpu.dot_dimension_numbers<[1], [0], [0], [1], [0, 0, 1, 1], [], []>} : vector<88x208xbf16>, vector<208x352xbf16>, vector<88x352xf32> -> vector<88x352xf32>
    %29 = arith.addf %24, %28 : vector<88x352xf32>
    %30 = vector.extract_strided_slice %20 {offsets = [16, 0], sizes = [88, 208], strides = [1, 1]} : vector<104x208xbf16> to vector<88x208xbf16>
    %c2_21 = arith.constant 2 : index
    %c0_22 = arith.constant 0 : index
    %c0_23 = arith.constant 0 : index
    %31 = vector.load %arg5[%c2_21, %c0_22, %c0_23] : memref<3x208x352xbf16, #tpu.memory_space<vmem>>, vector<1x208x352xbf16>
    %32 = vector.shape_cast %31 : vector<1x208x352xbf16> to vector<208x352xbf16>
    %cst_24 = arith.constant dense<0.000000e+00> : vector<88x352xf32>
    %33 = tpu.matmul %30, %32, %cst_24 {dimension_numbers = #tpu.dot_dimension_numbers<[1], [0], [0], [1], [0, 0, 1, 1], [], []>} : vector<88x208xbf16>, vector<208x352xbf16>, vector<88x352xf32> -> vector<88x352xf32>
    %34 = arith.addf %29, %33 : vector<88x352xf32>
    %c0_25 = arith.constant 0 : index
    %c0_26 = arith.constant 0 : index
    %35 = vector.load %arg6[%c0_25, %c0_26] : memref<1x352xf32, #tpu.memory_space<vmem>>, vector<1x352xf32>
    %36 = vector.broadcast %35 : vector<1x352xf32> to vector<88x352xf32>
    %37 = arith.addf %34, %36 : vector<88x352xf32>
    %cst_27 = arith.constant 0.000000e+00 : f32
    %38 = vector.broadcast %cst_27 : f32 to vector<88x352xf32>
    %39 = arith.maximumf %37, %38 : vector<88x352xf32>
    %40 = arith.truncf %39 : vector<88x352xf32> to vector<88x352xbf16>
    %c0_28 = arith.constant 0 : index
    %c0_29 = arith.constant 0 : index
    %41 = vector.load %arg8[%c0_28, %c0_29] : memref<1x32xf32, #tpu.memory_space<vmem>>, vector<1x32xf32>
    %42 = vector.extract_strided_slice %40 {offsets = [0, 0], sizes = [8, 352], strides = [1, 1]} : vector<88x352xbf16> to vector<8x352xbf16>
    %c0_30 = arith.constant 0 : index
    %c0_31 = arith.constant 0 : index
    %c0_32 = arith.constant 0 : index
    %43 = vector.load %arg7[%c0_30, %c0_31, %c0_32] : memref<11x352x32xbf16, #tpu.memory_space<vmem>>, vector<1x352x32xbf16>
    %44 = vector.shape_cast %43 : vector<1x352x32xbf16> to vector<352x32xbf16>
    %cst_33 = arith.constant dense<0.000000e+00> : vector<8x32xf32>
    %45 = tpu.matmul %42, %44, %cst_33 {dimension_numbers = #tpu.dot_dimension_numbers<[1], [0], [0], [1], [0, 0, 1, 1], [], []>} : vector<8x352xbf16>, vector<352x32xbf16>, vector<8x32xf32> -> vector<8x32xf32>
    %46 = vector.broadcast %41 : vector<1x32xf32> to vector<8x32xf32>
    %47 = arith.addf %46, %45 : vector<8x32xf32>
    %48 = vector.extract_strided_slice %40 {offsets = [8, 0], sizes = [8, 352], strides = [1, 1]} : vector<88x352xbf16> to vector<8x352xbf16>
    %c1_34 = arith.constant 1 : index
    %c0_35 = arith.constant 0 : index
    %c0_36 = arith.constant 0 : index
    %49 = vector.load %arg7[%c1_34, %c0_35, %c0_36] : memref<11x352x32xbf16, #tpu.memory_space<vmem>>, vector<1x352x32xbf16>
    %50 = vector.shape_cast %49 : vector<1x352x32xbf16> to vector<352x32xbf16>
    %cst_37 = arith.constant dense<0.000000e+00> : vector<8x32xf32>
    %51 = tpu.matmul %48, %50, %cst_37 {dimension_numbers = #tpu.dot_dimension_numbers<[1], [0], [0], [1], [0, 0, 1, 1], [], []>} : vector<8x352xbf16>, vector<352x32xbf16>, vector<8x32xf32> -> vector<8x32xf32>
    %52 = arith.addf %47, %51 : vector<8x32xf32>
    %53 = vector.extract_strided_slice %40 {offsets = [16, 0], sizes = [8, 352], strides = [1, 1]} : vector<88x352xbf16> to vector<8x352xbf16>
    %c2_38 = arith.constant 2 : index
    %c0_39 = arith.constant 0 : index
    %c0_40 = arith.constant 0 : index
    %54 = vector.load %arg7[%c2_38, %c0_39, %c0_40] : memref<11x352x32xbf16, #tpu.memory_space<vmem>>, vector<1x352x32xbf16>
    %55 = vector.shape_cast %54 : vector<1x352x32xbf16> to vector<352x32xbf16>
    %cst_41 = arith.constant dense<0.000000e+00> : vector<8x32xf32>
    %56 = tpu.matmul %53, %55, %cst_41 {dimension_numbers = #tpu.dot_dimension_numbers<[1], [0], [0], [1], [0, 0, 1, 1], [], []>} : vector<8x352xbf16>, vector<352x32xbf16>, vector<8x32xf32> -> vector<8x32xf32>
    %57 = arith.addf %52, %56 : vector<8x32xf32>
    %58 = vector.extract_strided_slice %40 {offsets = [24, 0], sizes = [8, 352], strides = [1, 1]} : vector<88x352xbf16> to vector<8x352xbf16>
    %c3 = arith.constant 3 : index
    %c0_42 = arith.constant 0 : index
    %c0_43 = arith.constant 0 : index
    %59 = vector.load %arg7[%c3, %c0_42, %c0_43] : memref<11x352x32xbf16, #tpu.memory_space<vmem>>, vector<1x352x32xbf16>
    %60 = vector.shape_cast %59 : vector<1x352x32xbf16> to vector<352x32xbf16>
    %cst_44 = arith.constant dense<0.000000e+00> : vector<8x32xf32>
    %61 = tpu.matmul %58, %60, %cst_44 {dimension_numbers = #tpu.dot_dimension_numbers<[1], [0], [0], [1], [0, 0, 1, 1], [], []>} : vector<8x352xbf16>, vector<352x32xbf16>, vector<8x32xf32> -> vector<8x32xf32>
    %62 = arith.addf %57, %61 : vector<8x32xf32>
    %63 = vector.extract_strided_slice %40 {offsets = [32, 0], sizes = [8, 352], strides = [1, 1]} : vector<88x352xbf16> to vector<8x352xbf16>
    %c4 = arith.constant 4 : index
    %c0_45 = arith.constant 0 : index
    %c0_46 = arith.constant 0 : index
    %64 = vector.load %arg7[%c4, %c0_45, %c0_46] : memref<11x352x32xbf16, #tpu.memory_space<vmem>>, vector<1x352x32xbf16>
    %65 = vector.shape_cast %64 : vector<1x352x32xbf16> to vector<352x32xbf16>
    %cst_47 = arith.constant dense<0.000000e+00> : vector<8x32xf32>
    %66 = tpu.matmul %63, %65, %cst_47 {dimension_numbers = #tpu.dot_dimension_numbers<[1], [0], [0], [1], [0, 0, 1, 1], [], []>} : vector<8x352xbf16>, vector<352x32xbf16>, vector<8x32xf32> -> vector<8x32xf32>
    %67 = arith.addf %62, %66 : vector<8x32xf32>
    %68 = vector.extract_strided_slice %40 {offsets = [40, 0], sizes = [8, 352], strides = [1, 1]} : vector<88x352xbf16> to vector<8x352xbf16>
    %c5 = arith.constant 5 : index
    %c0_48 = arith.constant 0 : index
    %c0_49 = arith.constant 0 : index
    %69 = vector.load %arg7[%c5, %c0_48, %c0_49] : memref<11x352x32xbf16, #tpu.memory_space<vmem>>, vector<1x352x32xbf16>
    %70 = vector.shape_cast %69 : vector<1x352x32xbf16> to vector<352x32xbf16>
    %cst_50 = arith.constant dense<0.000000e+00> : vector<8x32xf32>
    %71 = tpu.matmul %68, %70, %cst_50 {dimension_numbers = #tpu.dot_dimension_numbers<[1], [0], [0], [1], [0, 0, 1, 1], [], []>} : vector<8x352xbf16>, vector<352x32xbf16>, vector<8x32xf32> -> vector<8x32xf32>
    %72 = arith.addf %67, %71 : vector<8x32xf32>
    %73 = vector.extract_strided_slice %40 {offsets = [48, 0], sizes = [8, 352], strides = [1, 1]} : vector<88x352xbf16> to vector<8x352xbf16>
    %c6 = arith.constant 6 : index
    %c0_51 = arith.constant 0 : index
    %c0_52 = arith.constant 0 : index
    %74 = vector.load %arg7[%c6, %c0_51, %c0_52] : memref<11x352x32xbf16, #tpu.memory_space<vmem>>, vector<1x352x32xbf16>
    %75 = vector.shape_cast %74 : vector<1x352x32xbf16> to vector<352x32xbf16>
    %cst_53 = arith.constant dense<0.000000e+00> : vector<8x32xf32>
    %76 = tpu.matmul %73, %75, %cst_53 {dimension_numbers = #tpu.dot_dimension_numbers<[1], [0], [0], [1], [0, 0, 1, 1], [], []>} : vector<8x352xbf16>, vector<352x32xbf16>, vector<8x32xf32> -> vector<8x32xf32>
    %77 = arith.addf %72, %76 : vector<8x32xf32>
    %78 = vector.extract_strided_slice %40 {offsets = [56, 0], sizes = [8, 352], strides = [1, 1]} : vector<88x352xbf16> to vector<8x352xbf16>
    %c7 = arith.constant 7 : index
    %c0_54 = arith.constant 0 : index
    %c0_55 = arith.constant 0 : index
    %79 = vector.load %arg7[%c7, %c0_54, %c0_55] : memref<11x352x32xbf16, #tpu.memory_space<vmem>>, vector<1x352x32xbf16>
    %80 = vector.shape_cast %79 : vector<1x352x32xbf16> to vector<352x32xbf16>
    %cst_56 = arith.constant dense<0.000000e+00> : vector<8x32xf32>
    %81 = tpu.matmul %78, %80, %cst_56 {dimension_numbers = #tpu.dot_dimension_numbers<[1], [0], [0], [1], [0, 0, 1, 1], [], []>} : vector<8x352xbf16>, vector<352x32xbf16>, vector<8x32xf32> -> vector<8x32xf32>
    %82 = arith.addf %77, %81 : vector<8x32xf32>
    %83 = vector.extract_strided_slice %40 {offsets = [64, 0], sizes = [8, 352], strides = [1, 1]} : vector<88x352xbf16> to vector<8x352xbf16>
    %c8 = arith.constant 8 : index
    %c0_57 = arith.constant 0 : index
    %c0_58 = arith.constant 0 : index
    %84 = vector.load %arg7[%c8, %c0_57, %c0_58] : memref<11x352x32xbf16, #tpu.memory_space<vmem>>, vector<1x352x32xbf16>
    %85 = vector.shape_cast %84 : vector<1x352x32xbf16> to vector<352x32xbf16>
    %cst_59 = arith.constant dense<0.000000e+00> : vector<8x32xf32>
    %86 = tpu.matmul %83, %85, %cst_59 {dimension_numbers = #tpu.dot_dimension_numbers<[1], [0], [0], [1], [0, 0, 1, 1], [], []>} : vector<8x352xbf16>, vector<352x32xbf16>, vector<8x32xf32> -> vector<8x32xf32>
    %87 = arith.addf %82, %86 : vector<8x32xf32>
    %88 = vector.extract_strided_slice %40 {offsets = [72, 0], sizes = [8, 352], strides = [1, 1]} : vector<88x352xbf16> to vector<8x352xbf16>
    %c9 = arith.constant 9 : index
    %c0_60 = arith.constant 0 : index
    %c0_61 = arith.constant 0 : index
    %89 = vector.load %arg7[%c9, %c0_60, %c0_61] : memref<11x352x32xbf16, #tpu.memory_space<vmem>>, vector<1x352x32xbf16>
    %90 = vector.shape_cast %89 : vector<1x352x32xbf16> to vector<352x32xbf16>
    %cst_62 = arith.constant dense<0.000000e+00> : vector<8x32xf32>
    %91 = tpu.matmul %88, %90, %cst_62 {dimension_numbers = #tpu.dot_dimension_numbers<[1], [0], [0], [1], [0, 0, 1, 1], [], []>} : vector<8x352xbf16>, vector<352x32xbf16>, vector<8x32xf32> -> vector<8x32xf32>
    %92 = arith.addf %87, %91 : vector<8x32xf32>
    %93 = vector.extract_strided_slice %40 {offsets = [80, 0], sizes = [8, 352], strides = [1, 1]} : vector<88x352xbf16> to vector<8x352xbf16>
    %c10 = arith.constant 10 : index
    %c0_63 = arith.constant 0 : index
    %c0_64 = arith.constant 0 : index
    %94 = vector.load %arg7[%c10, %c0_63, %c0_64] : memref<11x352x32xbf16, #tpu.memory_space<vmem>>, vector<1x352x32xbf16>
    %95 = vector.shape_cast %94 : vector<1x352x32xbf16> to vector<352x32xbf16>
    %cst_65 = arith.constant dense<0.000000e+00> : vector<8x32xf32>
    %96 = tpu.matmul %93, %95, %cst_65 {dimension_numbers = #tpu.dot_dimension_numbers<[1], [0], [0], [1], [0, 0, 1, 1], [], []>} : vector<8x352xbf16>, vector<352x32xbf16>, vector<8x32xf32> -> vector<8x32xf32>
    %97 = arith.addf %92, %96 : vector<8x32xf32>
    %cst_66 = arith.constant 0.000000e+00 : f32
    %98 = vector.broadcast %cst_66 : f32 to vector<8x32xf32>
    %99 = arith.maximumf %97, %98 : vector<8x32xf32>
    %c0_67 = arith.constant 0 : index
    %c0_68 = arith.constant 0 : index
    %100 = vector.load %arg2[%c0_67, %c0_68] : memref<8x35xf32, #tpu.memory_space<vmem>>, vector<8x35xf32>
    %c0_69 = arith.constant 0 : index
    %c0_70 = arith.constant 0 : index
    %101 = vector.load %arg9[%c0_69, %c0_70] : memref<35x64xbf16, #tpu.memory_space<vmem>>, vector<35x64xbf16>
    %102 = arith.truncf %100 : vector<8x35xf32> to vector<8x35xbf16>
    %cst_71 = arith.constant dense<0.000000e+00> : vector<8x64xf32>
    %103 = tpu.matmul %102, %101, %cst_71 {dimension_numbers = #tpu.dot_dimension_numbers<[1], [0], [0], [1], [0, 0, 1, 1], [], []>} : vector<8x35xbf16>, vector<35x64xbf16>, vector<8x64xf32> -> vector<8x64xf32>
    %c0_72 = arith.constant 0 : index
    %c0_73 = arith.constant 0 : index
    %104 = vector.load %arg10[%c0_72, %c0_73] : memref<1x64xf32, #tpu.memory_space<vmem>>, vector<1x64xf32>
    %105 = vector.broadcast %104 : vector<1x64xf32> to vector<8x64xf32>
    %106 = arith.addf %103, %105 : vector<8x64xf32>
    %cst_74 = arith.constant 0.000000e+00 : f32
    %107 = vector.broadcast %cst_74 : f32 to vector<8x64xf32>
    %108 = arith.maximumf %106, %107 : vector<8x64xf32>
    %109 = tpu.concatenate %99, %108 in 1 : vector<8x32xf32>, vector<8x64xf32> -> vector<8x96xf32>
    %c0_75 = arith.constant 0 : index
    %c0_76 = arith.constant 0 : index
    %110 = vector.load %arg11[%c0_75, %c0_76] : memref<96x288xbf16, #tpu.memory_space<vmem>>, vector<96x288xbf16>
    %111 = arith.truncf %109 : vector<8x96xf32> to vector<8x96xbf16>
    %cst_77 = arith.constant dense<0.000000e+00> : vector<8x288xf32>
    %112 = tpu.matmul %111, %110, %cst_77 {dimension_numbers = #tpu.dot_dimension_numbers<[1], [0], [0], [1], [0, 0, 1, 1], [], []>} : vector<8x96xbf16>, vector<96x288xbf16>, vector<8x288xf32> -> vector<8x288xf32>
    %c0_78 = arith.constant 0 : index
    %c0_79 = arith.constant 0 : index
    %113 = vector.load %arg12[%c0_78, %c0_79] : memref<1x288xf32, #tpu.memory_space<vmem>>, vector<1x288xf32>
    %114 = vector.broadcast %113 : vector<1x288xf32> to vector<8x288xf32>
    %115 = arith.addf %112, %114 : vector<8x288xf32>
    %116 = vector.extract_strided_slice %115 {offsets = [0, 0], sizes = [8, 96], strides = [1, 1]} : vector<8x288xf32> to vector<8x96xf32>
    %117 = arith.negf %116 : vector<8x96xf32>
    %118 = math.exp %117 : vector<8x96xf32>
    %cst_80 = arith.constant 1.000000e+00 : f32
    %119 = vector.broadcast %cst_80 : f32 to vector<8x96xf32>
    %120 = arith.addf %119, %118 : vector<8x96xf32>
    %121 = arith.divf %119, %120 : vector<8x96xf32>
    %122 = vector.extract_strided_slice %115 {offsets = [0, 96], sizes = [8, 96], strides = [1, 1]} : vector<8x288xf32> to vector<8x96xf32>
    %123 = math.tanh %122 : vector<8x96xf32>
    %124 = arith.mulf %121, %123 : vector<8x96xf32>
    %125 = vector.extract_strided_slice %115 {offsets = [0, 192], sizes = [8, 96], strides = [1, 1]} : vector<8x288xf32> to vector<8x96xf32>
    %126 = arith.negf %125 : vector<8x96xf32>
    %127 = math.exp %126 : vector<8x96xf32>
    %cst_81 = arith.constant 1.000000e+00 : f32
    %128 = vector.broadcast %cst_81 : f32 to vector<8x96xf32>
    %129 = arith.addf %128, %127 : vector<8x96xf32>
    %130 = arith.divf %128, %129 : vector<8x96xf32>
    %131 = math.tanh %124 : vector<8x96xf32>
    %132 = arith.mulf %130, %131 : vector<8x96xf32>
    %c0_82 = arith.constant 0 : index
    %c0_83 = arith.constant 0 : index
    %133 = vector.load %arg13[%c0_82, %c0_83] : memref<96x32xbf16, #tpu.memory_space<vmem>>, vector<96x32xbf16>
    %134 = arith.truncf %132 : vector<8x96xf32> to vector<8x96xbf16>
    %cst_84 = arith.constant dense<0.000000e+00> : vector<8x32xf32>
    %135 = tpu.matmul %134, %133, %cst_84 {dimension_numbers = #tpu.dot_dimension_numbers<[1], [0], [0], [1], [0, 0, 1, 1], [], []>} : vector<8x96xbf16>, vector<96x32xbf16>, vector<8x32xf32> -> vector<8x32xf32>
    %c0_85 = arith.constant 0 : index
    %c0_86 = arith.constant 0 : index
    %136 = vector.load %arg14[%c0_85, %c0_86] : memref<1x32xf32, #tpu.memory_space<vmem>>, vector<1x32xf32>
    %137 = vector.broadcast %136 : vector<1x32xf32> to vector<8x32xf32>
    %138 = arith.addf %135, %137 : vector<8x32xf32>
    %cst_87 = arith.constant 0.000000e+00 : f32
    %139 = vector.broadcast %cst_87 : f32 to vector<8x32xf32>
    %140 = arith.maximumf %138, %139 : vector<8x32xf32>
    %c0_88 = arith.constant 0 : index
    %c0_89 = arith.constant 0 : index
    %141 = vector.load %arg15[%c0_88, %c0_89] : memref<32x4xbf16, #tpu.memory_space<vmem>>, vector<32x4xbf16>
    %142 = arith.truncf %140 : vector<8x32xf32> to vector<8x32xbf16>
    %cst_90 = arith.constant dense<0.000000e+00> : vector<8x4xf32>
    %143 = tpu.matmul %142, %141, %cst_90 {dimension_numbers = #tpu.dot_dimension_numbers<[1], [0], [0], [1], [0, 0, 1, 1], [], []>} : vector<8x32xbf16>, vector<32x4xbf16>, vector<8x4xf32> -> vector<8x4xf32>
    %c0_91 = arith.constant 0 : index
    %c0_92 = arith.constant 0 : index
    %144 = vector.load %arg16[%c0_91, %c0_92] : memref<1x4xf32, #tpu.memory_space<vmem>>, vector<1x4xf32>
    %145 = vector.broadcast %144 : vector<1x4xf32> to vector<8x4xf32>
    %146 = arith.addf %143, %145 : vector<8x4xf32>
    %147 = vector.extract_strided_slice %146 {offsets = [0, 1], sizes = [8, 3], strides = [1, 1]} : vector<8x4xf32> to vector<8x3xf32>
    %cst_93 = arith.constant dense<0xFF800000> : vector<8xf32>
    %148 = vector.multi_reduction <maximumf>, %147, %cst_93 [1] : vector<8x3xf32> to vector<8xf32>
    %149 = vector.shape_cast %148 : vector<8xf32> to vector<8x1xf32>
    %150 = vector.broadcast %149 : vector<8x1xf32> to vector<8x3xf32>
    %151 = arith.subf %147, %150 : vector<8x3xf32>
    %152 = math.exp %151 : vector<8x3xf32>
    %cst_94 = arith.constant dense<0.000000e+00> : vector<8xf32>
    %153 = vector.multi_reduction <add>, %152, %cst_94 [1] : vector<8x3xf32> to vector<8xf32>
    %154 = vector.shape_cast %153 : vector<8xf32> to vector<8x1xf32>
    %155 = tpu.reciprocal %154 {approx = true} : vector<8x1xf32> -> vector<8x1xf32>
    %156 = vector.broadcast %155 : vector<8x1xf32> to vector<8x3xf32>
    %157 = arith.mulf %152, %156 : vector<8x3xf32>
    %158 = vector.extract_strided_slice %146 {offsets = [0, 0], sizes = [8, 1], strides = [1, 1]} : vector<8x4xf32> to vector<8x1xf32>
    %159 = tpu.concatenate %158, %157 in 1 : vector<8x1xf32>, vector<8x3xf32> -> vector<8x4xf32>
    %c0_95 = arith.constant 0 : index
    %c0_96 = arith.constant 0 : index
    %160 = vector.load %arg17[%c0_95, %c0_96] : memref<8x4xf32, #tpu.memory_space<vmem>>, vector<8x4xf32>
    tpu.vector_store %arg17[%c0_95, %c0_96], %159 {strides = array<i32>} : memref<8x4xf32, #tpu.memory_space<vmem>>, vector<8x4xf32>,
    return
  }
  func.func @transform_0(%arg0: i32) -> (i32, i32) {
    %c0_i32 = arith.constant 0 : i32
    %c0_i32_0 = arith.constant 0 : i32
    return %arg0, %c0_i32 : i32, i32
  }
  func.func @transform_1(%arg0: i32) -> (i32, i32) {
    %c0_i32 = arith.constant 0 : i32
    %c0_i32_0 = arith.constant 0 : i32
    return %arg0, %c0_i32 : i32, i32
  }
  func.func @transform_2(%arg0: i32) -> (i32, i32, i32) {
    %c0_i32 = arith.constant 0 : i32
    %c0_i32_0 = arith.constant 0 : i32
    %c0_i32_1 = arith.constant 0 : i32
    %c0_i32_2 = arith.constant 0 : i32
    return %c0_i32, %c0_i32_0, %c0_i32_1 : i32, i32, i32
  }
  func.func @transform_3(%arg0: i32) -> (i32, i32) {
    %c0_i32 = arith.constant 0 : i32
    %c0_i32_0 = arith.constant 0 : i32
    %c0_i32_1 = arith.constant 0 : i32
    return %c0_i32, %c0_i32_0 : i32, i32
  }
  func.func @transform_4(%arg0: i32) -> (i32, i32, i32) {
    %c0_i32 = arith.constant 0 : i32
    %c0_i32_0 = arith.constant 0 : i32
    %c0_i32_1 = arith.constant 0 : i32
    %c0_i32_2 = arith.constant 0 : i32
    return %c0_i32, %c0_i32_0, %c0_i32_1 : i32, i32, i32
  }
  func.func @transform_5(%arg0: i32) -> (i32, i32) {
    %c0_i32 = arith.constant 0 : i32
    %c0_i32_0 = arith.constant 0 : i32
    %c0_i32_1 = arith.constant 0 : i32
    return %c0_i32, %c0_i32_0 : i32, i32
  }
  func.func @transform_6(%arg0: i32) -> (i32, i32, i32) {
    %c0_i32 = arith.constant 0 : i32
    %c0_i32_0 = arith.constant 0 : i32
    %c0_i32_1 = arith.constant 0 : i32
    %c0_i32_2 = arith.constant 0 : i32
    return %c0_i32, %c0_i32_0, %c0_i32_1 : i32, i32, i32
  }
  func.func @transform_7(%arg0: i32) -> (i32, i32) {
    %c0_i32 = arith.constant 0 : i32
    %c0_i32_0 = arith.constant 0 : i32
    %c0_i32_1 = arith.constant 0 : i32
    return %c0_i32, %c0_i32_0 : i32, i32
  }
  func.func @transform_8(%arg0: i32) -> (i32, i32) {
    %c0_i32 = arith.constant 0 : i32
    %c0_i32_0 = arith.constant 0 : i32
    %c0_i32_1 = arith.constant 0 : i32
    return %c0_i32, %c0_i32_0 : i32, i32
  }
  func.func @transform_9(%arg0: i32) -> (i32, i32) {
    %c0_i32 = arith.constant 0 : i32
    %c0_i32_0 = arith.constant 0 : i32
    %c0_i32_1 = arith.constant 0 : i32
    return %c0_i32, %c0_i32_0 : i32, i32
  }
  func.func @transform_10(%arg0: i32) -> (i32, i32) {
    %c0_i32 = arith.constant 0 : i32
    %c0_i32_0 = arith.constant 0 : i32
    %c0_i32_1 = arith.constant 0 : i32
    return %c0_i32, %c0_i32_0 : i32, i32
  }
  func.func @transform_11(%arg0: i32) -> (i32, i32) {
    %c0_i32 = arith.constant 0 : i32
    %c0_i32_0 = arith.constant 0 : i32
    %c0_i32_1 = arith.constant 0 : i32
    return %c0_i32, %c0_i32_0 : i32, i32
  }
  func.func @transform_12(%arg0: i32) -> (i32, i32) {
    %c0_i32 = arith.constant 0 : i32
    %c0_i32_0 = arith.constant 0 : i32
    %c0_i32_1 = arith.constant 0 : i32
    return %c0_i32, %c0_i32_0 : i32, i32
  }
  func.func @transform_13(%arg0: i32) -> (i32, i32) {
    %c0_i32 = arith.constant 0 : i32
    %c0_i32_0 = arith.constant 0 : i32
    %c0_i32_1 = arith.constant 0 : i32
    return %c0_i32, %c0_i32_0 : i32, i32
  }
  func.func @transform_14(%arg0: i32) -> (i32, i32) {
    %c0_i32 = arith.constant 0 : i32
    %c0_i32_0 = arith.constant 0 : i32
    %c0_i32_1 = arith.constant 0 : i32
    return %c0_i32, %c0_i32_0 : i32, i32
  }
  func.func @transform_15(%arg0: i32) -> (i32, i32) {
    %c0_i32 = arith.constant 0 : i32
    %c0_i32_0 = arith.constant 0 : i32
    %c0_i32_1 = arith.constant 0 : i32
    return %c0_i32, %c0_i32_0 : i32, i32
  }
  func.func @transform_16(%arg0: i32) -> (i32, i32) {
    %c0_i32 = arith.constant 0 : i32
    %c0_i32_0 = arith.constant 0 : i32
    return %arg0, %c0_i32 : i32, i32
  }
}

</mosaic_0001>

<bundles_post_ra>
// kernel: aux_network_forward.1
= control target key start
LH: loop header
LB: loop body
LE: loop exit
PB: predicated region body
PF: predicated region fallthrough
CT: control target
= control target key end

     0   :  { %vm165_vm0 = vcmask 1045504   ;;  %vm166_vm1 = vcmask 1046528   ;;  %v10774_v2 = vmov 65535   ;;  %vm143_vm2 = vcmask 367616   ;;  %s8140_s20 = smov 32   ;;  %s10756_s2 = inlined_call_operand.vmem [shape: bf16[3,45,208], index: 2, kind: input, shape index: {}]   ;;  %s10757_s0 = inlined_call_operand.vmem [shape: bf16[120,45], index: 0, kind: input, shape index: {}]   ;;  %s10758_s4 = inlined_call_operand.vmem [shape: bf16[3,208,352], index: 4, kind: input, shape index: {}]   ;;  %s10759_s3 = inlined_call_operand.vmem [shape: f32[1,208], index: 3, kind: input, shape index: {}]   ;;  %s10760_s6 = inlined_call_operand.vmem [shape: bf16[11,352,32], index: 6, kind: input, shape index: {}]   ;;  %s10761_s5 = inlined_call_operand.vmem [shape: f32[1,352], index: 5, kind: input, shape index: {}]   ;;  %s10762_s7 = inlined_call_operand.vmem [shape: f32[1,32], index: 7, kind: input, shape index: {}]   ;;  %s10763_s8 = inlined_call_operand.vmem [shape: bf16[35,64], index: 8, kind: input, shape index: {}]   ;;  %s10764_s1 = inlined_call_operand.vmem [shape: f32[8,35], index: 1, kind: input, shape index: {}]   ;;  %s10765_s9 = inlined_call_operand.vmem [shape: f32[1,64], index: 9, kind: input, shape index: {}]   ;;  %s10766_s10 = inlined_call_operand.vmem [shape: bf16[96,288], index: 10, kind: input, shape index: {}]   ;;  %s10767_s11 = inlined_call_operand.vmem [shape: f32[1,288], index: 11, kind: input, shape index: {}]   ;;  %s10768_s13 = inlined_call_operand.vmem [shape: f32[1,32], index: 13, kind: input, shape index: {}]   ;;  %s10769_s12 = inlined_call_operand.vmem [shape: bf16[96,32], index: 12, kind: input, shape index: {}]   ;;  %s10770_s14 = inlined_call_operand.vmem [shape: bf16[32,4], index: 14, kind: input, shape index: {}]   ;;  %s10771_s15 = inlined_call_operand.vmem [shape: f32[1,4], index: 15, kind: input, shape index: {}]   ;;  %s10772_s16 = inlined_call_operand.vmem [shape: f32[8,4], index: 16, kind: output, shape index: {}]  }
   0x1   :  { %10775 = sst [smem:[#allocation10_spill]] %s10756_s2  ;;  %v167_v3 = vsel %vm165_vm0, 4294967295, %v10774_v2  ;;  %v8101_v43 = vld [vmem:[%s10757_s0 + $0x4] sm:$0xff]   ;;  %v8103_v53 = vld [vmem:[%s10757_s0 + $0xc] sm:$0xff]   ;;  %v8105_v55 = vld [vmem:[%s10757_s0 + $0x14] sm:$0xff]   ;;  %vm1009_vm3 = vcmask 654336  }
   0x2   :  { %s10776_s23 = sld [smem:[#allocation10_spill]]  ;;  %v8235_v5 = vsel %vm166_vm1, %v167_v3, 0  ;;  %v8041_v44 = vld [vmem:[%s10757_s0] sm:$0xff]   ;;  %v8068_v54 = vld [vmem:[%s10757_s0 + $0x8] sm:$0xff]   ;;  %v8069_v56 = vld [vmem:[%s10757_s0 + $0x10] sm:$0xff]   ;;  %vm2551_vm4 = vcmask 785408  }
   0x3   :  { %v8107_v63 = vld [vmem:[%s10757_s0 + $0x1c] sm:$0xff]   ;;  %vm4929_vm5 = vcmask 1040384   ;;  %vm4930_vm6 = vcmask 1041408   ;;  %vm4925_vm7 = vcmask 285696   ;;  %vm4954_vm8 = vcmask 261120  }
   0x4   :  { %v8379_v3 = vld [vmem:[%s10757_s0 + $0x20] sm:$0xff]  }
   0x8   :  { %v5367_v0 = vld [vmem:[%s10776_s23 + $0x50] sm:$0xf]  ;;  %v7646_v1 = vld [vmem:[%s10776_s23 + $0x54] sm:$0x70]  ;;  %v7645_v6 = vld [vmem:[%s10776_s23 + $0x54] sm:$0xf] }
   0x9   :  { %v5368_v4 = vor.u32 %v7646_v1, %v5367_v0  ;;  %v5369_v7 = vld [vmem:[%s10776_s23 + $0x58] sm:$0x70]  ;;  %v5405_v9 = vld [vmem:[%s10776_s23 + $0x20] sm:$0xf]  ;;  %v7640_v10 = vld [vmem:[%s10776_s23 + $0x24] sm:$0x70] }
   0xa   :  { %v5372_v8 = vor.u32 %v7645_v6, %v5369_v7  ;;  %v7639_v11 = vld [vmem:[%s10776_s23 + $0x24] sm:$0xf]  ;;  %v5406_v13 = vor.u32 %v7640_v10, %v5405_v9  ;;  %v5407_v14 = vld [vmem:[%s10776_s23 + $0x28] sm:$0x70]  ;;  %v5359_v15 = vld [vmem:[%s10776_s23 + $0x40] sm:$0xf] }
   0xb   :  { %v170_v12 = vand.u32 %v5368_v4, %v8235_v5  ;;  %v7644_v16 = vld [vmem:[%s10776_s23 + $0x44] sm:$0xf0]  ;;  %v5410_v18 = vor.u32 %v7639_v11, %v5407_v14  ;;  %v7643_v19 = vld [vmem:[%s10776_s23 + $0x44] sm:$0xf]  ;;  %v5361_v20 = vld [vmem:[%s10776_s23 + $0x48] sm:$0xf0] }
   0xc   :  { %v173_v17 = vand.u32 %v5372_v8, %v8235_v5  ;;  %v5397_v21 = vld [vmem:[%s10776_s23 + $0x10] sm:$0xf]  ;;  %v320_v22 = vand.u32 %v5406_v13, %v8235_v5  ;;  %v5360_v23 = vor.u32 %v7644_v16, %v5359_v15  ;;  %v7638_v24 = vld [vmem:[%s10776_s23 + $0x14] sm:$0xf0]  ;;  %v7637_v25 = vld [vmem:[%s10776_s23 + $0x14] sm:$0xf]  ;;  %v5364_v28 = vor.u32 %v7643_v19, %v5361_v20 }
   0xd   :  { %180 = vmatpush.bf16.msra.mxu0 %v170_v12  ;;  %v5399_v26 = vld [vmem:[%s10776_s23 + $0x18] sm:$0xf0]  ;;  %v323_v27 = vand.u32 %v5410_v18, %v8235_v5  ;;  %v5351_v29 = vld [vmem:[%s10776_s23 + $0x30] sm:$0xf]  ;;  %v7642_v30 = vld [vmem:[%s10776_s23 + $0x34] sm:$0xf0]  ;;  %v5398_v31 = vor.u32 %v7638_v24, %v5397_v21 }
   0xe   :  { %223 = vmatpush.bf16.msra.mxu1 %v173_v17  ;;  %330 = vmatpush.bf16.msra.mxu2 %v320_v22  ;;  %v7641_v32 = vld [vmem:[%s10776_s23 + $0x34] sm:$0xf]  ;;  %v5353_v33 = vld [vmem:[%s10776_s23 + $0x38] sm:$0xf0]  ;;  %v5402_v34 = vor.u32 %v7637_v25, %v5399_v26  ;;  %v5389_v35 = vld [vmem:[%s10776_s23] sm:$0xf]  ;;  %v5352_v37 = vor.u32 %v7642_v30, %v5351_v29 }
   0xf   :  { %373 = vmatpush.bf16.msra.mxu3 %v323_v27  ;;  %v7636_v36 = vld [vmem:[%s10776_s23 + $0x4] sm:$0xf0]  ;;  %v7635_v38 = vld [vmem:[%s10776_s23 + $0x4] sm:$0xf]  ;;  %v5391_v39 = vld [vmem:[%s10776_s23 + $0x8] sm:$0xf0]  ;;  %v5356_v40 = vor.u32 %v7641_v32, %v5353_v33 }
  0x10   :  { %v5390_v41 = vor.u32 %v7636_v36, %v5389_v35  ;;  %v5394_v42 = vor.u32 %v7635_v38, %v5391_v39  ;;  %v5449_v45 = vld [vmem:[%s10776_s23 + $0x80] sm:$0xf]  ;;  %v7652_v46 = vld [vmem:[%s10776_s23 + $0x84] sm:$0x70]  ;;  %v7651_v47 = vld [vmem:[%s10776_s23 + $0x84] sm:$0xf] }
  0x11   :  { %181 = vmatpush.bf16.msra.mxu0 %v5360_v23  ;;  %v5450_v48 = vor.u32 %v7652_v46, %v5449_v45  ;;  %v5451_v49 = vld [vmem:[%s10776_s23 + $0x88] sm:$0x70]  ;;  %v5441_v57 = vld [vmem:[%s10776_s23 + $0x70] sm:$0xf]  ;;  %v7650_v58 = vld [vmem:[%s10776_s23 + $0x74] sm:$0xf0] }
  0x12   :  { %224 = vmatpush.bf16.msra.mxu1 %v5364_v28  ;;  %331 = vmatpush.bf16.msra.mxu2 %v5398_v31  ;;  %v5454_v50 = vor.u32 %v7651_v47, %v5451_v49  ;;  %v7649_v59 = vld [vmem:[%s10776_s23 + $0x74] sm:$0xf]  ;;  %v5442_v60 = vor.u32 %v7650_v58, %v5441_v57  ;;  %v5443_v61 = vld [vmem:[%s10776_s23 + $0x78] sm:$0xf0]  ;;  %v8108_v1 = vld [vmem:[%s10757_s0 + $0x24] sm:$0xff]  }
  0x13   :  { %374 = vmatpush.bf16.msra.mxu3 %v5402_v34  ;;  %v457_v51 = vand.u32 %v5450_v48, %v8235_v5  ;;  %v5446_v62 = vor.u32 %v7649_v59, %v5443_v61  ;;  %v8070_v0 = vld [vmem:[%s10757_s0 + $0x18] sm:$0xff]   ;;  %v5433_v4 = vld [vmem:[%s10776_s23 + $0x60] sm:$0xf]  ;;  %v7647_v6 = vld [vmem:[%s10776_s23 + $0x64] sm:$0xf] }
  0x14   :  { %v460_v52 = vand.u32 %v5454_v50, %v8235_v5  ;;  %v7648_v5 = vld [vmem:[%s10776_s23 + $0x64] sm:$0xf0]  ;;  %v5435_v8 = vld [vmem:[%s10776_s23 + $0x68] sm:$0xf0]  ;;  %v8407_v10 = vld [vmem:[%s10757_s0 + $0x30] sm:$0xff]  }
  0x15   :  { %182 = vmatpush.bf16.msra.mxu0 %v5352_v37  ;;  %v5434_v7 = vor.u32 %v7648_v5, %v5433_v4  ;;  %v8402_v9 = vld [vmem:[%s10757_s0 + $0x28] sm:$0xff]   ;;  %v5438_v11 = vor.u32 %v7647_v6, %v5435_v8  ;;  %v8066_v13 = vunpack.c.l.b16 %v8407_v10  ;;  %v8067_v15 = vunpack.c.h.b16 %v8407_v10  ;;  %v5607_v36 = vld [vmem:[%s10758_s4 + $0x1e0] sm:$0xf]  ;;  %v5667_v38 = vld [vmem:[%s10758_s4 + $0x258] sm:$0xf] }
  0x16   :  { %225 = vmatpush.bf16.msra.mxu1 %v5356_v40  ;;  %332 = vmatpush.bf16.msra.mxu2 %v5390_v41  ;;  %v8063_v12 = vunpack.c.h.b16 %v8402_v9  ;;  %v7714_v37 = vld [vmem:[%s10758_s4 + $0x1e8] sm:$0xf0]  ;;  %v7729_v40 = vld [vmem:[%s10758_s4 + $0x260] sm:$0xf0]  ;;  %v5655_v59 = vld [vmem:[%s10758_s4 + $0x240] sm:$0xf] }
  0x17   :  { %375 = vmatpush.bf16.msra.mxu3 %v5394_v42  ;;  %v114_v16 = vpack.c.b16 %v8067_v15, %v8067_v15  ;;  %v269_v17 = vpack.c.b16 %v8066_v13, %v8066_v13  ;;  %v5608_v39 = vor.u32 %v7714_v37, %v5607_v36  ;;  %v5668_v41 = vor.u32 %v7729_v40, %v5667_v38  ;;  %v5583_v5 = vld [vmem:[%s10758_s4 + $0x1b0] sm:$0xf]  ;;  %v7708_v6 = vld [vmem:[%s10758_s4 + $0x1b8] sm:$0xf0]  ;;  %v68_v15 = vld [vmem:[%s10757_s0 + $0x38] sm:$0xf] }
  0x18   :  { %5373 = vmatmul.msk.bf16.vlgmr.msra.gmra.mxu0 %vm143_vm2, %v8101_v43  ;;  %v113_v14 = vpack.c.b16 %v8066_v13, %v8063_v12  ;;  %v7715_v36 = vld [vmem:[%s10758_s4 + $0x1f0] sm:$0xf0] }
  0x19   :  { %5380 = vmatmul.msk.bf16.vlgmr.msra.gmra.mxu1 %vm143_vm2, %v8101_v43  ;;  %5411 = vmatmul.msk.bf16.vlgmr.msra.gmra.mxu2 %vm143_vm2, %v8041_v44 }
  0x1a   :  { %5418 = vmatmul.msk.bf16.vlgmr.msra.gmra.mxu3 %vm143_vm2, %v8041_v44  ;;  %467 = vmatpush.bf16.msrb.mxu0 %v457_v51 }
  0x1b   :  { %510 = vmatpush.bf16.msrb.mxu1 %v460_v52  ;;  %1028 = vmatpush.bf16.msrb.mxu2 %v5608_v39  ;;  %v5595_v52 = vld [vmem:[%s10758_s4 + $0x1c8] sm:$0xf] }
  0x1c   :  { %1069 = vmatpush.bf16.msrb.mxu3 %v5668_v41 }
  0x1e   :  { %468 = vmatpush.bf16.msrb.mxu0 %v5442_v60  ;;  %v7726_v60 = vld [vmem:[%s10758_s4 + $0x248] sm:$0xf0] }
  0x1f   :  { %511 = vmatpush.bf16.msrb.mxu1 %v5446_v62  ;;  %v5656_v61 = vor.u32 %v7726_v60, %v5655_v59 }
  0x21   :  { %1070 = vmatpush.bf16.msrb.mxu3 %v5656_v61 }
  0x22   :  { %469 = vmatpush.bf16.msrb.mxu0 %v5434_v7  ;;  %v5584_v7 = vor.u32 %v7708_v6, %v5583_v5  ;;  %v5559_v5 = vld [vmem:[%s10758_s4 + $0x180] sm:$0xf]  ;;  %v7702_v6 = vld [vmem:[%s10758_s4 + $0x188] sm:$0xf0] }
  0x23   :  { %512 = vmatpush.bf16.msrb.mxu1 %v5438_v11 }
  0x28   :  { %5374 = vmatmul.msk.bf16.gmra.mxu0 %vm143_vm2, %v8103_v53 }
  0x29   :  { %5381 = vmatmul.msk.bf16.gmra.mxu1 %vm143_vm2, %v8103_v53  ;;  %5412 = vmatmul.msk.bf16.gmra.mxu2 %vm143_vm2, %v8068_v54  ;;  %v7711_v53 = vld [vmem:[%s10758_s4 + $0x1d0] sm:$0xf0] }
  0x2a   :  { %5419 = vmatmul.msk.bf16.gmra.mxu3 %vm143_vm2, %v8068_v54 }
  0x38   :  { %5375 = vmatmul.msk.bf16.gmra.mxu0 %vm143_vm2, %v8105_v55 }
  0x39   :  { %5382 = vmatmul.msk.bf16.gmra.mxu1 %vm143_vm2, %v8105_v55  ;;  %5413 = vmatmul.msk.bf16.gmra.mxu2 %vm143_vm2, %v8069_v56 }
  0x3a   :  { %5420 = vmatmul.msk.bf16.gmra.mxu3 %vm143_vm2, %v8069_v56 }
  0x48   :  { %5376 = vmatmul.msk.bf16.gmra.mxu0 %vm143_vm2, %v8107_v63 }
  0x49   :  { %5383 = vmatmul.msk.bf16.gmra.mxu1 %vm143_vm2, %v8107_v63  ;;  %5414 = vmatmul.msk.bf16.gmra.mxu2 %vm143_vm2, %v8070_v0 }
  0x4a   :  { %5421 = vmatmul.msk.bf16.gmra.mxu3 %vm143_vm2, %v8070_v0 }
  0x58   :  { %5377 = vmatmul.msk.bf16.gmra.mxu0 %vm143_vm2, %v8108_v1 }
  0x59   :  { %5384 = vmatmul.msk.bf16.gmra.mxu1 %vm143_vm2, %v8108_v1  ;;  %5415 = vmatmul.msk.bf16.gmra.mxu2 %vm143_vm2, %v8379_v3 }
  0x5a   :  { %5422 = vmatmul.msk.bf16.gmra.mxu3 %vm143_vm2, %v8379_v3 }
  0x68   :  { %5378 = vmatmul.msk.bf16.gmra.mxu0 %vm143_vm2, %v113_v14 }
  0x69   :  { %5385 = vmatmul.msk.bf16.gmra.mxu1 %vm143_vm2, %v113_v14  ;;  %5416 = vmatmul.msk.bf16.gmra.mxu2 %vm143_vm2, %v8402_v9 }
  0x6a   :  { %5423 = vmatmul.msk.bf16.gmra.mxu3 %vm143_vm2, %v8402_v9 }
  0x78   :  { %5379 = vmatmul.msk.bf16.gmra.mxu0 %vm143_vm2, %v114_v16 }
  0x79   :  { %5386 = vmatmul.msk.bf16.gmra.mxu1 %vm143_vm2, %v114_v16  ;;  %5417 = vmatmul.msk.bf16.gmra.mxu2 %vm143_vm2, %v269_v17 }
  0x7a   :  { %5424 = vmatmul.msk.bf16.gmra.mxu3 %vm143_vm2, %v269_v17 }
  0x88   :  { %5455 = vmatmul.msk.bf16.vlgmr.msrb.gmra.mxu0 %vm143_vm2, %v8068_v54 }
  0x89   :  { %5462 = vmatmul.msk.bf16.vlgmr.msrb.gmra.mxu1 %vm143_vm2, %v8068_v54  ;;  %v5596_v54 = vor.u32 %v7711_v53, %v5595_v52  ;;  %v5591_v53 = vld [vmem:[%s10758_s4 + $0x1b8] sm:$0xf] }
  0x8b   :  { %1029 = vmatpush.bf16.msrb.mxu2 %v5596_v54  ;;  %v7709_v54 = vld [vmem:[%s10758_s4 + $0x1c0] sm:$0xf0] }
  0x8f   :  { %1030 = vmatpush.bf16.msrb.mxu2 %v5584_v7  ;;  %v5579_v7 = vld [vmem:[%s10758_s4 + $0x1a0] sm:$0xf] }
  0x95   :  { %v184_v18 = vpop.f32.mrf.mxu0 }
  0x96   :  { %v227_v19 = vpop.f32.mrf.mxu1 }
  0x98   :  { %5456 = vmatmul.msk.bf16.gmra.mxu0 %vm143_vm2, %v8069_v56 }
  0x99   :  { %5463 = vmatmul.msk.bf16.gmra.mxu1 %vm143_vm2, %v8069_v56 }
  0x9c   :  { %v334_v20 = vpop.f32.mrf.mxu2 }
  0x9d   :  { %v8426_v21 = vpop.f32.mrf.mxu0  ;;  %v8428_v22 = vadd.f32 %v334_v20, %v184_v18  ;;  %v377_v23 = vpop.f32.mrf.mxu3  ;;  %v5571_v20 = vld [vmem:[%s10758_s4 + $0x198] sm:$0xf] }
  0x9e   :  { %v8430_v24 = vpop.f32.mrf.mxu1  ;;  %v8432_v25 = vadd.f32 %v377_v23, %v227_v19  ;;  %v5643_v23 = vld [vmem:[%s10758_s4 + $0x228] sm:$0xf] }
  0xa4   :  { %v8434_v26 = vpop.f32.mrf.mxu2 }
  0xa5   :  { %v189_v27 = vpop.f32.mrf.mxu0  ;;  %v8436_v28 = vpop.f32.mrf.mxu3 }
  0xa6   :  { %v232_v29 = vpop.f32.mrf.mxu1 }
  0xa8   :  { %5457 = vmatmul.msk.bf16.gmra.mxu0 %vm143_vm2, %v8070_v0 }
  0xa9   :  { %5464 = vmatmul.msk.bf16.gmra.mxu1 %vm143_vm2, %v8070_v0 }
  0xac   :  { %v339_v30 = vpop.f32.mrf.mxu2 }
  0xad   :  { %v8440_v31 = vpop.f32.mrf.mxu0  ;;  %v8442_v32 = vadd.f32 %v339_v30, %v189_v27  ;;  %v382_v33 = vpop.f32.mrf.mxu3  ;;  %v419_v27 = vunpack.c.l.b16 %v68_v15  ;;  %v7723_v30 = vld [vmem:[%s10758_s4 + $0x230] sm:$0xf0]  ;;  %v7730_v15 = vld [vmem:[%s10758_s4 + $0x268] sm:$0xf0] }
  0xae   :  { %v8444_v34 = vpop.f32.mrf.mxu1  ;;  %v8446_v35 = vadd.f32 %v382_v33, %v232_v29  ;;  %v5615_v33 = vld [vmem:[%s10758_s4 + $0x1e8] sm:$0xf]  ;;  %v5644_v37 = vor.u32 %v7723_v30, %v5643_v23  ;;  %v7703_v23 = vld [vmem:[%s10758_s4 + $0x190] sm:$0xf0] }
  0xaf   :  { %v5616_v38 = vor.u32 %v7715_v36, %v5615_v33  ;;  %v421_v39 = vpack.c.b16 %v419_v27, %v419_v27  ;;  %v5663_v27 = vld [vmem:[%s10758_s4 + $0x248] sm:$0xf]  ;;  %v7727_v30 = vld [vmem:[%s10758_s4 + $0x250] sm:$0xf0] }
  0xb0   :  { %1071 = vmatpush.bf16.msrb.mxu3 %v5644_v37  ;;  %v5664_v37 = vor.u32 %v7727_v30, %v5663_v27  ;;  %v7721_v27 = vld [vmem:[%s10758_s4 + $0x220] sm:$0xf0] }
  0xb1   :  { %1180 = vmatpush.bf16.msra.mxu0 %v5616_v38 }
  0xb4   :  { %v8460_v42 = vpop.f32.mrf.mxu2 }
  0xb5   :  { %v194_v43 = vpop.f32.mrf.mxu0  ;;  %v8462_v44 = vpop.f32.mrf.mxu3 }
  0xb6   :  { %v237_v45 = vpop.f32.mrf.mxu1 }
  0xb8   :  { %5458 = vmatmul.msk.bf16.gmra.mxu0 %vm143_vm2, %v8379_v3 }
  0xb9   :  { %5465 = vmatmul.msk.bf16.gmra.mxu1 %vm143_vm2, %v8379_v3 }
  0xbc   :  { %v344_v46 = vpop.f32.mrf.mxu2 }
  0xbd   :  { %v8468_v47 = vpop.f32.mrf.mxu0  ;;  %v8470_v48 = vadd.f32 %v344_v46, %v194_v43  ;;  %v387_v49 = vpop.f32.mrf.mxu3  ;;  %v5603_v46 = vld [vmem:[%s10758_s4 + $0x1d0] sm:$0xf] }
  0xbe   :  { %v8472_v50 = vpop.f32.mrf.mxu1  ;;  %v8474_v51 = vadd.f32 %v387_v49, %v237_v45  ;;  %v7712_v49 = vld [vmem:[%s10758_s4 + $0x1d8] sm:$0xf0] }
  0xbf   :  { %v5604_v52 = vor.u32 %v7712_v49, %v5603_v46  ;;  %v5555_v46 = vld [vmem:[%s10758_s4 + $0x170] sm:$0xf] }
  0xc1   :  { %1181 = vmatpush.bf16.msra.mxu0 %v5604_v52  ;;  %v7700_v52 = vld [vmem:[%s10758_s4 + $0x178] sm:$0xf0] }
  0xc4   :  { %v8482_v55 = vpop.f32.mrf.mxu2 }
  0xc5   :  { %v199_v56 = vpop.f32.mrf.mxu0  ;;  %v8484_v57 = vpop.f32.mrf.mxu3 }
  0xc6   :  { %v242_v58 = vpop.f32.mrf.mxu1 }
  0xc8   :  { %5459 = vmatmul.msk.bf16.gmra.mxu0 %vm143_vm2, %v8402_v9 }
  0xc9   :  { %5466 = vmatmul.msk.bf16.gmra.mxu1 %vm143_vm2, %v8402_v9 }
  0xcc   :  { %v349_v62 = vpop.f32.mrf.mxu2 }
  0xcd   :  { %v8496_v63 = vpop.f32.mrf.mxu0  ;;  %v8498_v0 = vadd.f32 %v349_v62, %v199_v56  ;;  %v392_v1 = vpop.f32.mrf.mxu3  ;;  %v5592_v56 = vor.u32 %v7709_v54, %v5591_v53  ;;  %v5651_v53 = vld [vmem:[%s10758_s4 + $0x230] sm:$0xf]  ;;  %v7724_v54 = vld [vmem:[%s10758_s4 + $0x238] sm:$0xf0] }
  0xce   :  { %v8500_v3 = vpop.f32.mrf.mxu1  ;;  %v8502_v4 = vadd.f32 %v392_v1, %v242_v58 }
  0xcf   :  { %1182 = vmatpush.bf16.msra.mxu0 %v5592_v56  ;;  %v5556_v56 = vor.u32 %v7700_v52, %v5555_v46  ;;  %v5523_v46 = vld [vmem:[%s10758_s4 + $0x138] sm:$0xf] }
  0xd4   :  { %v8510_v8 = vpop.f32.mrf.mxu2 }
  0xd5   :  { %v204_v9 = vpop.f32.mrf.mxu0  ;;  %v8512_v11 = vpop.f32.mrf.mxu3 }
  0xd6   :  { %v247_v12 = vpop.f32.mrf.mxu1 }
  0xd8   :  { %5460 = vmatmul.msk.bf16.gmra.mxu0 %vm143_vm2, %v8407_v10 }
  0xd9   :  { %5467 = vmatmul.msk.bf16.gmra.mxu1 %vm143_vm2, %v8407_v10  ;;  %v7705_v10 = vld [vmem:[%s10758_s4 + $0x1a0] sm:$0xf0] }
  0xda   :  { %v5572_v29 = vor.u32 %v7705_v10, %v5571_v20  ;;  %v5567_v10 = vld [vmem:[%s10758_s4 + $0x188] sm:$0xf] }
  0xdc   :  { %v354_v13 = vpop.f32.mrf.mxu2  ;;  %1031 = vmatpush.bf16.msrb.mxu2 %v5572_v29  ;;  %v5568_v29 = vor.u32 %v7703_v23, %v5567_v10  ;;  %v5639_v23 = vld [vmem:[%s10758_s4 + $0x218] sm:$0xf] }
  0xdd   :  { %v8518_v14 = vpop.f32.mrf.mxu0  ;;  %v8523_v16 = vadd.f32 %v354_v13, %v204_v9  ;;  %v397_v17 = vpop.f32.mrf.mxu3  ;;  %v5560_v9 = vor.u32 %v7702_v6, %v5559_v5  ;;  %v5675_v13 = vld [vmem:[%s10758_s4 + $0x260] sm:$0xf]  ;;  %v7720_v5 = vld [vmem:[%s10758_s4 + $0x218] sm:$0xf0]  ;;  %v5535_v6 = vld [vmem:[%s10758_s4 + $0x150] sm:$0xf] }
  0xde   :  { %v8525_v18 = vpop.f32.mrf.mxu1  ;;  %v8527_v19 = vadd.f32 %v397_v17, %v247_v12  ;;  %v7706_v12 = vld [vmem:[%s10758_s4 + $0x1a8] sm:$0xf0]  ;;  %v5676_v20 = vor.u32 %v7730_v15, %v5675_v13  ;;  %v7697_v13 = vld [vmem:[%s10758_s4 + $0x160] sm:$0xf0] }
  0xdf   :  { %v5580_v17 = vor.u32 %v7706_v12, %v5579_v7  ;;  %v5543_v12 = vld [vmem:[%s10758_s4 + $0x158] sm:$0xf] }
  0xe0   :  { %1032 = vmatpush.bf16.msrb.mxu2 %v5560_v9  ;;  %1221 = vmatpush.bf16.msra.mxu1 %v5676_v20  ;;  %v7696_v9 = vld [vmem:[%s10758_s4 + $0x158] sm:$0xf0]  ;;  %v5544_v10 = vor.u32 %v7697_v13, %v5543_v12 }
  0xe1   :  { %1183 = vmatpush.bf16.msra.mxu0 %v5580_v17  ;;  %v5536_v20 = vor.u32 %v7696_v9, %v5535_v6  ;;  %v7718_v6 = vld [vmem:[%s10758_s4 + $0x208] sm:$0xf0] }
  0xe4   :  { %v8547_v40 = vpop.f32.mrf.mxu2  ;;  %1222 = vmatpush.bf16.msra.mxu1 %v5664_v37 }
  0xe5   :  { %v209_v41 = vpop.f32.mrf.mxu0  ;;  %v8549_v43 = vpop.f32.mrf.mxu3  ;;  %1184 = vmatpush.bf16.msra.mxu0 %v5568_v29 }
  0xe6   :  { %v252_v45 = vpop.f32.mrf.mxu1 }
  0xe8   :  { %5461 = vmatmul.msk.bf16.gmra.mxu0 %vm143_vm2, %v421_v39 }
  0xe9   :  { %5468 = vmatmul.msk.bf16.gmra.mxu1 %vm143_vm2, %v421_v39  ;;  %1185 = vmatpush.bf16.msra.mxu0 %v5556_v56  ;;  %v574_v56 = vld [vmem:[%s10759_s3] sm:$0x3] }
  0xea   :  { %v8680_v9 = vperm.slane %v574_v56, 0  ;;  %v8682_v13 = vperm.slane %v574_v56, 1 }
  0xec   :  { %v359_v58 = vpop.f32.mrf.mxu2 }
  0xed   :  { %v8565_v59 = vpop.f32.mrf.mxu0  ;;  %v8567_v60 = vadd.f32 %v359_v58, %v209_v41  ;;  %v402_v61 = vpop.f32.mrf.mxu3  ;;  %v5547_v41 = vld [vmem:[%s10758_s4 + $0x168] sm:$0xf]  ;;  %v5652_v58 = vor.u32 %v7724_v54, %v5651_v53  ;;  %1186 = vmatpush.bf16.msra.mxu0 %v5544_v10  ;;  %v5531_v53 = vld [vmem:[%s10758_s4 + $0x140] sm:$0xf]  ;;  %v7694_v54 = vld [vmem:[%s10758_s4 + $0x148] sm:$0xf0] }
  0xee   :  { %v8569_v62 = vpop.f32.mrf.mxu1  ;;  %v8571_v1 = vadd.f32 %v402_v61, %v252_v45  ;;  %v7699_v45 = vld [vmem:[%s10758_s4 + $0x170] sm:$0xf0]  ;;  %v5631_v61 = vld [vmem:[%s10758_s4 + $0x210] sm:$0xf] }
  0xef   :  { %v5548_v49 = vor.u32 %v7699_v45, %v5547_v41  ;;  %1223 = vmatpush.bf16.msra.mxu1 %v5652_v58  ;;  %v5632_v7 = vor.u32 %v7720_v5, %v5631_v61  ;;  %v5640_v41 = vor.u32 %v7721_v27, %v5639_v23  ;;  %v5532_v61 = vor.u32 %v7694_v54, %v5531_v53  ;;  %v5627_v5 = vld [vmem:[%s10758_s4 + $0x200] sm:$0xf] }
  0xf1   :  { %1033 = vmatpush.bf16.msrb.mxu2 %v5548_v49  ;;  %1072 = vmatpush.bf16.msrb.mxu3 %v5632_v7  ;;  %v7693_v49 = vld [vmem:[%s10758_s4 + $0x140] sm:$0xf0]  ;;  %v5628_v7 = vor.u32 %v7718_v6, %v5627_v5 }
  0xf2   :  { %v5524_v52 = vor.u32 %v7693_v49, %v5523_v46  ;;  %1187 = vmatpush.bf16.msra.mxu0 %v5532_v61  ;;  %v337_v46 = vadd.f32 %v8434_v26, %v8426_v21  ;;  %v380_v49 = vadd.f32 %v8436_v28, %v8430_v24 }
  0xf3   :  { %1224 = vmatpush.bf16.msra.mxu1 %v5640_v41 }
  0xf4   :  { %v8603_v33 = vpop.f32.mrf.mxu2 }
  0xf5   :  { %v214_v36 = vpop.f32.mrf.mxu0  ;;  %v8605_v38 = vpop.f32.mrf.mxu3  ;;  %1034 = vmatpush.bf16.msrb.mxu2 %v5536_v20 }
  0xf6   :  { %v257_v39 = vpop.f32.mrf.mxu1 }
  0xf7   :  { %1225 = vmatpush.bf16.msra.mxu1 %v5628_v7 }
  0xf9   :  { %1035 = vmatpush.bf16.msrb.mxu2 %v5524_v52 }
  0xfc   :  { %v364_v15 = vpop.f32.mrf.mxu2 }
  0xfd   :  { %v216_v17 = vpop.f32.mrf.mxu0  ;;  %v8649_v29 = vadd.f32 %v364_v15, %v214_v36  ;;  %v407_v30 = vpop.f32.mrf.mxu3  ;;  %v5619_v36 = vld [vmem:[%s10758_s4 + $0x1f8] sm:$0xf] }
  0xfe   :  { %v259_v37 = vpop.f32.mrf.mxu1  ;;  %v8651_v45 = vadd.f32 %v407_v30, %v257_v39  ;;  %v7717_v39 = vld [vmem:[%s10758_s4 + $0x200] sm:$0xf0] }
  0xff   :  { %v5620_v58 = vor.u32 %v7717_v39, %v5619_v36 }
 0x101   :  { %1073 = vmatpush.bf16.msrb.mxu3 %v5620_v58 }
 0x104   :  { %v366_v15 = vpop.f32.mrf.mxu2 }
 0x105   :  { %v471_v12 = vpop.f32.mrf.mxu0  ;;  %v409_v10 = vpop.f32.mrf.mxu3 }
 0x106   :  { %v548_v17 = vadd.f32 %v471_v12, %v8428_v22  ;;  %v514_v20 = vpop.f32.mrf.mxu1 }
 0x107   :  { %v549_v23 = vadd.f32 %v514_v20, %v8432_v25 }
 0x108   :  { %v580_v27 = vadd.f32 %v8680_v9, %v548_v17 }
 0x109   :  { %v581_v30 = vadd.f32 %v8682_v13, %v549_v23 }
 0x10a   :  { %v606_v37 = vmax.f32 %v580_v27, 0.0 }
 0x10b   :  { %v607_v41 = vmax.f32 %v581_v30, 0.0  ;;  %v342_v30 = vadd.f32 %v8460_v42, %v8440_v31 }
 0x10d   :  { %v632_v36 = vpack.c.bf16 %v607_v41, %v606_v37  ;;  %v473_v52 = vpop.f32.mrf.mxu0 }
 0x10e   :  { %v550_v39 = vadd.f32 %v473_v52, %v337_v46  ;;  %v516_v22 = vpop.f32.mrf.mxu1 }
 0x10f   :  { %v551_v53 = vadd.f32 %v516_v22, %v380_v49  ;;  %v1257_v6 = vunpack.c.l.b16 %v632_v36  ;;  %v1258_v26 = vunpack.c.h.b16 %v632_v36 }
 0x110   :  { %v582_v54 = vadd.f32 %v8680_v9, %v550_v39 }
 0x111   :  { %v583_v25 = vadd.f32 %v8682_v13, %v551_v53 }
 0x112   :  { %v608_v56 = vmax.f32 %v582_v54, 0.0 }
 0x113   :  { %v609_v58 = vmax.f32 %v583_v25, 0.0  ;;  %v7713_v25 = vld [vmem:[%s10758_s4 + $0x1e4] sm:$0xf] }
 0x115   :  { %v633_v61 = vpack.c.bf16 %v609_v58, %v608_v56  ;;  %v476_v5 = vpop.f32.mrf.mxu0  ;;  %v5609_v56 = vld [vmem:[%s10758_s4 + $0x1ec] sm:$0xf0]  ;;  %v7728_v58 = vld [vmem:[%s10758_s4 + $0x25c] sm:$0xf] }
 0x116   :  { %v552_v7 = vadd.f32 %v476_v5, %v8442_v32  ;;  %v519_v21 = vpop.f32.mrf.mxu1  ;;  %v385_v32 = vadd.f32 %v8462_v44, %v8444_v34 }
 0x117   :  { %v762_v12 = vunpack.c.h.b16 %v633_v61  ;;  %v553_v24 = vadd.f32 %v519_v21, %v8446_v35  ;;  %v761_v28 = vunpack.c.l.b16 %v633_v61 }
 0x118   :  { %v584_v15 = vadd.f32 %v8680_v9, %v552_v7  ;;  %v5669_v7 = vld [vmem:[%s10758_s4 + $0x264] sm:$0xf0] }
 0x119   :  { %v8697_v17 = vpack.c.b16 %v762_v12, %v1258_v26  ;;  %v585_v20 = vadd.f32 %v8682_v13, %v553_v24  ;;  %v8700_v10 = vpack.c.b16 %v761_v28, %v1257_v6  ;;  %v5612_v6 = vor.u32 %v7713_v25, %v5609_v56 }
 0x11a   :  { %v610_v23 = vmax.f32 %v584_v15, 0.0  ;;  %v5672_v24 = vor.u32 %v7728_v58, %v5669_v7 }
 0x11b   :  { %v611_v27 = vmax.f32 %v585_v20, 0.0  ;;  %1104 = vmatpush.bf16.msra.mxu2 %v5612_v6 }
 0x11c   :  { %1145 = vmatpush.bf16.msra.mxu3 %v5672_v24 }
 0x11d   :  { %v634_v37 = vpack.c.bf16 %v611_v27, %v610_v23  ;;  %v478_v41 = vpop.f32.mrf.mxu0 }
 0x11e   :  { %v554_v35 = vadd.f32 %v478_v41, %v342_v30  ;;  %v521_v46 = vpop.f32.mrf.mxu1  ;;  %v347_v30 = vadd.f32 %v8482_v55, %v8468_v47 }
 0x11f   :  { %v764_v49 = vunpack.c.h.b16 %v634_v37  ;;  %v555_v36 = vadd.f32 %v521_v46, %v385_v32  ;;  %v763_v52 = vunpack.c.l.b16 %v634_v37 }
 0x120   :  { %v586_v39 = vadd.f32 %v8680_v9, %v554_v35 }
 0x121   :  { %v587_v22 = vadd.f32 %v8682_v13, %v555_v36  ;;  %v8708_v53 = vpack.c.b16 %v763_v52, %v761_v28  ;;  %v8710_v54 = vpack.c.b16 %v764_v49, %v762_v12 }
 0x122   :  { %v612_v31 = vmax.f32 %v586_v39, 0.0 }
 0x123   :  { %v613_v42 = vmax.f32 %v587_v22, 0.0  ;;  %1036 = vmatmul.bf16.vlgmr.msrb.gmra.mxu2 %v8708_v53  ;;  %5677 = vmatmul.msk.bf16.vlgmr.msrb.gmra.mxu3 %vm1009_vm3, %v8710_v54 }
 0x124   :  { %1188 = vmatmul.bf16.vlgmr.msra.gmra.mxu0 %v8708_v53  ;;  %5689 = vmatmul.msk.bf16.vlgmr.msra.gmra.mxu1 %vm1009_vm3, %v8710_v54 }
 0x125   :  { %v635_v34 = vpack.c.bf16 %v613_v42, %v612_v31  ;;  %v481_v44 = vpop.f32.mrf.mxu0 }
 0x126   :  { %v556_v61 = vadd.f32 %v481_v44, %v8470_v48  ;;  %v524_v5 = vpop.f32.mrf.mxu1 }
 0x127   :  { %v557_v21 = vadd.f32 %v524_v5, %v8474_v51  ;;  %v765_v26 = vunpack.c.l.b16 %v635_v34  ;;  %v766_v12 = vunpack.c.h.b16 %v635_v34  ;;  %v390_v51 = vadd.f32 %v8484_v57, %v8472_v50  ;;  %v7710_v57 = vld [vmem:[%s10758_s4 + $0x1cc] sm:$0xf]  ;;  %v5597_v34 = vld [vmem:[%s10758_s4 + $0x1d4] sm:$0xf0] }
 0x128   :  { %v588_v28 = vadd.f32 %v8680_v9, %v556_v61  ;;  %v5600_v56 = vor.u32 %v7710_v57, %v5597_v34 }
 0x129   :  { %v589_v15 = vadd.f32 %v8682_v13, %v557_v21  ;;  %v8734_v20 = vpack.c.b16 %v765_v26, %v763_v52  ;;  %v8736_v23 = vpack.c.b16 %v766_v12, %v764_v49 }
 0x12a   :  { %v614_v48 = vmax.f32 %v588_v28, 0.0  ;;  %1105 = vmatpush.bf16.msra.mxu2 %v5600_v56  ;;  %v395_v28 = vadd.f32 %v8512_v11, %v8500_v3  ;;  %v5585_v11 = vld [vmem:[%s10758_s4 + $0x1bc] sm:$0xf0] }
 0x12b   :  { %v615_v27 = vmax.f32 %v589_v15, 0.0 }
 0x12d   :  { %v636_v32 = vpack.c.bf16 %v615_v27, %v614_v48  ;;  %v483_v37 = vpop.f32.mrf.mxu0 }
 0x12e   :  { %v558_v41 = vadd.f32 %v483_v37, %v347_v30  ;;  %v526_v35 = vpop.f32.mrf.mxu1  ;;  %v7725_v37 = vld [vmem:[%s10758_s4 + $0x244] sm:$0xf] }
 0x12f   :  { %v559_v46 = vadd.f32 %v526_v35, %v390_v51  ;;  %v767_v36 = vunpack.c.l.b16 %v636_v32  ;;  %v768_v39 = vunpack.c.h.b16 %v636_v32 }
 0x130   :  { %v590_v52 = vadd.f32 %v8680_v9, %v558_v41  ;;  %v5657_v41 = vld [vmem:[%s10758_s4 + $0x24c] sm:$0xf0] }
 0x131   :  { %v591_v49 = vadd.f32 %v8682_v13, %v559_v46  ;;  %v8744_v22 = vpack.c.b16 %v767_v36, %v765_v26  ;;  %v8746_v31 = vpack.c.b16 %v768_v39, %v766_v12 }
 0x132   :  { %v616_v42 = vmax.f32 %v590_v52, 0.0 }
 0x133   :  { %v617_v47 = vmax.f32 %v591_v49, 0.0  ;;  %1041 = vmatmul.bf16.gmra.mxu2 %v8744_v22  ;;  %5678 = vmatmul.msk.bf16.gmra.mxu3 %vm1009_vm3, %v8746_v31 }
 0x134   :  { %1193 = vmatmul.bf16.gmra.mxu0 %v8744_v22  ;;  %5690 = vmatmul.msk.bf16.gmra.mxu1 %vm1009_vm3, %v8746_v31 }
 0x135   :  { %v637_v50 = vpack.c.bf16 %v617_v47, %v616_v42  ;;  %v486_v55 = vpop.f32.mrf.mxu0  ;;  %v7674_v42 = vld [vmem:[%s10758_s4 + $0xac] sm:$0xf]  ;;  %v5783_v47 = vld [vmem:[%s10758_s4 + $0xb4] sm:$0xf0] }
 0x136   :  { %v560_v44 = vadd.f32 %v486_v55, %v8498_v0  ;;  %v529_v25 = vpop.f32.mrf.mxu1  ;;  %v352_v0 = vadd.f32 %v8510_v8, %v8496_v63  ;;  %v7707_v63 = vld [vmem:[%s10758_s4 + $0x1b4] sm:$0xf]  ;;  %v5660_v8 = vor.u32 %v7725_v37, %v5657_v41 }
 0x137   :  { %v561_v58 = vadd.f32 %v529_v25, %v8502_v4  ;;  %v769_v61 = vunpack.c.l.b16 %v637_v50  ;;  %v770_v5 = vunpack.c.h.b16 %v637_v50  ;;  %v5786_v50 = vor.u32 %v7674_v42, %v5783_v47 }
 0x138   :  { %v592_v6 = vadd.f32 %v8680_v9, %v560_v44  ;;  %1146 = vmatpush.bf16.msra.mxu3 %v5660_v8  ;;  %v7704_v8 = vld [vmem:[%s10758_s4 + $0x19c] sm:$0xf] }
 0x139   :  { %v593_v7 = vadd.f32 %v8682_v13, %v561_v58  ;;  %v8764_v21 = vpack.c.b16 %v769_v61, %v767_v36  ;;  %v8766_v26 = vpack.c.b16 %v770_v5, %v768_v39  ;;  %v5588_v39 = vor.u32 %v7707_v63, %v5585_v11  ;;  %1579 = vmatpush.bf16.msrb.mxu0 %v5786_v50  ;;  %v5645_v11 = vld [vmem:[%s10758_s4 + $0x234] sm:$0xf0]  ;;  %v7689_v50 = vld [vmem:[%s10758_s4 + $0x124] sm:$0xf] }
 0x13a   :  { %v618_v12 = vmax.f32 %v592_v6, 0.0 }
 0x13b   :  { %v619_v24 = vmax.f32 %v593_v7, 0.0  ;;  %1106 = vmatpush.bf16.msra.mxu2 %v5588_v39  ;;  %v5747_v39 = vld [vmem:[%s10758_s4 + $0x6c] sm:$0xf0] }
 0x13d   :  { %v638_v4 = vpack.c.bf16 %v619_v24, %v618_v12  ;;  %v488_v15 = vpop.f32.mrf.mxu0 }
 0x13e   :  { %v562_v48 = vadd.f32 %v488_v15, %v352_v0  ;;  %v531_v27 = vpop.f32.mrf.mxu1  ;;  %v357_v15 = vadd.f32 %v8547_v40, %v8518_v14  ;;  %v5573_v14 = vld [vmem:[%s10758_s4 + $0x1a4] sm:$0xf0] }
 0x13f   :  { %v563_v30 = vadd.f32 %v531_v27, %v395_v28  ;;  %v771_v51 = vunpack.c.l.b16 %v638_v4  ;;  %v772_v32 = vunpack.c.h.b16 %v638_v4  ;;  %v7668_v28 = vld [vmem:[%s10758_s4 + $0x7c] sm:$0xf]  ;;  %v5759_v4 = vld [vmem:[%s10758_s4 + $0x84] sm:$0xf0]  ;;  %v400_v27 = vadd.f32 %v8549_v43, %v8525_v18  ;;  %v7722_v18 = vld [vmem:[%s10758_s4 + $0x22c] sm:$0xf] }
 0x140   :  { %v594_v3 = vadd.f32 %v8680_v9, %v562_v48  ;;  %v5762_v48 = vor.u32 %v7668_v28, %v5759_v4  ;;  %v5576_v43 = vor.u32 %v7704_v8, %v5573_v14  ;;  %v5648_v47 = vor.u32 %v7722_v18, %v5645_v11  ;;  %v5831_v28 = vld [vmem:[%s10758_s4 + $0x114] sm:$0xf0]  ;;  %v7698_v4 = vld [vmem:[%s10758_s4 + $0x16c] sm:$0xf]  ;;  %v5819_v18 = vld [vmem:[%s10758_s4 + $0xfc] sm:$0xf0] }
 0x141   :  { %v595_v35 = vadd.f32 %v8682_v13, %v563_v30  ;;  %v8786_v46 = vpack.c.b16 %v771_v51, %v769_v61  ;;  %v8788_v36 = vpack.c.b16 %v772_v32, %v770_v5  ;;  %v7671_v61 = vld [vmem:[%s10758_s4 + $0x94] sm:$0xf]  ;;  %v5771_v5 = vld [vmem:[%s10758_s4 + $0x9c] sm:$0xf0] }
 0x142   :  { %v620_v52 = vmax.f32 %v594_v3, 0.0  ;;  %v5774_v7 = vor.u32 %v7671_v61, %v5771_v5  ;;  %1107 = vmatpush.bf16.msra.mxu2 %v5576_v43  ;;  %v7662_v5 = vld [vmem:[%s10758_s4 + $0x4c] sm:$0xf]  ;;  %1147 = vmatpush.bf16.msra.mxu3 %v5648_v47  ;;  %v5537_v43 = vld [vmem:[%s10758_s4 + $0x15c] sm:$0xf0] }
 0x143   :  { %v621_v49 = vmax.f32 %v595_v35, 0.0  ;;  %1046 = vmatmul.bf16.gmra.mxu2 %v8786_v46  ;;  %5679 = vmatmul.msk.bf16.gmra.mxu3 %vm1009_vm3, %v8788_v36  ;;  %v7665_v35 = vld [vmem:[%s10758_s4 + $0x64] sm:$0xf] }
 0x144   :  { %1198 = vmatmul.bf16.gmra.mxu0 %v8786_v46  ;;  %5691 = vmatmul.msk.bf16.gmra.mxu1 %vm1009_vm3, %v8788_v36 }
 0x145   :  { %v639_v55 = vpack.c.bf16 %v621_v49, %v620_v52  ;;  %v491_v57 = vpop.f32.mrf.mxu0  ;;  %1580 = vmatpush.bf16.msrb.mxu0 %v5774_v7  ;;  %v7686_v7 = vld [vmem:[%s10758_s4 + $0x10c] sm:$0xf] }
 0x146   :  { %v564_v34 = vadd.f32 %v491_v57, %v8523_v16  ;;  %v534_v44 = vpop.f32.mrf.mxu1 }
 0x147   :  { %v565_v25 = vadd.f32 %v534_v44, %v8527_v19  ;;  %v773_v56 = vunpack.c.l.b16 %v639_v55  ;;  %v774_v58 = vunpack.c.h.b16 %v639_v55  ;;  %v5843_v55 = vld [vmem:[%s10758_s4 + $0x12c] sm:$0xf0] }
 0x148   :  { %v596_v6 = vadd.f32 %v8680_v9, %v564_v34  ;;  %v5750_v34 = vor.u32 %v7665_v35, %v5747_v39  ;;  %v5846_v44 = vor.u32 %v7689_v50, %v5843_v55  ;;  %v5633_v39 = vld [vmem:[%s10758_s4 + $0x21c] sm:$0xf0] }
 0x149   :  { %v597_v12 = vadd.f32 %v8682_v13, %v565_v25  ;;  %v8812_v16 = vpack.c.b16 %v773_v56, %v771_v51  ;;  %v8814_v24 = vpack.c.b16 %v774_v58, %v772_v32  ;;  %1581 = vmatpush.bf16.msrb.mxu0 %v5762_v48 }
 0x14a   :  { %v622_v19 = vmax.f32 %v596_v6, 0.0  ;;  %v5735_v6 = vld [vmem:[%s10758_s4 + $0x54] sm:$0xf0]  ;;  %1620 = vmatpush.bf16.msrb.mxu1 %v5846_v44  ;;  %v7680_v44 = vld [vmem:[%s10758_s4 + $0xdc] sm:$0xf] }
 0x14b   :  { %v623_v0 = vmax.f32 %v597_v12, 0.0 }
 0x14d   :  { %v8826_v30 = vpack.c.bf16 %v623_v0, %v622_v19  ;;  %v493_v51 = vpop.f32.mrf.mxu0  ;;  %1582 = vmatpush.bf16.msrb.mxu0 %v5750_v34  ;;  %v5738_v0 = vor.u32 %v7662_v5, %v5735_v6  ;;  %v5711_v34 = vld [vmem:[%s10758_s4 + $0x24] sm:$0xf0]  ;;  %v7716_v6 = vld [vmem:[%s10758_s4 + $0x1fc] sm:$0xf] }
 0x14e   :  { %v566_v32 = vadd.f32 %v493_v51, %v357_v15  ;;  %v536_v37 = vpop.f32.mrf.mxu1  ;;  %v5549_v15 = vld [vmem:[%s10758_s4 + $0x174] sm:$0xf0] }
 0x14f   :  { %v567_v41 = vadd.f32 %v536_v37, %v400_v27  ;;  %v775_v63 = vunpack.c.l.b16 %v8826_v30  ;;  %v776_v3 = vunpack.c.h.b16 %v8826_v30  ;;  %v5834_v30 = vor.u32 %v7686_v7, %v5831_v28  ;;  %v5723_v37 = vld [vmem:[%s10758_s4 + $0x3c] sm:$0xf0]  ;;  %v5621_v7 = vld [vmem:[%s10758_s4 + $0x204] sm:$0xf0] }
 0x150   :  { %v598_v40 = vadd.f32 %v8680_v9, %v566_v32  ;;  %v5552_v51 = vor.u32 %v7698_v4, %v5549_v15  ;;  %v7659_v32 = vld [vmem:[%s10758_s4 + $0x34] sm:$0xf] }
 0x151   :  { %v599_v52 = vadd.f32 %v8682_v13, %v567_v41  ;;  %v8850_v49 = vpack.c.b16 %v775_v63, %v773_v56  ;;  %v8852_v42 = vpack.c.b16 %v776_v3, %v774_v58  ;;  %v7701_v56 = vld [vmem:[%s10758_s4 + $0x184] sm:$0xf]  ;;  %v5561_v58 = vld [vmem:[%s10758_s4 + $0x18c] sm:$0xf0]  ;;  %v7683_v41 = vld [vmem:[%s10758_s4 + $0xf4] sm:$0xf]  ;;  %v5726_v35 = vor.u32 %v7659_v32, %v5723_v37  ;;  %1583 = vmatpush.bf16.msrb.mxu0 %v5738_v0 }
 0x152   :  { %v624_v57 = vmax.f32 %v598_v40, 0.0  ;;  %v5564_v61 = vor.u32 %v7701_v56, %v5561_v58  ;;  %v7695_v40 = vld [vmem:[%s10758_s4 + $0x154] sm:$0xf]  ;;  %1621 = vmatpush.bf16.msrb.mxu1 %v5834_v30  ;;  %v7692_v58 = vld [vmem:[%s10758_s4 + $0x13c] sm:$0xf]  ;;  %v405_v0 = vadd.f32 %v8605_v38, %v8569_v62 }
 0x153   :  { %v625_v25 = vmax.f32 %v599_v52, 0.0  ;;  %1051 = vmatmul.bf16.gmra.mxu2 %v8850_v49  ;;  %5680 = vmatmul.msk.bf16.gmra.mxu3 %vm1009_vm3, %v8852_v42  ;;  %v7656_v52 = vld [vmem:[%s10758_s4 + $0x1c] sm:$0xf]  ;;  %v7653_v32 = vld [vmem:[%s10758_s4 + $0x4] sm:$0xf] }
 0x154   :  { %1203 = vmatmul.bf16.gmra.mxu0 %v8850_v49  ;;  %5692 = vmatmul.msk.bf16.gmra.mxu1 %vm1009_vm3, %v8852_v42  ;;  %v5714_v15 = vor.u32 %v7656_v52, %v5711_v34  ;;  %v7677_v37 = vld [vmem:[%s10758_s4 + $0xc4] sm:$0xf] }
 0x155   :  { %v8881_v12 = vpack.c.bf16 %v625_v25, %v624_v57  ;;  %v496_v19 = vpop.f32.mrf.mxu0  ;;  %1108 = vmatpush.bf16.msra.mxu2 %v5564_v61  ;;  %v5807_v25 = vld [vmem:[%s10758_s4 + $0xe4] sm:$0xf0]  ;;  %1584 = vmatpush.bf16.msrb.mxu0 %v5726_v35 }
 0x156   :  { %v568_v48 = vadd.f32 %v496_v19, %v8567_v60  ;;  %v539_v27 = vpop.f32.mrf.mxu1  ;;  %v5525_v61 = vld [vmem:[%s10758_s4 + $0x144] sm:$0xf0]  ;;  %v5624_v19 = vor.u32 %v7716_v6, %v5621_v7  ;;  %v5810_v30 = vor.u32 %v7680_v44, %v5807_v25 }
 0x157   :  { %v569_v8 = vadd.f32 %v539_v27, %v8571_v1  ;;  %v777_v60 = vunpack.c.l.b16 %v8881_v12  ;;  %v778_v14 = vunpack.c.h.b16 %v8881_v12  ;;  %v7719_v1 = vld [vmem:[%s10758_s4 + $0x214] sm:$0xf]  ;;  %v362_v12 = vadd.f32 %v8603_v33, %v8565_v59  ;;  %v5699_v59 = vld [vmem:[%s10758_s4 + $0xc] sm:$0xf0] }
 0x158   :  { %v600_v11 = vadd.f32 %v8680_v9, %v568_v48  ;;  %v5636_v57 = vor.u32 %v7719_v1, %v5633_v39 }
 0x159   :  { %v601_v47 = vadd.f32 %v8682_v13, %v569_v8  ;;  %v8925_v50 = vpack.c.b16 %v777_v60, %v775_v63  ;;  %v8927_v55 = vpack.c.b16 %v778_v14, %v776_v3  ;;  %1109 = vmatpush.bf16.msra.mxu2 %v5552_v51  ;;  %v5822_v63 = vor.u32 %v7683_v41, %v5819_v18  ;;  %v5795_v41 = vld [vmem:[%s10758_s4 + $0xcc] sm:$0xf0] }
 0x15a   :  { %v626_v56 = vmax.f32 %v600_v11, 0.0  ;;  %v5540_v3 = vor.u32 %v7695_v40, %v5537_v43  ;;  %1148 = vmatpush.bf16.msra.mxu3 %v5636_v57  ;;  %v5528_v51 = vor.u32 %v7692_v58, %v5525_v61  ;;  %1585 = vmatpush.bf16.msrb.mxu0 %v5714_v15  ;;  %v5702_v11 = vor.u32 %v7653_v32, %v5699_v59  ;;  %v5829_v15 = vld [vmem:[%s10758_s4 + $0x108] sm:$0xf] }
 0x15b   :  { %v627_v5 = vmax.f32 %v601_v47, 0.0  ;;  %1622 = vmatpush.bf16.msrb.mxu1 %v5822_v63  ;;  %v5798_v1 = vor.u32 %v7677_v37, %v5795_v41  ;;  %v7753_v37 = vld [vmem:[%s10758_s4 + $0x320] sm:$0xf0] }
 0x15d   :  { %v642_v28 = vpack.c.bf16 %v627_v5, %v626_v56  ;;  %v498_v4 = vpop.f32.mrf.mxu0  ;;  %1110 = vmatpush.bf16.msra.mxu2 %v5540_v3 }
 0x15e   :  { %v570_v48 = vadd.f32 %v498_v4, %v362_v12  ;;  %v541_v27 = vpop.f32.mrf.mxu1  ;;  %1149 = vmatpush.bf16.msra.mxu3 %v5624_v19  ;;  %1586 = vmatpush.bf16.msrb.mxu0 %v5702_v11  ;;  %v5841_v12 = vld [vmem:[%s10758_s4 + $0x120] sm:$0xf]  ;;  %v7666_v11 = vld [vmem:[%s10758_s4 + $0x68] sm:$0xf0] }
 0x15f   :  { %v8960_v33 = vunpack.c.l.b16 %v642_v28  ;;  %v8962_v62 = vunpack.c.h.b16 %v642_v28  ;;  %v571_v38 = vadd.f32 %v541_v27, %v405_v0  ;;  %1623 = vmatpush.bf16.msrb.mxu1 %v5810_v30  ;;  %v5769_v0 = vld [vmem:[%s10758_s4 + $0x90] sm:$0xf]  ;;  %v7672_v28 = vld [vmem:[%s10758_s4 + $0x98] sm:$0xf0] }
 0x160   :  { %v602_v8 = vadd.f32 %v8680_v9, %v570_v48  ;;  %v5770_v4 = vor.u32 %v7672_v28, %v5769_v0  ;;  %v7687_v48 = vld [vmem:[%s10758_s4 + $0x110] sm:$0xf0] }
 0x161   :  { %v603_v18 = vadd.f32 %v8682_v13, %v571_v38  ;;  %v8973_v40 = vpack.c.b16 %v8960_v33, %v777_v60  ;;  %v8976_v43 = vpack.c.b16 %v8962_v62, %v778_v14  ;;  %1111 = vmatpush.bf16.msra.mxu2 %v5528_v51  ;;  %v5830_v27 = vor.u32 %v7687_v48, %v5829_v15  ;;  %v6007_v38 = vld [vmem:[%s10758_s4 + $0x318] sm:$0xf]  ;;  %v5733_v15 = vld [vmem:[%s10758_s4 + $0x48] sm:$0xf]  ;;  %v7663_v48 = vld [vmem:[%s10758_s4 + $0x50] sm:$0xf0] }
 0x162   :  { %v628_v35 = vmax.f32 %v602_v8, 0.0  ;;  %v6008_v41 = vor.u32 %v7753_v37, %v6007_v38 }
 0x163   :  { %v629_v39 = vmax.f32 %v603_v18, 0.0  ;;  %1056 = vmatmul.bf16.gmra.mxu2 %v8973_v40  ;;  %5681 = vmatmul.msk.bf16.gmra.mxu3 %vm1009_vm3, %v8976_v43 }
 0x164   :  { %1208 = vmatmul.bf16.gmra.mxu0 %v8973_v40  ;;  %5693 = vmatmul.msk.bf16.gmra.mxu1 %vm1009_vm3, %v8976_v43 }
 0x165   :  { %v643_v60 = vpack.c.bf16 %v629_v39, %v628_v35  ;;  %v501_v14 = vpop.f32.mrf.mxu0  ;;  %1624 = vmatpush.bf16.msrb.mxu1 %v5798_v1  ;;  %2007 = vmatpush.bf16.msra.mxu0 %v6008_v41  ;;  %v5995_v35 = vld [vmem:[%s10758_s4 + $0x300] sm:$0xf]  ;;  %v7750_v39 = vld [vmem:[%s10758_s4 + $0x308] sm:$0xf0]  ;;  %v5721_v41 = vld [vmem:[%s10758_s4 + $0x30] sm:$0xf] }
 0x166   :  { %v572_v52 = vadd.f32 %v501_v14, %v8649_v29  ;;  %v544_v47 = vpop.f32.mrf.mxu1 }
 0x167   :  { %v782_v57 = vunpack.c.h.b16 %v643_v60  ;;  %v573_v34 = vadd.f32 %v544_v47, %v8651_v45  ;;  %v781_v44 = vunpack.c.l.b16 %v643_v60 }
 0x168   :  { %v604_v25 = vadd.f32 %v8680_v9, %v572_v52  ;;  %v5781_v9 = vld [vmem:[%s10758_s4 + $0xa8] sm:$0xf]  ;;  %v5996_v52 = vor.u32 %v7750_v39, %v5995_v35  ;;  %v6043_v35 = vld [vmem:[%s10758_s4 + $0x360] sm:$0xf] }
 0x169   :  { %v605_v56 = vadd.f32 %v8682_v13, %v573_v34  ;;  %v8989_v63 = vpack.c.b16 %v781_v44, %v8960_v33  ;;  %v8992_v58 = vpack.c.b16 %v782_v57, %v8962_v62  ;;  %v8996_v7 = vpack.c.b16 %v781_v44, %v781_v44  ;;  %v7675_v13 = vld [vmem:[%s10758_s4 + $0xb0] sm:$0xf0]  ;;  %v7684_v34 = vld [vmem:[%s10758_s4 + $0xf8] sm:$0xf0]  ;;  %v5983_v44 = vld [vmem:[%s10758_s4 + $0x2e8] sm:$0xf] }
 0x16a   :  { %v630_v3 = vmax.f32 %v604_v25, 0.0  ;;  %v8998_v45 = vpack.c.b16 %v782_v57, %v782_v57  ;;  %v5817_v57 = vld [vmem:[%s10758_s4 + $0xf0] sm:$0xf]  ;;  %2008 = vmatpush.bf16.msra.mxu0 %v5996_v52 }
 0x16b   :  { %v631_v61 = vmax.f32 %v605_v56, 0.0  ;;  %v5818_v25 = vor.u32 %v7684_v34, %v5817_v57  ;;  %v7747_v56 = vld [vmem:[%s10758_s4 + $0x2f0] sm:$0xf0]  ;;  %v5709_v34 = vld [vmem:[%s10758_s4 + $0x18] sm:$0xf] }
 0x16d   :  { %v8994_v5 = vpack.c.bf16 %v631_v61, %v630_v3  ;;  %v503_v29 = vpop.f32.mrf.mxu0  ;;  %v5984_v3 = vor.u32 %v7747_v56, %v5983_v44  ;;  %v7657_v44 = vld [vmem:[%s10758_s4 + $0x20] sm:$0xf0] }
 0x16e   :  { %v546_v6 = vpop.f32.mrf.mxu1  ;;  %v5710_v56 = vor.u32 %v7657_v44, %v5709_v34 }
 0x16f   :  { %2009 = vmatpush.bf16.msra.mxu0 %v5984_v3  ;;  %v7681_v3 = vld [vmem:[%s10758_s4 + $0xe0] sm:$0xf0] }
 0x173   :  { %1061 = vmatmul.bf16.gmra.mxu2 %v8996_v7  ;;  %5682 = vmatmul.msk.bf16.gmra.mxu3 %vm1009_vm3, %v8998_v45 }
 0x174   :  { %1213 = vmatmul.bf16.gmra.mxu0 %v8996_v7  ;;  %5694 = vmatmul.msk.bf16.gmra.mxu1 %vm1009_vm3, %v8998_v45 }
 0x183   :  { %1112 = vmatmul.bf16.vlgmr.msra.gmra.mxu2 %v8708_v53  ;;  %5683 = vmatmul.msk.bf16.vlgmr.msra.gmra.mxu3 %vm1009_vm3, %v8710_v54  ;;  %v5782_v53 = vor.u32 %v7675_v13, %v5781_v9  ;;  %v7690_v54 = vld [vmem:[%s10758_s4 + $0x128] sm:$0xf0]  ;;  %v5971_v9 = vld [vmem:[%s10758_s4 + $0x2d0] sm:$0xf]  ;;  %v7744_v13 = vld [vmem:[%s10758_s4 + $0x2d8] sm:$0xf0] }
 0x184   :  { %1587 = vmatmul.bf16.vlgmr.msrb.gmra.mxu0 %v8700_v10  ;;  %5857 = vmatmul.msk.bf16.vlgmr.msrb.gmra.mxu1 %vm1009_vm3, %v8697_v17  ;;  %v5842_v19 = vor.u32 %v7690_v54, %v5841_v12  ;;  %v6067_v12 = vld [vmem:[%s10758_s4 + $0x390] sm:$0xf]  ;;  %v5972_v0 = vor.u32 %v7744_v13, %v5971_v9  ;;  %v6031_v13 = vld [vmem:[%s10758_s4 + $0x348] sm:$0xf] }
 0x185   :  { %1503 = vmatpush.bf16.msrb.mxu2 %v5782_v53  ;;  %v7768_v53 = vld [vmem:[%s10758_s4 + $0x398] sm:$0xf0] }
 0x186   :  { %1544 = vmatpush.bf16.msrb.mxu3 %v5842_v19  ;;  %v6068_v28 = vor.u32 %v7768_v53, %v6067_v12  ;;  %2010 = vmatpush.bf16.msra.mxu0 %v5972_v0  ;;  %v7759_v12 = vld [vmem:[%s10758_s4 + $0x350] sm:$0xf0] }
 0x188   :  { %2048 = vmatpush.bf16.msra.mxu1 %v6068_v28 }
 0x189   :  { %1504 = vmatpush.bf16.msrb.mxu2 %v5770_v4 }
 0x18a   :  { %1545 = vmatpush.bf16.msrb.mxu3 %v5830_v27  ;;  %v5959_v27 = vld [vmem:[%s10758_s4 + $0x2b8] sm:$0xf] }
 0x18e   :  { %1546 = vmatpush.bf16.msrb.mxu3 %v5818_v25  ;;  %v5805_v25 = vld [vmem:[%s10758_s4 + $0xd8] sm:$0xf] }
 0x18f   :  { %v5806_v9 = vor.u32 %v7681_v3, %v5805_v25  ;;  %v9224_v3 = vpack.c.b16 %v8962_v62, %v8962_v62 }
 0x192   :  { %1547 = vmatpush.bf16.msrb.mxu3 %v5806_v9 }
 0x193   :  { %1117 = vmatmul.bf16.gmra.mxu2 %v8744_v22  ;;  %5684 = vmatmul.msk.bf16.gmra.mxu3 %vm1009_vm3, %v8746_v31  ;;  %v5757_v22 = vld [vmem:[%s10758_s4 + $0x78] sm:$0xf]  ;;  %v7669_v31 = vld [vmem:[%s10758_s4 + $0x80] sm:$0xf0] }
 0x194   :  { %1592 = vmatmul.bf16.gmra.mxu0 %v8734_v20  ;;  %5858 = vmatmul.msk.bf16.gmra.mxu1 %vm1009_vm3, %v8736_v23  ;;  %v5758_v30 = vor.u32 %v7669_v31, %v5757_v22  ;;  %v6055_v22 = vld [vmem:[%s10758_s4 + $0x378] sm:$0xf]  ;;  %v7765_v31 = vld [vmem:[%s10758_s4 + $0x380] sm:$0xf0] }
 0x196   :  { %1505 = vmatpush.bf16.msrb.mxu2 %v5758_v30 }
 0x1a1   :  { %v1189_v51 = vpop.f32.mrf.mxu0  ;;  %v1227_v32 = vpop.f32.mrf.mxu1 }
 0x1a2   :  { %v9048_v59 = vadd.f32 %v1227_v32, %v1189_v51  ;;  %v6056_v51 = vor.u32 %v7765_v31, %v6055_v22  ;;  %v5923_v22 = vld [vmem:[%s10758_s4 + $0x270] sm:$0xf]  ;;  %v7732_v31 = vld [vmem:[%s10758_s4 + $0x278] sm:$0xf0] }
 0x1a3   :  { %1122 = vmatmul.bf16.gmra.mxu2 %v8786_v46  ;;  %5685 = vmatmul.msk.bf16.gmra.mxu3 %vm1009_vm3, %v8788_v36  ;;  %v5745_v36 = vld [vmem:[%s10758_s4 + $0x60] sm:$0xf] }
 0x1a4   :  { %1597 = vmatmul.bf16.gmra.mxu0 %v8764_v21  ;;  %5859 = vmatmul.msk.bf16.gmra.mxu1 %vm1009_vm3, %v8766_v26  ;;  %v5746_v1 = vor.u32 %v7666_v11, %v5745_v36  ;;  %v7738_v11 = vld [vmem:[%s10758_s4 + $0x2a8] sm:$0xf0] }
 0x1a5   :  { %2049 = vmatpush.bf16.msra.mxu1 %v6056_v51 }
 0x1a6   :  { %v1037_v8 = vpop.f32.mrf.mxu2  ;;  %v1075_v18 = vpop.f32.mrf.mxu3  ;;  %1506 = vmatpush.bf16.msrb.mxu2 %v5746_v1  ;;  %v7762_v1 = vld [vmem:[%s10758_s4 + $0x368] sm:$0xf0] }
 0x1a7   :  { %v9062_v46 = vadd.f32 %v1075_v18, %v1037_v8  ;;  %v7660_v8 = vld [vmem:[%s10758_s4 + $0x38] sm:$0xf0]  ;;  %v5947_v18 = vld [vmem:[%s10758_s4 + $0x2a0] sm:$0xf]  ;;  %v6044_v52 = vor.u32 %v7762_v1, %v6043_v35 }
 0x1a8   :  { %v5722_v36 = vor.u32 %v7660_v8, %v5721_v41  ;;  %v6019_v41 = vld [vmem:[%s10758_s4 + $0x330] sm:$0xf]  ;;  %v7756_v8 = vld [vmem:[%s10758_s4 + $0x338] sm:$0xf0] }
 0x1a9   :  { %v1191_v60 = vpop.f32.mrf.mxu0  ;;  %v1229_v14 = vpop.f32.mrf.mxu1  ;;  %2050 = vmatpush.bf16.msra.mxu1 %v6044_v52 }
 0x1aa   :  { %v9076_v47 = vadd.f32 %v1229_v14, %v1191_v60  ;;  %v5948_v14 = vor.u32 %v7738_v11, %v5947_v18 }
 0x1ae   :  { %v1039_v61 = vpop.f32.mrf.mxu2  ;;  %v1077_v29 = vpop.f32.mrf.mxu3 }
 0x1af   :  { %v9090_v6 = vadd.f32 %v1077_v29, %v1039_v61  ;;  %v5935_v61 = vld [vmem:[%s10758_s4 + $0x288] sm:$0xf]  ;;  %v7735_v29 = vld [vmem:[%s10758_s4 + $0x290] sm:$0xf0] }
 0x1b0   :  { %v5936_v53 = vor.u32 %v7735_v29, %v5935_v61 }
 0x1b1   :  { %v1194_v54 = vpop.f32.mrf.mxu0  ;;  %v1232_v19 = vpop.f32.mrf.mxu1 }
 0x1b2   :  { %v9104_v4 = vadd.f32 %v1232_v19, %v1194_v54  ;;  %v6032_v54 = vor.u32 %v7759_v12, %v6031_v13 }
 0x1b3   :  { %1127 = vmatmul.bf16.gmra.mxu2 %v8850_v49  ;;  %5686 = vmatmul.msk.bf16.gmra.mxu3 %vm1009_vm3, %v8852_v42  ;;  %v5734_v49 = vor.u32 %v7663_v48, %v5733_v15  ;;  %v7741_v42 = vld [vmem:[%s10758_s4 + $0x2c0] sm:$0xf0]  ;;  %v5697_v15 = vld [vmem:[%s10758_s4] sm:$0xf]  ;;  %v7654_v48 = vld [vmem:[%s10758_s4 + $0x8] sm:$0xf0] }
 0x1b4   :  { %1602 = vmatmul.bf16.gmra.mxu0 %v8812_v16  ;;  %5860 = vmatmul.msk.bf16.gmra.mxu1 %vm1009_vm3, %v8814_v24  ;;  %v5960_v30 = vor.u32 %v7741_v42, %v5959_v27  ;;  %v5793_v27 = vld [vmem:[%s10758_s4 + $0xc0] sm:$0xf]  ;;  %v7678_v42 = vld [vmem:[%s10758_s4 + $0xc8] sm:$0xf0] }
 0x1b5   :  { %1507 = vmatpush.bf16.msrb.mxu2 %v5734_v49  ;;  %v5698_v49 = vor.u32 %v7654_v48, %v5697_v15  ;;  %2051 = vmatpush.bf16.msra.mxu1 %v6032_v54  ;;  %v7676_v15 = vld [vmem:[%s10758_s4 + $0xb8] sm:$0xf0]  ;;  %v5849_v48 = vld [vmem:[%s10758_s4 + $0x128] sm:$0xf] }
 0x1b6   :  { %v1042_v32 = vpop.f32.mrf.mxu2  ;;  %v1080_v38 = vpop.f32.mrf.mxu3  ;;  %2011 = vmatpush.bf16.msra.mxu0 %v5960_v30 }
 0x1b7   :  { %v9130_v37 = vadd.f32 %v1080_v38, %v1042_v32  ;;  %v5794_v32 = vor.u32 %v7678_v42, %v5793_v27  ;;  %v5924_v38 = vor.u32 %v7732_v31, %v5923_v22 }
 0x1b9   :  { %v1196_v39 = vpop.f32.mrf.mxu0  ;;  %v1234_v60 = vpop.f32.mrf.mxu1  ;;  %1508 = vmatpush.bf16.msrb.mxu2 %v5722_v36  ;;  %v6020_v36 = vor.u32 %v7756_v8, %v6019_v41  ;;  %1548 = vmatpush.bf16.msrb.mxu3 %v5794_v32 }
 0x1ba   :  { %v9150_v57 = vadd.f32 %v1234_v60, %v1196_v39  ;;  %2012 = vmatpush.bf16.msra.mxu0 %v5948_v14 }
 0x1bb   :  { %2052 = vmatpush.bf16.msra.mxu1 %v6020_v36 }
 0x1bd   :  { %1509 = vmatpush.bf16.msrb.mxu2 %v5710_v56  ;;  %v9220_v56 = vpack.c.b16 %v8960_v33, %v8960_v33 }
 0x1be   :  { %v1044_v19 = vpop.f32.mrf.mxu2  ;;  %v1082_v0 = vpop.f32.mrf.mxu3  ;;  %2013 = vmatpush.bf16.msra.mxu0 %v5936_v53 }
 0x1bf   :  { %v9176_v28 = vadd.f32 %v1082_v0, %v1044_v19  ;;  %v5789_v0 = vld [vmem:[%s10758_s4 + $0xb0] sm:$0xf] }
 0x1c0   :  { %v5790_v27 = vor.u32 %v7676_v15, %v5789_v0 }
 0x1c1   :  { %v1199_v30 = vpop.f32.mrf.mxu0  ;;  %v1237_v51 = vpop.f32.mrf.mxu1  ;;  %1510 = vmatpush.bf16.msrb.mxu2 %v5698_v49  ;;  %v7691_v49 = vld [vmem:[%s10758_s4 + $0x130] sm:$0xf0] }
 0x1c2   :  { %v9202_v18 = vadd.f32 %v1237_v51, %v1199_v30  ;;  %2014 = vmatpush.bf16.msra.mxu0 %v5924_v38  ;;  %v5850_v42 = vor.u32 %v7691_v49, %v5849_v48 }
 0x1c3   :  { %1132 = vmatmul.bf16.gmra.mxu2 %v8973_v40  ;;  %5687 = vmatmul.msk.bf16.gmra.mxu3 %vm1009_vm3, %v8976_v43 }
 0x1c4   :  { %1607 = vmatmul.bf16.gmra.mxu0 %v8925_v50  ;;  %5861 = vmatmul.msk.bf16.gmra.mxu1 %vm1009_vm3, %v8927_v55 }
 0x1c5   :  { %1655 = vmatpush.bf16.msra.mxu2 %v5790_v27  ;;  %1696 = vmatpush.bf16.msra.mxu3 %v5850_v42  ;;  %v6015_v42 = vld [vmem:[%s10758_s4 + $0x320] sm:$0xf] }
 0x1c6   :  { %v1047_v11 = vpop.f32.mrf.mxu2  ;;  %v1085_v35 = vpop.f32.mrf.mxu3 }
 0x1c7   :  { %v9210_v1 = vadd.f32 %v1085_v35, %v1047_v11 }
 0x1c9   :  { %v1201_v39 = vpop.f32.mrf.mxu0  ;;  %v1239_v60 = vpop.f32.mrf.mxu1 }
 0x1ca   :  { %v9212_v14 = vadd.f32 %v1239_v60, %v1201_v39  ;;  %v5777_v39 = vld [vmem:[%s10758_s4 + $0x98] sm:$0xf]  ;;  %v7673_v60 = vld [vmem:[%s10758_s4 + $0xa0] sm:$0xf0] }
 0x1ce   :  { %v1049_v40 = vpop.f32.mrf.mxu2  ;;  %v1087_v52 = vpop.f32.mrf.mxu3 }
 0x1cf   :  { %v9214_v34 = vadd.f32 %v1087_v52, %v1049_v40  ;;  %v5778_v52 = vor.u32 %v7673_v60, %v5777_v39 }
 0x1d1   :  { %v1204_v43 = vpop.f32.mrf.mxu0  ;;  %v1242_v44 = vpop.f32.mrf.mxu1  ;;  %1656 = vmatpush.bf16.msra.mxu2 %v5778_v52 }
 0x1d2   :  { %v9216_v25 = vadd.f32 %v1242_v44, %v1204_v43 }
 0x1d3   :  { %1137 = vmatmul.bf16.gmra.mxu2 %v8996_v7  ;;  %5688 = vmatmul.msk.bf16.gmra.mxu3 %vm1009_vm3, %v8998_v45 }
 0x1d4   :  { %1612 = vmatmul.bf16.gmra.mxu0 %v9220_v56  ;;  %5862 = vmatmul.msk.bf16.gmra.mxu1 %vm1009_vm3, %v9224_v3 }
 0x1d6   :  { %v1052_v61 = vpop.f32.mrf.mxu2  ;;  %v1090_v29 = vpop.f32.mrf.mxu3 }
 0x1d7   :  { %v9232_v9 = vadd.f32 %v1090_v29, %v1052_v61 }
 0x1d9   :  { %v1206_v33 = vpop.f32.mrf.mxu0  ;;  %v1244_v13 = vpop.f32.mrf.mxu1 }
 0x1da   :  { %v9234_v12 = vadd.f32 %v1244_v13, %v1206_v33  ;;  %v5837_v13 = vld [vmem:[%s10758_s4 + $0x110] sm:$0xf] }
 0x1de   :  { %v1054_v62 = vpop.f32.mrf.mxu2  ;;  %v1092_v53 = vpop.f32.mrf.mxu3 }
 0x1df   :  { %v9236_v54 = vadd.f32 %v1092_v53, %v1054_v62  ;;  %v7688_v62 = vld [vmem:[%s10758_s4 + $0x118] sm:$0xf0]  ;;  %v5765_v53 = vld [vmem:[%s10758_s4 + $0x80] sm:$0xf] }
 0x1e1   :  { %v1209_v7 = vpop.f32.mrf.mxu0  ;;  %v1247_v19 = vpop.f32.mrf.mxu1 }
 0x1e2   :  { %v9238_v45 = vadd.f32 %v1247_v19, %v1209_v7  ;;  %v5838_v7 = vor.u32 %v7688_v62, %v5837_v13  ;;  %v7670_v19 = vld [vmem:[%s10758_s4 + $0x88] sm:$0xf0]  ;;  %v7685_v13 = vld [vmem:[%s10758_s4 + $0x100] sm:$0xf0]  ;;  %v5991_v62 = vld [vmem:[%s10758_s4 + $0x2f0] sm:$0xf] }
 0x1e3   :  { %1511 = vmatmul.bf16.vlgmr.msrb.gmra.mxu2 %v8700_v10  ;;  %5851 = vmatmul.msk.bf16.vlgmr.msrb.gmra.mxu3 %vm1009_vm3, %v8697_v17  ;;  %v5766_v0 = vor.u32 %v7670_v19, %v5765_v53  ;;  %v7748_v53 = vld [vmem:[%s10758_s4 + $0x2f8] sm:$0xf0] }
 0x1e4   :  { %2015 = vmatmul.bf16.vlgmr.msra.gmra.mxu0 %v8734_v20  ;;  %6077 = vmatmul.msk.bf16.vlgmr.msra.gmra.mxu1 %vm1009_vm3, %v8736_v23  ;;  %v5992_v19 = vor.u32 %v7748_v53, %v5991_v62 }
 0x1e5   :  { %1697 = vmatpush.bf16.msra.mxu3 %v5838_v7  ;;  %1657 = vmatpush.bf16.msra.mxu2 %v5766_v0 }
 0x1e6   :  { %v1057_v22 = vpop.f32.mrf.mxu2  ;;  %v1095_v31 = vpop.f32.mrf.mxu3 }
 0x1e7   :  { %v9258_v30 = vadd.f32 %v1095_v31, %v1057_v22  ;;  %v7754_v22 = vld [vmem:[%s10758_s4 + $0x328] sm:$0xf0] }
 0x1e8   :  { %v6016_v31 = vor.u32 %v7754_v22, %v6015_v42  ;;  %v5979_v42 = vld [vmem:[%s10758_s4 + $0x2d8] sm:$0xf]  ;;  %v7745_v22 = vld [vmem:[%s10758_s4 + $0x2e0] sm:$0xf0] }
 0x1e9   :  { %v1211_v51 = vpop.f32.mrf.mxu0  ;;  %v1249_v32 = vpop.f32.mrf.mxu1 }
 0x1ea   :  { %v9260_v38 = vadd.f32 %v1249_v32, %v1211_v51  ;;  %2159 = vmatpush.bf16.msrb.mxu0 %v6016_v31  ;;  %v6075_v31 = vld [vmem:[%s10758_s4 + $0x398] sm:$0xf] }
 0x1ee   :  { %v1059_v41 = vpop.f32.mrf.mxu2  ;;  %v1097_v8 = vpop.f32.mrf.mxu3 }
 0x1ef   :  { %v9262_v36 = vadd.f32 %v1097_v8, %v1059_v41  ;;  %v6003_v8 = vld [vmem:[%s10758_s4 + $0x308] sm:$0xf] }
 0x1f1   :  { %v1214_v11 = vpop.f32.mrf.mxu0  ;;  %v1252_v35 = vpop.f32.mrf.mxu1 }
 0x1f2   :  { %v9270_v40 = vadd.f32 %v1252_v35, %v1214_v11  ;;  %v7751_v11 = vld [vmem:[%s10758_s4 + $0x310] sm:$0xf0] }
 0x1f3   :  { %1516 = vmatmul.bf16.gmra.mxu2 %v8734_v20  ;;  %5852 = vmatmul.msk.bf16.gmra.mxu3 %vm1009_vm3, %v8736_v23  ;;  %v6004_v35 = vor.u32 %v7751_v11, %v6003_v8 }
 0x1f4   :  { %2020 = vmatmul.bf16.gmra.mxu0 %v8764_v21  ;;  %6078 = vmatmul.msk.bf16.gmra.mxu1 %vm1009_vm3, %v8766_v26 }
 0x1f5   :  { %2160 = vmatpush.bf16.msrb.mxu0 %v6004_v35  ;;  %v5741_v35 = vld [vmem:[%s10758_s4 + $0x50] sm:$0xf] }
 0x1f6   :  { %v1062_v43 = vpop.f32.mrf.mxu2  ;;  %v1100_v44 = vpop.f32.mrf.mxu3 }
 0x1f7   :  { %v9278_v61 = vadd.f32 %v1100_v44, %v1062_v43  ;;  %v5753_v43 = vld [vmem:[%s10758_s4 + $0x68] sm:$0xf]  ;;  %v7667_v44 = vld [vmem:[%s10758_s4 + $0x70] sm:$0xf0] }
 0x1f9   :  { %v1216_v29 = vpop.f32.mrf.mxu0  ;;  %v1254_v33 = vpop.f32.mrf.mxu1  ;;  %2161 = vmatpush.bf16.msrb.mxu0 %v5992_v19 }
 0x1fa   :  { %v5825_v29 = vld [vmem:[%s10758_s4 + $0xf8] sm:$0xf]  ;;  %v5754_v33 = vor.u32 %v7667_v44, %v5753_v43 }
 0x1fb   :  { %v5826_v7 = vor.u32 %v7685_v13, %v5825_v29  ;;  %v7742_v29 = vld [vmem:[%s10758_s4 + $0x2c8] sm:$0xf0] }
 0x1fc   :  { %1658 = vmatpush.bf16.msra.mxu2 %v5754_v33  ;;  %v6063_v33 = vld [vmem:[%s10758_s4 + $0x380] sm:$0xf]  ;;  %v7766_v13 = vld [vmem:[%s10758_s4 + $0x388] sm:$0xf0] }
 0x1fd   :  { %1698 = vmatpush.bf16.msra.mxu3 %v5826_v7  ;;  %v6064_v62 = vor.u32 %v7766_v13, %v6063_v33  ;;  %v5943_v13 = vld [vmem:[%s10758_s4 + $0x290] sm:$0xf] }
 0x1fe   :  { %v1064_v15 = vpop.f32.mrf.mxu2  ;;  %v1102_v48 = vpop.f32.mrf.mxu3 }
 0x201   :  { %v1588_v27 = vpop.f32.mrf.mxu0  ;;  %v1626_v49 = vpop.f32.mrf.mxu1 }
 0x203   :  { %1521 = vmatmul.bf16.gmra.mxu2 %v8764_v21  ;;  %5853 = vmatmul.msk.bf16.gmra.mxu3 %vm1009_vm3, %v8766_v26 }
 0x204   :  { %2025 = vmatmul.bf16.gmra.mxu0 %v8812_v16  ;;  %6079 = vmatmul.msk.bf16.gmra.mxu1 %vm1009_vm3, %v8814_v24 }
 0x206   :  { %v1113_v51 = vpop.f32.mrf.mxu2  ;;  %v1151_v32 = vpop.f32.mrf.mxu3 }
 0x207   :  { %v1152_v41 = vadd.f32 %v1151_v32, %v1113_v51  ;;  %v7769_v51 = vld [vmem:[%s10758_s4 + $0x3a0] sm:$0xf0] }
 0x208   :  { %v6076_v11 = vor.u32 %v7769_v51, %v6075_v31  ;;  %v6051_v31 = vld [vmem:[%s10758_s4 + $0x368] sm:$0xf] }
 0x209   :  { %v1589_v39 = vadd.f32 %v1588_v27, %v1152_v41  ;;  %v1590_v60 = vpop.f32.mrf.mxu0  ;;  %v1628_v52 = vpop.f32.mrf.mxu1 }
 0x20a   :  { %2200 = vmatpush.bf16.msrb.mxu1 %v6076_v11 }
 0x20b   :  { %v9328_v0 = vadd.f32 %v1626_v49, %v1589_v39  ;;  %v5980_v49 = vor.u32 %v7745_v22, %v5979_v42  ;;  %v7664_v39 = vld [vmem:[%s10758_s4 + $0x58] sm:$0xf0]  ;;  %v7739_v22 = vld [vmem:[%s10758_s4 + $0x2b0] sm:$0xf0] }
 0x20c   :  { %v5742_v44 = vor.u32 %v7664_v39, %v5741_v35 }
 0x20d   :  { %2162 = vmatpush.bf16.msrb.mxu0 %v5980_v49  ;;  %v7763_v49 = vld [vmem:[%s10758_s4 + $0x370] sm:$0xf0] }
 0x20e   :  { %v1115_v15 = vpop.f32.mrf.mxu2  ;;  %v1153_v48 = vpop.f32.mrf.mxu3  ;;  %1659 = vmatpush.bf16.msra.mxu2 %v5742_v44  ;;  %2201 = vmatpush.bf16.msrb.mxu1 %v6064_v62  ;;  %v6052_v39 = vor.u32 %v7763_v49, %v6051_v31  ;;  %v7658_v44 = vld [vmem:[%s10758_s4 + $0x28] sm:$0xf0]  ;;  %v5705_v31 = vld [vmem:[%s10758_s4 + $0x8] sm:$0xf]  ;;  %v7655_v49 = vld [vmem:[%s10758_s4 + $0x10] sm:$0xf0] }
 0x20f   :  { %v1154_v27 = vadd.f32 %v1153_v48, %v1115_v15  ;;  %v5729_v15 = vld [vmem:[%s10758_s4 + $0x38] sm:$0xf]  ;;  %v7661_v48 = vld [vmem:[%s10758_s4 + $0x40] sm:$0xf0] }
 0x210   :  { %v5730_v42 = vor.u32 %v7661_v48, %v5729_v15 }
 0x211   :  { %v1591_v32 = vadd.f32 %v1590_v60, %v1154_v27  ;;  %v1593_v41 = vpop.f32.mrf.mxu0  ;;  %v1631_v8 = vpop.f32.mrf.mxu1  ;;  %v5967_v60 = vld [vmem:[%s10758_s4 + $0x2c0] sm:$0xf]  ;;  %v5955_v27 = vld [vmem:[%s10758_s4 + $0x2a8] sm:$0xf] }
 0x212   :  { %v5956_v35 = vor.u32 %v7739_v22, %v5955_v27  ;;  %1660 = vmatpush.bf16.msra.mxu2 %v5730_v42  ;;  %2202 = vmatpush.bf16.msrb.mxu1 %v6052_v39  ;;  %v5931_v39 = vld [vmem:[%s10758_s4 + $0x278] sm:$0xf] }
 0x213   :  { %1526 = vmatmul.bf16.gmra.mxu2 %v8812_v16  ;;  %5854 = vmatmul.msk.bf16.gmra.mxu3 %vm1009_vm3, %v8814_v24  ;;  %v9354_v43 = vadd.f32 %v1628_v52, %v1591_v32  ;;  %v5968_v52 = vor.u32 %v7742_v29, %v5967_v60  ;;  %v5717_v60 = vld [vmem:[%s10758_s4 + $0x20] sm:$0xf] }
 0x214   :  { %2030 = vmatmul.bf16.gmra.mxu0 %v8925_v50  ;;  %6080 = vmatmul.msk.bf16.gmra.mxu1 %vm1009_vm3, %v8927_v55  ;;  %v5813_v29 = vld [vmem:[%s10758_s4 + $0xe0] sm:$0xf]  ;;  %v5718_v33 = vor.u32 %v7658_v44, %v5717_v60  ;;  %v7733_v60 = vld [vmem:[%s10758_s4 + $0x280] sm:$0xf0] }
 0x215   :  { %2163 = vmatpush.bf16.msrb.mxu0 %v5968_v52  ;;  %v7736_v52 = vld [vmem:[%s10758_s4 + $0x298] sm:$0xf0] }
 0x216   :  { %v1118_v53 = vpop.f32.mrf.mxu2  ;;  %v1156_v7 = vpop.f32.mrf.mxu3  ;;  %1661 = vmatpush.bf16.msra.mxu2 %v5718_v33 }
 0x217   :  { %v1157_v19 = vadd.f32 %v1156_v7, %v1118_v53  ;;  %v5944_v53 = vor.u32 %v7736_v52, %v5943_v13  ;;  %v6039_v7 = vld [vmem:[%s10758_s4 + $0x350] sm:$0xf]  ;;  %v5932_v13 = vor.u32 %v7733_v60, %v5931_v39  ;;  %v6027_v52 = vld [vmem:[%s10758_s4 + $0x338] sm:$0xf] }
 0x219   :  { %v1594_v51 = vadd.f32 %v1593_v41, %v1157_v19  ;;  %v1595_v32 = vpop.f32.mrf.mxu0  ;;  %v1633_v11 = vpop.f32.mrf.mxu1  ;;  %v7682_v41 = vld [vmem:[%s10758_s4 + $0xe8] sm:$0xf0]  ;;  %2164 = vmatpush.bf16.msrb.mxu0 %v5956_v35  ;;  %v7760_v19 = vld [vmem:[%s10758_s4 + $0x358] sm:$0xf0]  ;;  %v7679_v35 = vld [vmem:[%s10758_s4 + $0xd0] sm:$0xf0] }
 0x21a   :  { %v5814_v62 = vor.u32 %v7682_v41, %v5813_v29  ;;  %v6040_v48 = vor.u32 %v7760_v19, %v6039_v7 }
 0x21b   :  { %v9410_v15 = vadd.f32 %v1631_v8, %v1594_v51  ;;  %v5801_v8 = vld [vmem:[%s10758_s4 + $0xc8] sm:$0xf]  ;;  %v5706_v51 = vor.u32 %v7655_v49, %v5705_v31  ;;  %v1786_v49 = vunpack.c.h.b16 %v8994_v5 }
 0x21c   :  { %1699 = vmatpush.bf16.msra.mxu3 %v5814_v62  ;;  %2203 = vmatpush.bf16.msrb.mxu1 %v6040_v48  ;;  %v5802_v41 = vor.u32 %v7679_v35, %v5801_v8  ;;  %v7757_v62 = vld [vmem:[%s10758_s4 + $0x340] sm:$0xf0] }
 0x21d   :  { %2165 = vmatpush.bf16.msrb.mxu0 %v5944_v53  ;;  %1662 = vmatpush.bf16.msra.mxu2 %v5706_v51  ;;  %v6028_v53 = vor.u32 %v7757_v62, %v6027_v52  ;;  %v1785_v51 = vunpack.c.l.b16 %v8994_v5 }
 0x21e   :  { %v1120_v27 = vpop.f32.mrf.mxu2  ;;  %v1158_v42 = vpop.f32.mrf.mxu3 }
 0x21f   :  { %v1159_v22 = vadd.f32 %v1158_v42, %v1120_v27 }
 0x220   :  { %1700 = vmatpush.bf16.msra.mxu3 %v5802_v41  ;;  %2204 = vmatpush.bf16.msrb.mxu1 %v6028_v53  ;;  %v9448_v41 = vpack.c.b16 %v1785_v51, %v1785_v51  ;;  %v6009_v51 = vld [vmem:[%s10758_s4 + $0x324] sm:$0xf0] }
 0x221   :  { %v1596_v44 = vadd.f32 %v1595_v32, %v1159_v22  ;;  %v1598_v29 = vpop.f32.mrf.mxu0  ;;  %v1636_v33 = vpop.f32.mrf.mxu1  ;;  %2166 = vmatpush.bf16.msrb.mxu0 %v5932_v13  ;;  %v9450_v13 = vpack.c.b16 %v1786_v49, %v1786_v49 }
 0x223   :  { %1531 = vmatmul.bf16.gmra.mxu2 %v8925_v50  ;;  %5855 = vmatmul.msk.bf16.gmra.mxu3 %vm1009_vm3, %v8927_v55  ;;  %v9439_v32 = vadd.f32 %v1633_v11, %v1596_v44 }
 0x224   :  { %2035 = vmatmul.bf16.gmra.mxu0 %v8989_v63  ;;  %6081 = vmatmul.msk.bf16.gmra.mxu1 %vm1009_vm3, %v8992_v58 }
 0x226   :  { %v1123_v7 = vpop.f32.mrf.mxu2  ;;  %v1161_v19 = vpop.f32.mrf.mxu3 }
 0x227   :  { %v1162_v48 = vadd.f32 %v1161_v19, %v1123_v7 }
 0x229   :  { %v1599_v27 = vadd.f32 %v1598_v29, %v1162_v48  ;;  %v1600_v42 = vpop.f32.mrf.mxu0  ;;  %v1638_v22 = vpop.f32.mrf.mxu1 }
 0x22b   :  { %v9444_v31 = vadd.f32 %v1636_v33, %v1599_v27 }
 0x22e   :  { %v1125_v11 = vpop.f32.mrf.mxu2  ;;  %v1163_v8 = vpop.f32.mrf.mxu3 }
 0x22f   :  { %v1164_v35 = vadd.f32 %v1163_v8, %v1125_v11  ;;  %v7752_v8 = vld [vmem:[%s10758_s4 + $0x31c] sm:$0xf] }
 0x231   :  { %v1601_v39 = vadd.f32 %v1600_v42, %v1164_v35  ;;  %v1603_v60 = vpop.f32.mrf.mxu0  ;;  %v1641_v44 = vpop.f32.mrf.mxu1  ;;  %v7767_v35 = vld [vmem:[%s10758_s4 + $0x394] sm:$0xf] }
 0x233   :  { %1536 = vmatmul.bf16.gmra.mxu2 %v9220_v56  ;;  %5856 = vmatmul.msk.bf16.gmra.mxu3 %vm1009_vm3, %v9224_v3  ;;  %v9455_v29 = vadd.f32 %v1638_v22, %v1601_v39 }
 0x234   :  { %2040 = vmatmul.bf16.gmra.mxu0 %v9448_v41  ;;  %6082 = vmatmul.msk.bf16.gmra.mxu1 %vm1009_vm3, %v9450_v13 }
 0x236   :  { %v1128_v5 = vpop.f32.mrf.mxu2  ;;  %v1166_v33 = vpop.f32.mrf.mxu3 }
 0x237   :  { %v1167_v52 = vadd.f32 %v1166_v33, %v1128_v5 }
 0x239   :  { %v1604_v62 = vadd.f32 %v1603_v60, %v1167_v52  ;;  %v1605_v53 = vpop.f32.mrf.mxu0  ;;  %v1643_v7 = vpop.f32.mrf.mxu1 }
 0x23b   :  { %v9460_v19 = vadd.f32 %v1641_v44, %v1604_v62 }
 0x23e   :  { %v1130_v48 = vpop.f32.mrf.mxu2  ;;  %v1168_v27 = vpop.f32.mrf.mxu3 }
 0x23f   :  { %v1169_v42 = vadd.f32 %v1168_v27, %v1130_v48 }
 0x241   :  { %v1606_v49 = vadd.f32 %v1605_v53, %v1169_v42  ;;  %v1608_v11 = vpop.f32.mrf.mxu0  ;;  %v1646_v22 = vpop.f32.mrf.mxu1 }
 0x243   :  { %1663 = vmatmul.bf16.vlgmr.msra.gmra.mxu2 %v8700_v10  ;;  %5863 = vmatmul.msk.bf16.vlgmr.msra.gmra.mxu3 %vm1009_vm3, %v8697_v17  ;;  %v9474_v39 = vadd.f32 %v1643_v7, %v1606_v49  ;;  %v6012_v17 = vor.u32 %v7752_v8, %v6009_v51  ;;  %v6069_v10 = vld [vmem:[%s10758_s4 + $0x39c] sm:$0xf0] }
 0x244   :  { %2167 = vmatmul.bf16.vlgmr.msrb.gmra.mxu0 %v8734_v20  ;;  %6089 = vmatmul.msk.bf16.vlgmr.msrb.gmra.mxu1 %vm1009_vm3, %v8736_v23  ;;  %v6072_v60 = vor.u32 %v7767_v35, %v6069_v10  ;;  %v7749_v10 = vld [vmem:[%s10758_s4 + $0x304] sm:$0xf] }
 0x245   :  { %2083 = vmatpush.bf16.msrb.mxu2 %v6012_v17 }
 0x246   :  { %v1133_v44 = vpop.f32.mrf.mxu2  ;;  %v1171_v5 = vpop.f32.mrf.mxu3  ;;  %2124 = vmatpush.bf16.msrb.mxu3 %v6072_v60  ;;  %v5997_v60 = vld [vmem:[%s10758_s4 + $0x30c] sm:$0xf0] }
 0x247   :  { %v1172_v33 = vadd.f32 %v1171_v5, %v1133_v44  ;;  %v6000_v44 = vor.u32 %v7749_v10, %v5997_v60 }
 0x249   :  { %v1609_v52 = vadd.f32 %v1608_v11, %v1172_v33  ;;  %v1610_v62 = vpop.f32.mrf.mxu0  ;;  %v1648_v53 = vpop.f32.mrf.mxu1  ;;  %2084 = vmatpush.bf16.msrb.mxu2 %v6000_v44 }
 0x24b   :  { %v9482_v7 = vadd.f32 %v1646_v22, %v1609_v52 }
 0x24e   :  { %v1135_v48 = vpop.f32.mrf.mxu2  ;;  %v1173_v27 = vpop.f32.mrf.mxu3 }
 0x24f   :  { %v1174_v42 = vadd.f32 %v1173_v27, %v1135_v48  ;;  %v7764_v27 = vld [vmem:[%s10758_s4 + $0x37c] sm:$0xf] }
 0x251   :  { %v1611_v49 = vadd.f32 %v1610_v62, %v1174_v42  ;;  %v1613_v8 = vpop.f32.mrf.mxu0  ;;  %v1651_v51 = vpop.f32.mrf.mxu1  ;;  %v6057_v42 = vld [vmem:[%s10758_s4 + $0x384] sm:$0xf0] }
 0x253   :  { %1668 = vmatmul.bf16.gmra.mxu2 %v8734_v20  ;;  %5864 = vmatmul.msk.bf16.gmra.mxu3 %vm1009_vm3, %v8736_v23  ;;  %v9487_v35 = vadd.f32 %v1648_v53, %v1611_v49  ;;  %v7746_v49 = vld [vmem:[%s10758_s4 + $0x2ec] sm:$0xf] }
 0x254   :  { %2172 = vmatmul.bf16.gmra.mxu0 %v8764_v21  ;;  %6090 = vmatmul.msk.bf16.gmra.mxu1 %vm1009_vm3, %v8766_v26 }
 0x255   :  { %10777 = vst [vmem:[#allocation2_spill] sm:$0xff] %v9487_v35 }
 0x256   :  { %v1138_v11 = vpop.f32.mrf.mxu2  ;;  %v1176_v22 = vpop.f32.mrf.mxu3 }
 0x257   :  { %v1177_v17 = vadd.f32 %v1176_v22, %v1138_v11 }
 0x259   :  { %v1614_v5 = vadd.f32 %v1613_v8, %v1177_v17  ;;  %v1615_v33 = vpop.f32.mrf.mxu0  ;;  %v1653_v52 = vpop.f32.mrf.mxu1  ;;  %v6060_v8 = vor.u32 %v7764_v27, %v6057_v42 }
 0x25b   :  { %v9498_v62 = vadd.f32 %v1651_v51, %v1614_v5  ;;  %v5985_v51 = vld [vmem:[%s10758_s4 + $0x2f4] sm:$0xf0]  ;;  %2125 = vmatpush.bf16.msrb.mxu3 %v6060_v8  ;;  %v7743_v8 = vld [vmem:[%s10758_s4 + $0x2d4] sm:$0xf] }
 0x25c   :  { %v5988_v17 = vor.u32 %v7746_v49, %v5985_v51  ;;  %v5973_v51 = vld [vmem:[%s10758_s4 + $0x2dc] sm:$0xf0] }
 0x25d   :  { %10778 = vst [vmem:[#allocation3_spill] sm:$0xff] %v9498_v62 }
 0x25e   :  { %v1140_v53 = vpop.f32.mrf.mxu2  ;;  %v1178_v48 = vpop.f32.mrf.mxu3  ;;  %2085 = vmatpush.bf16.msrb.mxu2 %v5988_v17 }
 0x261   :  { %v2016_v11 = vpop.f32.mrf.mxu0  ;;  %v2054_v22 = vpop.f32.mrf.mxu1 }
 0x262   :  { %v2055_v10 = vadd.f32 %v2054_v22, %v2016_v11  ;;  %v7761_v11 = vld [vmem:[%s10758_s4 + $0x364] sm:$0xf]  ;;  %v6045_v22 = vld [vmem:[%s10758_s4 + $0x36c] sm:$0xf0] }
 0x263   :  { %1673 = vmatmul.bf16.gmra.mxu2 %v8764_v21  ;;  %5865 = vmatmul.msk.bf16.gmra.mxu3 %vm1009_vm3, %v8766_v26 }
 0x264   :  { %2177 = vmatmul.bf16.gmra.mxu0 %v8812_v16  ;;  %6091 = vmatmul.msk.bf16.gmra.mxu1 %vm1009_vm3, %v8814_v24 }
 0x266   :  { %v1512_v60 = vpop.f32.mrf.mxu2  ;;  %v1550_v44 = vpop.f32.mrf.mxu3 }
 0x267   :  { %v1513_v5 = vadd.f32 %v1512_v60, %v9062_v46  ;;  %v5976_v46 = vor.u32 %v7743_v8, %v5973_v51  ;;  %v6048_v60 = vor.u32 %v7761_v11, %v6045_v22  ;;  %v7737_v51 = vld [vmem:[%s10758_s4 + $0x2a4] sm:$0xf] }
 0x269   :  { %v1551_v33 = vadd.f32 %v1550_v44, %v1513_v5  ;;  %v9519_v52 = vpop.f32.mrf.mxu0  ;;  %v9521_v53 = vpop.f32.mrf.mxu1  ;;  %2086 = vmatpush.bf16.msrb.mxu2 %v5976_v46  ;;  %v7740_v5 = vld [vmem:[%s10758_s4 + $0x2bc] sm:$0xf]  ;;  %2126 = vmatpush.bf16.msrb.mxu3 %v6048_v60  ;;  %v5949_v46 = vld [vmem:[%s10758_s4 + $0x2ac] sm:$0xf0] }
 0x26a   :  { %v5952_v11 = vor.u32 %v7737_v51, %v5949_v46  ;;  %v7731_v46 = vld [vmem:[%s10758_s4 + $0x274] sm:$0xf] }
 0x26b   :  { %v9523_v48 = vadd.f32 %v2055_v10, %v1551_v33  ;;  %v5961_v33 = vld [vmem:[%s10758_s4 + $0x2c4] sm:$0xf0] }
 0x26e   :  { %v1514_v27 = vpop.f32.mrf.mxu2  ;;  %v1552_v42 = vpop.f32.mrf.mxu3 }
 0x26f   :  { %v1515_v49 = vadd.f32 %v1514_v27, %v9090_v6  ;;  %v5964_v27 = vor.u32 %v7740_v5, %v5961_v33  ;;  %v5937_v5 = vld [vmem:[%s10758_s4 + $0x294] sm:$0xf0]  ;;  %v7758_v33 = vld [vmem:[%s10758_s4 + $0x34c] sm:$0xf] }
 0x271   :  { %v9538_v17 = vadd.f32 %v1552_v42, %v1515_v49  ;;  %v2021_v6 = vpop.f32.mrf.mxu0  ;;  %v2059_v10 = vpop.f32.mrf.mxu1  ;;  %2087 = vmatpush.bf16.msrb.mxu2 %v5964_v27 }
 0x272   :  { %v2060_v44 = vadd.f32 %v2059_v10, %v2021_v6 }
 0x273   :  { %1678 = vmatmul.bf16.gmra.mxu2 %v8812_v16  ;;  %5866 = vmatmul.msk.bf16.gmra.mxu3 %vm1009_vm3, %v8814_v24 }
 0x274   :  { %2182 = vmatmul.bf16.gmra.mxu0 %v8925_v50  ;;  %6092 = vmatmul.msk.bf16.gmra.mxu1 %vm1009_vm3, %v8927_v55 }
 0x275   :  { %2088 = vmatpush.bf16.msrb.mxu2 %v5952_v11  ;;  %v5925_v11 = vld [vmem:[%s10758_s4 + $0x27c] sm:$0xf0] }
 0x276   :  { %v1517_v42 = vpop.f32.mrf.mxu2  ;;  %v1555_v49 = vpop.f32.mrf.mxu3 }
 0x277   :  { %v1518_v8 = vadd.f32 %v1517_v42, %v9130_v37  ;;  %v7734_v37 = vld [vmem:[%s10758_s4 + $0x28c] sm:$0xf]  ;;  %v6033_v42 = vld [vmem:[%s10758_s4 + $0x354] sm:$0xf0] }
 0x278   :  { %v5940_v27 = vor.u32 %v7734_v37, %v5937_v5  ;;  %v7755_v37 = vld [vmem:[%s10758_s4 + $0x334] sm:$0xf]  ;;  %v6021_v5 = vld [vmem:[%s10758_s4 + $0x33c] sm:$0xf0] }
 0x279   :  { %v1556_v22 = vadd.f32 %v1555_v49, %v1518_v8  ;;  %v9559_v6 = vpop.f32.mrf.mxu0  ;;  %v9561_v10 = vpop.f32.mrf.mxu1  ;;  %v6036_v49 = vor.u32 %v7758_v33, %v6033_v42  ;;  %v6024_v42 = vor.u32 %v7755_v37, %v6021_v5 }
 0x27a   :  { %2089 = vmatpush.bf16.msrb.mxu2 %v5940_v27 }
 0x27b   :  { %v9563_v60 = vadd.f32 %v2060_v44, %v1556_v22  ;;  %2127 = vmatpush.bf16.msrb.mxu3 %v6036_v49  ;;  %v5928_v22 = vor.u32 %v7731_v46, %v5925_v11 }
 0x27e   :  { %v1519_v44 = vpop.f32.mrf.mxu2  ;;  %v1557_v8 = vpop.f32.mrf.mxu3  ;;  %2090 = vmatpush.bf16.msrb.mxu2 %v5928_v22 }
 0x27f   :  { %v1520_v51 = vadd.f32 %v1519_v44, %v9176_v28  ;;  %2128 = vmatpush.bf16.msrb.mxu3 %v6024_v42 }
 0x281   :  { %v9590_v33 = vadd.f32 %v1557_v8, %v1520_v51  ;;  %v2026_v28 = vpop.f32.mrf.mxu0  ;;  %v2064_v27 = vpop.f32.mrf.mxu1 }
 0x282   :  { %v2065_v49 = vadd.f32 %v2064_v27, %v2026_v28 }
 0x283   :  { %1683 = vmatmul.bf16.gmra.mxu2 %v8925_v50  ;;  %5867 = vmatmul.msk.bf16.gmra.mxu3 %vm1009_vm3, %v8927_v55 }
 0x284   :  { %2187 = vmatmul.bf16.gmra.mxu0 %v8989_v63  ;;  %6093 = vmatmul.msk.bf16.gmra.mxu1 %vm1009_vm3, %v8992_v58 }
 0x286   :  { %v1522_v44 = vpop.f32.mrf.mxu2  ;;  %v1560_v46 = vpop.f32.mrf.mxu3 }
 0x287   :  { %v1523_v8 = vadd.f32 %v1522_v44, %v9210_v1 }
 0x289   :  { %v1561_v51 = vadd.f32 %v1560_v46, %v1523_v8  ;;  %v9599_v11 = vpop.f32.mrf.mxu0  ;;  %v9601_v37 = vpop.f32.mrf.mxu1 }
 0x28b   :  { %v9603_v22 = vadd.f32 %v2065_v49, %v1561_v51  ;;  %v7791_v51 = vld [vmem:[%s10760_s6 + $0xa8] sm:$0xff] }
 0x28c   :  { %2583 = vmatpush.bf16.msra.mxu0 %v7791_v51 }
 0x28e   :  { %v1524_v5 = vpop.f32.mrf.mxu2  ;;  %v1562_v28 = vpop.f32.mrf.mxu3 }
 0x28f   :  { %v1525_v27 = vadd.f32 %v1524_v5, %v9214_v34 }
 0x291   :  { %v9606_v2 = vadd.f32 %v1562_v28, %v1525_v27  ;;  %v2031_v62 = vpop.f32.mrf.mxu0  ;;  %v2069_v35 = vpop.f32.mrf.mxu1 }
 0x292   :  { %v2070_v42 = vadd.f32 %v2069_v35, %v2031_v62 }
 0x293   :  { %1688 = vmatmul.bf16.gmra.mxu2 %v9220_v56  ;;  %5868 = vmatmul.msk.bf16.gmra.mxu3 %vm1009_vm3, %v9224_v3 }
 0x294   :  { %2192 = vmatmul.bf16.gmra.mxu0 %v9448_v41  ;;  %6094 = vmatmul.msk.bf16.gmra.mxu1 %vm1009_vm3, %v9450_v13 }
 0x296   :  { %v1527_v1 = vpop.f32.mrf.mxu2  ;;  %v1565_v49 = vpop.f32.mrf.mxu3 }
 0x297   :  { %v1528_v44 = vadd.f32 %v1527_v1, %v9232_v9 }
 0x299   :  { %v1566_v34 = vadd.f32 %v1565_v49, %v1528_v44  ;;  %v9615_v46 = vpop.f32.mrf.mxu0  ;;  %v9617_v8 = vpop.f32.mrf.mxu1  ;;  %v7789_v44 = vld [vmem:[%s10760_s6 + $0x98] sm:$0xff] }
 0x29b   :  { %v9619_v35 = vadd.f32 %v2070_v42, %v1566_v34  ;;  %v7790_v42 = vld [vmem:[%s10760_s6 + $0xa0] sm:$0xff] }
 0x29c   :  { %2584 = vmatpush.bf16.msra.mxu0 %v7790_v42 }
 0x29e   :  { %v1529_v56 = vpop.f32.mrf.mxu2  ;;  %v1567_v62 = vpop.f32.mrf.mxu3 }
 0x29f   :  { %v1530_v3 = vadd.f32 %v1529_v56, %v9236_v54 }
 0x2a0   :  { %2585 = vmatpush.bf16.msra.mxu0 %v7789_v44 }
 0x2a1   :  { %v9625_v5 = vadd.f32 %v1567_v62, %v1530_v3  ;;  %v2036_v28 = vpop.f32.mrf.mxu0  ;;  %v2074_v27 = vpop.f32.mrf.mxu1  ;;  %v7788_v62 = vld [vmem:[%s10760_s6 + $0x90] sm:$0xff] }
 0x2a2   :  { %v2075_v9 = vadd.f32 %v2074_v27, %v2036_v28  ;;  %v7787_v28 = vld [vmem:[%s10760_s6 + $0x88] sm:$0xff] }
 0x2a3   :  { %2091 = vmatmul.bf16.vlgmr.msrb.gmra.mxu2 %v8734_v20  ;;  %6083 = vmatmul.msk.bf16.vlgmr.msrb.gmra.mxu3 %vm1009_vm3, %v8736_v23 }
 0x2a4   :  { %2586 = vmatpush.bf16.msra.mxu0 %v7788_v62 }
 0x2a6   :  { %v1532_v54 = vpop.f32.mrf.mxu2  ;;  %v1570_v1 = vpop.f32.mrf.mxu3 }
 0x2a7   :  { %v1533_v49 = vadd.f32 %v1532_v54, %v9258_v30 }
 0x2a8   :  { %2587 = vmatpush.bf16.msra.mxu0 %v7787_v28 }
 0x2a9   :  { %v1571_v34 = vadd.f32 %v1570_v1, %v1533_v49  ;;  %v9637_v56 = vpop.f32.mrf.mxu0  ;;  %v9639_v20 = vpop.f32.mrf.mxu1 }
 0x2aa   :  { %10779 = vst [vmem:[#allocation4_spill] sm:$0xff] %v9637_v56 }
 0x2ab   :  { %10780 = vst [vmem:[#allocation5_spill] sm:$0xff] %v9639_v20  ;;  %v9641_v23 = vadd.f32 %v2075_v9, %v1571_v34  ;;  %v7786_v9 = vld [vmem:[%s10760_s6 + $0x80] sm:$0xff]  ;;  %v7793_v20 = vld [vmem:[%s10760_s6 + $0xb8] sm:$0xff] }
 0x2ac   :  { %2588 = vmatpush.bf16.msra.mxu0 %v7786_v9 }
 0x2ae   :  { %v1534_v3 = vpop.f32.mrf.mxu2  ;;  %v1572_v51 = vpop.f32.mrf.mxu3 }
 0x2af   :  { %v1535_v30 = vadd.f32 %v1534_v3, %v9262_v36 }
 0x2b1   :  { %v9650_v27 = vadd.f32 %v1572_v51, %v1535_v30  ;;  %v2041_v42 = vpop.f32.mrf.mxu0  ;;  %v2079_v54 = vpop.f32.mrf.mxu1 }
 0x2b2   :  { %v2080_v1 = vadd.f32 %v2079_v54, %v2041_v42 }
 0x2b3   :  { %10781 = vst [vmem:[#allocation6_spill] sm:$0xff] %v9650_v27  ;;  %2096 = vmatmul.bf16.gmra.mxu2 %v8764_v21  ;;  %6084 = vmatmul.msk.bf16.gmra.mxu3 %vm1009_vm3, %v8766_v26  ;;  %v7779_v27 = vld [vmem:[%s10760_s6 + $0x48] sm:$0xff] }
 0x2b6   :  { %v1537_v36 = vpop.f32.mrf.mxu2  ;;  %v1575_v49 = vpop.f32.mrf.mxu3 }
 0x2b7   :  { %v1538_v44 = vadd.f32 %v1537_v36, %v9278_v61  ;;  %v9668_v61 = vld [vmem:[%s10761_s5] sm:$0x7] }
 0x2b9   :  { %v1576_v34 = vadd.f32 %v1575_v49, %v1538_v44  ;;  %v2043_v62 = vpop.f32.mrf.mxu0  ;;  %v2081_v3 = vpop.f32.mrf.mxu1  ;;  %v9671_v49 = vperm.slane %v9668_v61, 2 }
 0x2bb   :  { %v9659_v51 = vadd.f32 %v2080_v1, %v1576_v34 }
 0x2bd   :  { %10782 = vst [vmem:[#allocation7_spill] sm:$0xff] %v9659_v51  ;;  %v7781_v51 = vld [vmem:[%s10760_s6 + $0x58] sm:$0xff] }
 0x2be   :  { %v1539_v30 = vpop.f32.mrf.mxu2  ;;  %v1577_v28 = vpop.f32.mrf.mxu3 }
 0x2c1   :  { %v2168_v21 = vpop.f32.mrf.mxu0  ;;  %v2206_v42 = vpop.f32.mrf.mxu1 }
 0x2c2   :  { %v2207_v1 = vadd.f32 %v2206_v42, %v2168_v21 }
 0x2c3   :  { %2101 = vmatmul.bf16.gmra.mxu2 %v8812_v16  ;;  %6085 = vmatmul.msk.bf16.gmra.mxu3 %vm1009_vm3, %v8814_v24 }
 0x2c6   :  { %v1664_v26 = vpop.f32.mrf.mxu2  ;;  %v1702_v54 = vpop.f32.mrf.mxu3 }
 0x2c7   :  { %v1665_v9 = vadd.f32 %v1664_v26, %v9048_v59 }
 0x2c9   :  { %v1703_v36 = vadd.f32 %v1702_v54, %v1665_v9  ;;  %v9673_v44 = vpop.f32.mrf.mxu0  ;;  %v9675_v16 = vpop.f32.mrf.mxu1 }
 0x2cb   :  { %v2237_v34 = vadd.f32 %v2207_v1, %v1703_v36 }
 0x2cd   :  { %v2278_v24 = vadd.f32 %v9671_v49, %v2237_v34 }
 0x2ce   :  { %v9678_v62 = vpop.f32.mrf.mxu2  ;;  %v9680_v59 = vpop.f32.mrf.mxu3 }
 0x2cf   :  { %v2311_v3 = vmax.f32 %v2278_v24, 0.0 }
 0x2d1   :  { %v2343_v30 = vpack.c.bf16 %v2311_v3, %v2311_v3  ;;  %v2173_v28 = vpop.f32.mrf.mxu0  ;;  %v2211_v26 = vpop.f32.mrf.mxu1 }
 0x2d2   :  { %v2212_v21 = vadd.f32 %v2211_v26, %v2173_v28 }
 0x2d3   :  { %v2413_v42 = vunpack.c.l.b16 %v2343_v30  ;;  %2106 = vmatmul.bf16.gmra.mxu2 %v8925_v50  ;;  %6086 = vmatmul.msk.bf16.gmra.mxu3 %vm1009_vm3, %v8927_v55  ;;  %v7777_v50 = vld [vmem:[%s10760_s6 + $0x38] sm:$0xff] }
 0x2d4   :  { %2555 = vmatpush.bf16.msra.mxu2 %v7777_v50  ;;  %v7784_v50 = vld [vmem:[%s10760_s6 + $0x70] sm:$0xff] }
 0x2d5   :  { %v2416_v54 = vpack.c.b16 %v2413_v42, %v2413_v42 }
 0x2d6   :  { %v1669_v9 = vpop.f32.mrf.mxu2  ;;  %v1707_v1 = vpop.f32.mrf.mxu3 }
 0x2d7   :  { %v1670_v36 = vadd.f32 %v1669_v9, %v9104_v4  ;;  %6183 = vmatmul.msk.bf16.vlgmr.msra.gmra.mxu0 %vm2551_vm4, %v2416_v54  ;;  %v7776_v4 = vld [vmem:[%s10760_s6 + $0x30] sm:$0xff]  ;;  %v7775_v9 = vld [vmem:[%s10760_s6 + $0x28] sm:$0xff] }
 0x2d8   :  { %2556 = vmatpush.bf16.msra.mxu2 %v7776_v4  ;;  %v7798_v4 = vld [vmem:[%s10760_s6 + $0xe0] sm:$0xff] }
 0x2d9   :  { %v1708_v34 = vadd.f32 %v1707_v1, %v1670_v36  ;;  %v9687_v24 = vpop.f32.mrf.mxu0  ;;  %v9689_v3 = vpop.f32.mrf.mxu1  ;;  %v7785_v1 = vld [vmem:[%s10760_s6 + $0x78] sm:$0xff] }
 0x2da   :  { %2568 = vmatpush.bf16.msra.mxu3 %v7785_v1  ;;  %v7783_v1 = vld [vmem:[%s10760_s6 + $0x68] sm:$0xff] }
 0x2db   :  { %v9691_v28 = vadd.f32 %v2212_v21, %v1708_v34  ;;  %v7799_v21 = vld [vmem:[%s10760_s6 + $0xe8] sm:$0xff] }
 0x2dc   :  { %2788 = vmatpush.bf16.msra.mxu1 %v7799_v21  ;;  %2557 = vmatpush.bf16.msra.mxu2 %v7775_v9  ;;  %v7773_v9 = vld [vmem:[%s10760_s6 + $0x18] sm:$0xff] }
 0x2de   :  { %v9696_v55 = vpop.f32.mrf.mxu2  ;;  %v9698_v30 = vpop.f32.mrf.mxu3  ;;  %2569 = vmatpush.bf16.msra.mxu3 %v7784_v50  ;;  %v7782_v50 = vld [vmem:[%s10760_s6 + $0x60] sm:$0xff] }
 0x2e0   :  { %2789 = vmatpush.bf16.msra.mxu1 %v7798_v4  ;;  %v7796_v4 = vld [vmem:[%s10760_s6 + $0xd0] sm:$0xff] }
 0x2e1   :  { %v2178_v26 = vpop.f32.mrf.mxu0  ;;  %v2216_v42 = vpop.f32.mrf.mxu1 }
 0x2e2   :  { %v2217_v54 = vadd.f32 %v2216_v42, %v2178_v26  ;;  %2570 = vmatpush.bf16.msra.mxu3 %v7783_v1 }
 0x2e3   :  { %2111 = vmatmul.bf16.gmra.mxu2 %v8989_v63  ;;  %6087 = vmatmul.msk.bf16.gmra.mxu3 %vm1009_vm3, %v8992_v58  ;;  %v7774_v58 = vld [vmem:[%s10760_s6 + $0x20] sm:$0xff] }
 0x2e4   :  { %2558 = vmatpush.bf16.msra.mxu2 %v7774_v58  ;;  %v7772_v58 = vld [vmem:[%s10760_s6 + $0x10] sm:$0xff] }
 0x2e6   :  { %v1674_v36 = vpop.f32.mrf.mxu2  ;;  %v1712_v34 = vpop.f32.mrf.mxu3  ;;  %2571 = vmatpush.bf16.msra.mxu3 %v7782_v50  ;;  %v7819_v50 = vld [vmem:[%s10760_s6 + $0x188] sm:$0xff] }
 0x2e7   :  { %v1675_v63 = vadd.f32 %v1674_v36, %v9202_v18  ;;  %v7797_v36 = vld [vmem:[%s10760_s6 + $0xd8] sm:$0xff] }
 0x2e8   :  { %2559 = vmatpush.bf16.msra.mxu2 %v7773_v9  ;;  %2790 = vmatpush.bf16.msra.mxu1 %v7797_v36 }
 0x2e9   :  { %v1713_v26 = vadd.f32 %v1712_v34, %v1675_v63  ;;  %v9725_v42 = vpop.f32.mrf.mxu0  ;;  %v9727_v21 = vpop.f32.mrf.mxu1  ;;  %v7821_v34 = vld [vmem:[%s10760_s6 + $0x198] sm:$0xff] }
 0x2ea   :  { %10783 = vst [vmem:[#allocation8_spill] sm:$0xff] %v9727_v21  ;;  %3018 = vmatpush.bf16.msrb.mxu0 %v7821_v34  ;;  %v7771_v34 = vld [vmem:[%s10760_s6 + $0x8] sm:$0xff]  ;;  %2572 = vmatpush.bf16.msra.mxu3 %v7781_v51 }
 0x2eb   :  { %v9729_v18 = vadd.f32 %v2217_v54, %v1713_v26  ;;  %v7820_v26 = vld [vmem:[%s10760_s6 + $0x190] sm:$0xff]  ;;  %v7815_v21 = vld [vmem:[%s10760_s6 + $0x168] sm:$0xff] }
 0x2ec   :  { %2560 = vmatpush.bf16.msra.mxu2 %v7772_v58  ;;  %2791 = vmatpush.bf16.msra.mxu1 %v7796_v4  ;;  %v7795_v58 = vld [vmem:[%s10760_s6 + $0xc8] sm:$0xff] }
 0x2ee   :  { %v9743_v54 = vpop.f32.mrf.mxu2  ;;  %v9745_v63 = vpop.f32.mrf.mxu3  ;;  %3019 = vmatpush.bf16.msrb.mxu0 %v7820_v26  ;;  %v7770_v26 = vld [vmem:[%s10760_s6] sm:$0xff] }
 0x2f0   :  { %2561 = vmatpush.bf16.msra.mxu2 %v7771_v34  ;;  %2792 = vmatpush.bf16.msra.mxu1 %v7795_v58  ;;  %v7818_v34 = vld [vmem:[%s10760_s6 + $0x180] sm:$0xff] }
 0x2f1   :  { %v2183_v9 = vpop.f32.mrf.mxu0  ;;  %v2221_v36 = vpop.f32.mrf.mxu1 }
 0x2f2   :  { %v2222_v1 = vadd.f32 %v2221_v36, %v2183_v9  ;;  %3020 = vmatpush.bf16.msrb.mxu0 %v7819_v50  ;;  %v7780_v9 = vld [vmem:[%s10760_s6 + $0x50] sm:$0xff]  ;;  %v7794_v36 = vld [vmem:[%s10760_s6 + $0xc0] sm:$0xff] }
 0x2f3   :  { %2116 = vmatmul.bf16.gmra.mxu2 %v9448_v41  ;;  %6088 = vmatmul.msk.bf16.gmra.mxu3 %vm1009_vm3, %v9450_v13 }
 0x2f4   :  { %2562 = vmatpush.bf16.msra.mxu2 %v7770_v26  ;;  %2793 = vmatpush.bf16.msra.mxu1 %v7794_v36  ;;  %v7778_v36 = vld [vmem:[%s10760_s6 + $0x40] sm:$0xff] }
 0x2f5   :  { %2573 = vmatpush.bf16.msra.mxu3 %v7780_v9 }
 0x2f6   :  { %v1679_v41 = vpop.f32.mrf.mxu2  ;;  %v1717_v13 = vpop.f32.mrf.mxu3  ;;  %3021 = vmatpush.bf16.msrb.mxu0 %v7818_v34  ;;  %v7792_v34 = vld [vmem:[%s10760_s6 + $0xb0] sm:$0xff] }
 0x2f7   :  { %v1680_v4 = vadd.f32 %v1679_v41, %v9216_v25  ;;  %v7807_v25 = vld [vmem:[%s10760_s6 + $0x128] sm:$0xff] }
 0x2f8   :  { %2801 = vmatpush.bf16.msrb.mxu2 %v7807_v25  ;;  %2794 = vmatpush.bf16.msra.mxu1 %v7793_v20  ;;  %v7816_v25 = vld [vmem:[%s10760_s6 + $0x170] sm:$0xff]  ;;  %v7805_v20 = vld [vmem:[%s10760_s6 + $0x118] sm:$0xff] }
 0x2f9   :  { %v1718_v51 = vadd.f32 %v1717_v13, %v1680_v4  ;;  %v2185_v58 = vpop.f32.mrf.mxu0  ;;  %v2223_v50 = vpop.f32.mrf.mxu1  ;;  %v7817_v13 = vld [vmem:[%s10760_s6 + $0x178] sm:$0xff]  ;;  %v7806_v4 = vld [vmem:[%s10760_s6 + $0x120] sm:$0xff]  ;;  %2574 = vmatpush.bf16.msra.mxu3 %v7779_v27 }
 0x2fa   :  { %3022 = vmatpush.bf16.msrb.mxu0 %v7817_v13  ;;  %v7829_v27 = vld [vmem:[%s10760_s6 + $0x1d8] sm:$0xff] }
 0x2fb   :  { %v9790_v41 = vadd.f32 %v2222_v1, %v1718_v51  ;;  %v2224_v51 = vadd.f32 %v2223_v50, %v2185_v58  ;;  %v7804_v58 = vld [vmem:[%s10760_s6 + $0x110] sm:$0xff] }
 0x2fc   :  { %2802 = vmatpush.bf16.msrb.mxu2 %v7806_v4  ;;  %2795 = vmatpush.bf16.msra.mxu1 %v7792_v34  ;;  %v7812_v50 = vld [vmem:[%s10760_s6 + $0x150] sm:$0xff] }
 0x2fd   :  { %10784 = vst [vmem:[#allocation9_spill] sm:$0xff] %v9790_v41  ;;  %2575 = vmatpush.bf16.msra.mxu3 %v7778_v36 }
 0x2fe   :  { %v1681_v1 = vpop.f32.mrf.mxu2  ;;  %v1719_v26 = vpop.f32.mrf.mxu3  ;;  %3023 = vmatpush.bf16.msrb.mxu0 %v7816_v25  ;;  %v7814_v25 = vld [vmem:[%s10760_s6 + $0x160] sm:$0xff] }
 0x2ff   :  { %v1682_v9 = vadd.f32 %v1681_v1, %v9234_v12  ;;  %v7813_v12 = vld [vmem:[%s10760_s6 + $0x158] sm:$0xff] }
 0x300   :  { %2803 = vmatpush.bf16.msrb.mxu2 %v7805_v20  ;;  %3031 = vmatpush.bf16.msrb.mxu1 %v7829_v27  ;;  %v7803_v20 = vld [vmem:[%s10760_s6 + $0x108] sm:$0xff] }
 0x301   :  { %v1720_v13 = vadd.f32 %v1719_v26, %v1682_v9  ;;  %v2188_v4 = vpop.f32.mrf.mxu0  ;;  %v2226_v1 = vpop.f32.mrf.mxu1  ;;  %2816 = vmatpush.bf16.msrb.mxu3 %v7813_v12  ;;  %v7828_v26 = vld [vmem:[%s10760_s6 + $0x1d0] sm:$0xff]  ;;  %v7811_v12 = vld [vmem:[%s10760_s6 + $0x148] sm:$0xff] }
 0x302   :  { %v2227_v41 = vadd.f32 %v2226_v1, %v2188_v4  ;;  %3024 = vmatpush.bf16.msrb.mxu0 %v7815_v21  ;;  %v7827_v21 = vld [vmem:[%s10760_s6 + $0x1c8] sm:$0xff] }
 0x303   :  { %v9823_v56 = vadd.f32 %v2224_v51, %v1720_v13  ;;  %v7851_v13 = vld [vmem:[%s10760_s6 + $0x288] sm:$0xff] }
 0x304   :  { %2804 = vmatpush.bf16.msrb.mxu2 %v7804_v58  ;;  %3032 = vmatpush.bf16.msrb.mxu1 %v7828_v26  ;;  %v7802_v58 = vld [vmem:[%s10760_s6 + $0x100] sm:$0xff] }
 0x305   :  { %2817 = vmatpush.bf16.msrb.mxu3 %v7812_v50  ;;  %v7810_v50 = vld [vmem:[%s10760_s6 + $0x140] sm:$0xff] }
 0x306   :  { %v1684_v9 = vpop.f32.mrf.mxu2  ;;  %v1722_v36 = vpop.f32.mrf.mxu3  ;;  %3025 = vmatpush.bf16.msrb.mxu0 %v7814_v25  ;;  %v7826_v26 = vld [vmem:[%s10760_s6 + $0x1c0] sm:$0xff]  ;;  %v7801_v25 = vld [vmem:[%s10760_s6 + $0xf8] sm:$0xff] }
 0x307   :  { %v1685_v34 = vadd.f32 %v1684_v9, %v9238_v45 }
 0x308   :  { %2805 = vmatpush.bf16.msrb.mxu2 %v7803_v20  ;;  %3033 = vmatpush.bf16.msrb.mxu1 %v7827_v21  ;;  %v7809_v20 = vld [vmem:[%s10760_s6 + $0x138] sm:$0xff] }
 0x309   :  { %v1723_v45 = vadd.f32 %v1722_v36, %v1685_v34  ;;  %v2190_v27 = vpop.f32.mrf.mxu0  ;;  %v2228_v51 = vpop.f32.mrf.mxu1  ;;  %2818 = vmatpush.bf16.msrb.mxu3 %v7811_v12  ;;  %v7825_v12 = vld [vmem:[%s10760_s6 + $0x1b8] sm:$0xff] }
 0x30a   :  { %v2229_v4 = vadd.f32 %v2228_v51, %v2190_v27  ;;  %3261 = vmatpush.bf16.msra.mxu0 %v7851_v13 }
 0x30b   :  { %v9853_v1 = vadd.f32 %v2227_v41, %v1723_v45  ;;  %v7850_v41 = vld [vmem:[%s10760_s6 + $0x280] sm:$0xff] }
 0x30c   :  { %2806 = vmatpush.bf16.msrb.mxu2 %v7802_v58  ;;  %3034 = vmatpush.bf16.msrb.mxu1 %v7826_v26  ;;  %v7800_v58 = vld [vmem:[%s10760_s6 + $0xf0] sm:$0xff] }
 0x30d   :  { %2819 = vmatpush.bf16.msrb.mxu3 %v7810_v50  ;;  %v7808_v50 = vld [vmem:[%s10760_s6 + $0x130] sm:$0xff] }
 0x30e   :  { %v1686_v9 = vpop.f32.mrf.mxu2  ;;  %v1724_v36 = vpop.f32.mrf.mxu3  ;;  %3262 = vmatpush.bf16.msra.mxu0 %v7850_v41  ;;  %v7824_v26 = vld [vmem:[%s10760_s6 + $0x1b0] sm:$0xff] }
 0x30f   :  { %v1687_v34 = vadd.f32 %v1686_v9, %v9260_v38  ;;  %v7849_v38 = vld [vmem:[%s10760_s6 + $0x278] sm:$0xff] }
 0x310   :  { %2807 = vmatpush.bf16.msrb.mxu2 %v7801_v25  ;;  %3035 = vmatpush.bf16.msrb.mxu1 %v7825_v12  ;;  %v7847_v25 = vld [vmem:[%s10760_s6 + $0x268] sm:$0xff] }
 0x311   :  { %v1725_v21 = vadd.f32 %v1724_v36, %v1687_v34  ;;  %v2193_v45 = vpop.f32.mrf.mxu0  ;;  %v2231_v27 = vpop.f32.mrf.mxu1  ;;  %2820 = vmatpush.bf16.msrb.mxu3 %v7809_v20  ;;  %v7823_v34 = vld [vmem:[%s10760_s6 + $0x1a8] sm:$0xff] }
 0x312   :  { %v2232_v51 = vadd.f32 %v2231_v27, %v2193_v45  ;;  %3263 = vmatpush.bf16.msra.mxu0 %v7849_v38  ;;  %v7846_v27 = vld [vmem:[%s10760_s6 + $0x260] sm:$0xff] }
 0x313   :  { %v9880_v13 = vadd.f32 %v2229_v4, %v1725_v21  ;;  %v7848_v4 = vld [vmem:[%s10760_s6 + $0x270] sm:$0xff] }
 0x314   :  { %2808 = vmatpush.bf16.msrb.mxu2 %v7800_v58  ;;  %3036 = vmatpush.bf16.msrb.mxu1 %v7824_v26  ;;  %v9916_v26 = vperm.slane %v9668_v61, 0 }
 0x315   :  { %2821 = vmatpush.bf16.msrb.mxu3 %v7808_v50  ;;  %v7845_v50 = vld [vmem:[%s10760_s6 + $0x258] sm:$0xff] }
 0x316   :  { %v1689_v41 = vpop.f32.mrf.mxu2  ;;  %v1727_v9 = vpop.f32.mrf.mxu3  ;;  %3264 = vmatpush.bf16.msra.mxu0 %v7848_v4 }
 0x317   :  { %v1690_v36 = vadd.f32 %v1689_v41, %v9270_v40  ;;  %v7822_v40 = vld [vmem:[%s10760_s6 + $0x1a0] sm:$0xff] }
 0x318   :  { %3037 = vmatpush.bf16.msrb.mxu1 %v7823_v34  ;;  %v9921_v34 = vperm.slane %v9668_v61, 1  ;;  %v2209_v61 = vadd.f32 %v9675_v16, %v9673_v44 }
 0x319   :  { %v1728_v20 = vadd.f32 %v1727_v9, %v1690_v36  ;;  %v2195_v12 = vpop.f32.mrf.mxu0  ;;  %v2233_v21 = vpop.f32.mrf.mxu1  ;;  %v1667_v9 = vadd.f32 %v9678_v62, %v9076_v47 }
 0x31a   :  { %3265 = vmatpush.bf16.msra.mxu0 %v7847_v25  ;;  %v2276_v25 = vadd.f32 %v9916_v26, %v9523_v48  ;;  %v2057_v12 = vadd.f32 %v9521_v53, %v9519_v52 }
 0x31b   :  { %v9901_v45 = vadd.f32 %v2232_v51, %v1728_v20  ;;  %v7844_v51 = vld [vmem:[%s10760_s6 + $0x250] sm:$0xff]  ;;  %v1705_v21 = vadd.f32 %v9680_v59, %v1667_v9  ;;  %v7835_v59 = vld [vmem:[%s10760_s6 + $0x208] sm:$0xff] }
 0x31c   :  { %3038 = vmatpush.bf16.msrb.mxu1 %v7822_v40  ;;  %v2238_v47 = vadd.f32 %v2057_v12, %v9538_v17  ;;  %v7843_v17 = vld [vmem:[%s10760_s6 + $0x248] sm:$0xff]  ;;  %v7834_v12 = vld [vmem:[%s10760_s6 + $0x200] sm:$0xff] }
 0x31e   :  { %v1691_v38 = vpop.f32.mrf.mxu2  ;;  %v1729_v58 = vpop.f32.mrf.mxu3  ;;  %3266 = vmatpush.bf16.msra.mxu0 %v7846_v27  ;;  %v2309_v27 = vmax.f32 %v2276_v25, 0.0 }
 0x322   :  { %3267 = vmatpush.bf16.msra.mxu0 %v7845_v50  ;;  %v2240_v50 = vadd.f32 %v2209_v61, %v1705_v21  ;;  %v7842_v21 = vld [vmem:[%s10760_s6 + $0x240] sm:$0xff]  ;;  %v2282_v61 = vadd.f32 %v9916_v26, %v9563_v60 }
 0x324   :  { %v2281_v44 = vadd.f32 %v9671_v49, %v2240_v50  ;;  %v7841_v50 = vld [vmem:[%s10760_s6 + $0x238] sm:$0xff] }
 0x326   :  { %v2092_v4 = vpop.f32.mrf.mxu2  ;;  %v2130_v41 = vpop.f32.mrf.mxu3  ;;  %3268 = vmatpush.bf16.msra.mxu0 %v7844_v51 }
 0x327   :  { %v2131_v36 = vadd.f32 %v2130_v41, %v2092_v4 }
 0x329   :  { %v2236_v20 = vadd.f32 %v2131_v36, %v9328_v0  ;;  %v2279_v0 = vadd.f32 %v9916_v26, %v2238_v47 }
 0x32b   :  { %v2277_v40 = vadd.f32 %v9921_v34, %v2236_v20  ;;  %v2312_v36 = vmax.f32 %v2279_v0, 0.0 }
 0x32d   :  { %v2310_v62 = vmax.f32 %v2277_v40, 0.0  ;;  %v2314_v40 = vmax.f32 %v2281_v44, 0.0 }
 0x32e   :  { %v2094_v38 = vpop.f32.mrf.mxu2  ;;  %v2132_v58 = vpop.f32.mrf.mxu3 }
 0x32f   :  { %v2342_v48 = vpack.c.bf16 %v2310_v62, %v2309_v27  ;;  %v2133_v51 = vadd.f32 %v2132_v58, %v2094_v38  ;;  %v7833_v58 = vld [vmem:[%s10760_s6 + $0x1f8] sm:$0xff] }
 0x331   :  { %v2411_v4 = vunpack.c.l.b16 %v2342_v48  ;;  %v2412_v52 = vunpack.c.h.b16 %v2342_v48  ;;  %v2239_v53 = vadd.f32 %v2133_v51, %v9354_v43  ;;  %v2062_v48 = vadd.f32 %v9561_v10, %v9559_v6  ;;  %v7832_v6 = vld [vmem:[%s10760_s6 + $0x1f0] sm:$0xff] }
 0x332   :  { %v2345_v51 = vpack.c.bf16 %v2314_v40, %v2314_v40  ;;  %v7840_v10 = vld [vmem:[%s10760_s6 + $0x230] sm:$0xff] }
 0x333   :  { %v2414_v16 = vpack.c.b16 %v2411_v4, %v2411_v4  ;;  %v2415_v41 = vpack.c.b16 %v2412_v52, %v2412_v52  ;;  %v2280_v9 = vadd.f32 %v9921_v34, %v2239_v53  ;;  %v2315_v4 = vmax.f32 %v2282_v61, 0.0 }
 0x334   :  { %v2244_v52 = vadd.f32 %v2062_v48, %v9590_v33  ;;  %v2647_v44 = vunpack.c.l.b16 %v2345_v51  ;;  %v7856_v33 = vld [vmem:[%s10760_s6 + $0x2b0] sm:$0xff] }
 0x335   :  { %v2313_v25 = vmax.f32 %v2280_v9, 0.0  ;;  %2563 = vmatmul.bf16.vlgmr.msra.gmra.mxu2 %v2414_v16  ;;  %2576 = vmatmul.bf16.vlgmr.msra.gmra.mxu3 %v2415_v41 }
 0x336   :  { %3046 = vmatpush.bf16.msra.mxu3 %v7835_v59  ;;  %3248 = vmatpush.bf16.msra.mxu2 %v7843_v17  ;;  %v2097_v43 = vpop.f32.mrf.mxu2  ;;  %v2135_v20 = vpop.f32.mrf.mxu3 }
 0x337   :  { %v2344_v27 = vpack.c.bf16 %v2313_v25, %v2312_v36  ;;  %v2136_v47 = vadd.f32 %v2135_v20, %v2097_v43  ;;  %v1672_v36 = vadd.f32 %v9696_v55, %v9150_v57  ;;  %v2285_v25 = vadd.f32 %v9916_v26, %v2244_v52  ;;  %v7839_v57 = vld [vmem:[%s10760_s6 + $0x228] sm:$0xff]  ;;  %v7886_v52 = vld [vmem:[%s10760_s6 + $0x3a0] sm:$0xff] }
 0x338   :  { %v2284_v55 = vadd.f32 %v9671_v49, %v9691_v28  ;;  %v7830_v28 = vld [vmem:[%s10760_s6 + $0x1e0] sm:$0xff] }
 0x339   :  { %v2645_v62 = vunpack.c.l.b16 %v2344_v27  ;;  %v2242_v38 = vadd.f32 %v2136_v47, %v9410_v15  ;;  %v7857_v15 = vld [vmem:[%s10760_s6 + $0x2b8] sm:$0xff]  ;;  %v2646_v16 = vunpack.c.h.b16 %v2344_v27  ;;  %v1710_v61 = vadd.f32 %v9698_v30, %v1672_v36 }
 0x33a   :  { %3047 = vmatpush.bf16.msra.mxu3 %v7834_v12  ;;  %3249 = vmatpush.bf16.msra.mxu2 %v7842_v21  ;;  %v7831_v12 = vld [vmem:[%s10760_s6 + $0x1e8] sm:$0xff]  ;;  %v2650_v21 = vpack.c.b16 %v2647_v44, %v2647_v44 }
 0x33b   :  { %v2648_v0 = vpack.c.b16 %v2645_v62, %v2645_v62  ;;  %v2283_v60 = vadd.f32 %v9921_v34, %v2242_v38  ;;  %v2649_v40 = vpack.c.b16 %v2646_v16, %v2646_v16  ;;  %v7887_v62 = vld [vmem:[%s10760_s6 + $0x3a8] sm:$0xff]  ;;  %v2318_v38 = vmax.f32 %v2285_v25, 0.0  ;;  %v7837_v16 = vld [vmem:[%s10760_s6 + $0x218] sm:$0xff] }
 0x33d   :  { %v2316_v53 = vmax.f32 %v2283_v60, 0.0  ;;  %2796 = vmatmul.bf16.vlgmr.msra.gmra.mxu1 %v2648_v0 }
 0x33e   :  { %3048 = vmatpush.bf16.msra.mxu3 %v7833_v58  ;;  %3250 = vmatpush.bf16.msra.mxu2 %v7841_v50  ;;  %v2099_v59 = vpop.f32.mrf.mxu2  ;;  %v2137_v17 = vpop.f32.mrf.mxu3  ;;  %v2214_v50 = vadd.f32 %v9689_v3, %v9687_v24  ;;  %v7854_v24 = vld [vmem:[%s10760_s6 + $0x2a0] sm:$0xff]  ;;  %v2317_v3 = vmax.f32 %v2284_v55, 0.0 }
 0x33f   :  { %v2346_v41 = vpack.c.bf16 %v2316_v53, %v2315_v4  ;;  %3276 = vmatpush.bf16.msra.mxu1 %v7857_v15  ;;  %v2138_v9 = vadd.f32 %v2137_v17, %v2099_v59  ;;  %v7838_v15 = vld [vmem:[%s10760_s6 + $0x220] sm:$0xff]  ;;  %v7865_v53 = vld [vmem:[%s10760_s6 + $0x2f8] sm:$0xff]  ;;  %v2288_v59 = vadd.f32 %v9916_v26, %v9603_v22 }
 0x340   :  { %v2246_v4 = vadd.f32 %v2214_v50, %v1710_v61  ;;  %v2347_v22 = vpack.c.bf16 %v2317_v3, %v2317_v3  ;;  %v7872_v3 = vld [vmem:[%s10760_s6 + $0x330] sm:$0xff] }
 0x341   :  { %v2875_v43 = vunpack.c.l.b16 %v2346_v41  ;;  %v2245_v20 = vadd.f32 %v2138_v9, %v9439_v32  ;;  %v7855_v32 = vld [vmem:[%s10760_s6 + $0x2a8] sm:$0xff]  ;;  %v2876_v30 = vunpack.c.h.b16 %v2346_v41  ;;  %v7853_v41 = vld [vmem:[%s10760_s6 + $0x298] sm:$0xff]  ;;  %v2321_v9 = vmax.f32 %v2288_v59, 0.0 }
 0x342   :  { %3049 = vmatpush.bf16.msra.mxu3 %v7832_v6  ;;  %3251 = vmatpush.bf16.msra.mxu2 %v7840_v10  ;;  %v2067_v6 = vadd.f32 %v9601_v37, %v9599_v11  ;;  %v7885_v11 = vld [vmem:[%s10760_s6 + $0x398] sm:$0xff]  ;;  %v7864_v37 = vld [vmem:[%s10760_s6 + $0x2f0] sm:$0xff] }
 0x343   :  { %v2878_v27 = vpack.c.b16 %v2875_v43, %v2875_v43  ;;  %v2286_v47 = vadd.f32 %v9921_v34, %v2245_v20  ;;  %3277 = vmatpush.bf16.msra.mxu1 %v7856_v33  ;;  %v2879_v10 = vpack.c.b16 %v2876_v30, %v2876_v30 }
 0x344   :  { %v2250_v33 = vadd.f32 %v2067_v6, %v9606_v2 }
 0x345   :  { %v2319_v58 = vmax.f32 %v2286_v47, 0.0  ;;  %2809 = vmatmul.bf16.vlgmr.msrb.gmra.mxu2 %v2649_v40  ;;  %6316 = vmatmul.msk.bf16.vlgmr.msrb.gmra.mxu3 %vm2551_vm4, %v2650_v21  ;;  %v7836_v21 = vld [vmem:[%s10760_s6 + $0x210] sm:$0xff] }
 0x346   :  { %3026 = vmatmul.bf16.vlgmr.msrb.gmra.mxu0 %v2878_v27  ;;  %3050 = vmatpush.bf16.msra.mxu3 %v7831_v12  ;;  %v2102_v48 = vpop.f32.mrf.mxu2  ;;  %v2140_v51 = vpop.f32.mrf.mxu3  ;;  %v7852_v40 = vld [vmem:[%s10760_s6 + $0x290] sm:$0xff]  ;;  %v2877_v27 = vunpack.c.l.b16 %v2347_v22  ;;  %v2291_v55 = vadd.f32 %v9916_v26, %v2250_v33  ;;  %v7871_v22 = vld [vmem:[%s10760_s6 + $0x328] sm:$0xff] }
 0x347   :  { %v10000_v0 = vpack.c.bf16 %v2319_v58, %v2318_v38  ;;  %3252 = vmatpush.bf16.msra.mxu2 %v7839_v57  ;;  %3278 = vmatpush.bf16.msra.mxu1 %v7855_v32  ;;  %v2141_v60 = vadd.f32 %v2140_v51, %v2102_v48  ;;  %v7884_v57 = vld [vmem:[%s10760_s6 + $0x390] sm:$0xff]  ;;  %v7863_v32 = vld [vmem:[%s10760_s6 + $0x2e8] sm:$0xff]  ;;  %v7873_v38 = vld [vmem:[%s10760_s6 + $0x338] sm:$0xff] }
 0x348   :  { %3708 = vmatpush.bf16.msrb.mxu0 %v7887_v62  ;;  %v7879_v58 = vld [vmem:[%s10760_s6 + $0x368] sm:$0xff]  ;;  %v2880_v48 = vpack.c.b16 %v2877_v27, %v2877_v27  ;;  %v7860_v33 = vld [vmem:[%s10760_s6 + $0x2d0] sm:$0xff] }
 0x349   :  { %v2248_v17 = vadd.f32 %v2141_v60, %v9444_v31  ;;  %v2287_v31 = vadd.f32 %v9671_v49, %v2246_v4  ;;  %v3105_v2 = vunpack.c.l.b16 %v10000_v0  ;;  %v3106_v61 = vunpack.c.h.b16 %v10000_v0  ;;  %v7862_v0 = vld [vmem:[%s10760_s6 + $0x2e0] sm:$0xff] }
 0x34a   :  { %3051 = vmatpush.bf16.msra.mxu3 %v7830_v28  ;;  %v2324_v60 = vmax.f32 %v2291_v55, 0.0  ;;  %v7878_v4 = vld [vmem:[%s10760_s6 + $0x360] sm:$0xff]  ;;  %v7869_v55 = vld [vmem:[%s10760_s6 + $0x318] sm:$0xff] }
 0x34b   :  { %v2289_v44 = vadd.f32 %v9921_v34, %v2248_v17  ;;  %3253 = vmatpush.bf16.msra.mxu2 %v7838_v15  ;;  %3279 = vmatpush.bf16.msra.mxu1 %v7854_v24  ;;  %v2320_v47 = vmax.f32 %v2287_v31, 0.0  ;;  %v3108_v28 = vpack.c.b16 %v3105_v2, %v3105_v2  ;;  %v3109_v15 = vpack.c.b16 %v3106_v61, %v3106_v61  ;;  %v7877_v31 = vld [vmem:[%s10760_s6 + $0x358] sm:$0xff]  ;;  %v7859_v2 = vld [vmem:[%s10760_s6 + $0x2c8] sm:$0xff] }
 0x34c   :  { %3709 = vmatpush.bf16.msrb.mxu0 %v7886_v52  ;;  %v7875_v61 = vld [vmem:[%s10760_s6 + $0x348] sm:$0xff] }
 0x34d   :  { %v2322_v36 = vmax.f32 %v2289_v44, 0.0  ;;  %3039 = vmatmul.bf16.vlgmr.msrb.gmra.mxu1 %v2879_v10  ;;  %v2349_v51 = vpack.c.bf16 %v2320_v47, %v2320_v47  ;;  %v7882_v10 = vld [vmem:[%s10760_s6 + $0x380] sm:$0xff]  ;;  %v7861_v44 = vld [vmem:[%s10760_s6 + $0x2d8] sm:$0xff]  ;;  %v7880_v47 = vld [vmem:[%s10760_s6 + $0x370] sm:$0xff] }
 0x34e   :  { %3478 = vmatpush.bf16.msrb.mxu3 %v7865_v53  ;;  %v2104_v25 = vpop.f32.mrf.mxu2  ;;  %v2142_v43 = vpop.f32.mrf.mxu3 }
 0x34f   :  { %v10034_v20 = vpack.c.bf16 %v2322_v36, %v2321_v9  ;;  %3254 = vmatpush.bf16.msra.mxu2 %v7837_v16  ;;  %3280 = vmatpush.bf16.msra.mxu1 %v7853_v41  ;;  %v2143_v12 = vadd.f32 %v2142_v43, %v2104_v25  ;;  %v3107_v6 = vunpack.c.l.b16 %v2349_v51  ;;  %v2294_v16 = vadd.f32 %v9916_v26, %v9619_v35 }
 0x350   :  { %3710 = vmatpush.bf16.msrb.mxu0 %v7885_v11  ;;  %v2072_v11 = vadd.f32 %v9617_v8, %v9615_v46  ;;  %v7870_v46 = vld [vmem:[%s10760_s6 + $0x320] sm:$0xff]  ;;  %v7876_v8 = vld [vmem:[%s10760_s6 + $0x350] sm:$0xff] }
 0x351   :  { %v2251_v62 = vadd.f32 %v2143_v12, %v9455_v29  ;;  %v7883_v29 = vld [vmem:[%s10760_s6 + $0x388] sm:$0xff]  ;;  %v3110_v9 = vpack.c.b16 %v3107_v6, %v3107_v6  ;;  %v2327_v36 = vmax.f32 %v2294_v16, 0.0  ;;  %v2290_v12 = vadd.f32 %v9671_v49, %v9729_v18 }
 0x352   :  { %3479 = vmatpush.bf16.msrb.mxu3 %v7864_v37  ;;  %v2256_v25 = vadd.f32 %v2072_v11, %v9625_v5  ;;  %v3335_v51 = vunpack.c.l.b16 %v10034_v20  ;;  %v2300_v6 = vadd.f32 %v9916_v26, %v9641_v23  ;;  %v7867_v16 = vld [vmem:[%s10760_s6 + $0x308] sm:$0xff]  ;;  %v10786_v23 = vld [vmem:[#allocation4_spill] sm:$0xff]  ;;  %v10787_v11 = vld [vmem:[#allocation5_spill] sm:$0xff] }
 0x353   :  { %v2292_v50 = vadd.f32 %v9921_v34, %v2251_v62  ;;  %3255 = vmatpush.bf16.msra.mxu2 %v7836_v21  ;;  %3281 = vmatpush.bf16.msra.mxu1 %v7852_v40  ;;  %v2323_v62 = vmax.f32 %v2290_v12, 0.0 }
 0x354   :  { %3711 = vmatpush.bf16.msrb.mxu0 %v7884_v57  ;;  %v10059_v30 = vpop.f32.mrf.mxu0  ;;  %v2297_v57 = vadd.f32 %v9916_v26, %v2256_v25 }
 0x355   :  { %v2325_v24 = vmax.f32 %v2292_v50, 0.0  ;;  %6449 = vmatmul.msk.bf16.vlgmr.msra.gmra.mxu3 %vm2551_vm4, %v2880_v48  ;;  %v7858_v50 = vld [vmem:[%s10760_s6 + $0x2c0] sm:$0xff] }
 0x356   :  { %3480 = vmatpush.bf16.msrb.mxu3 %v7863_v32  ;;  %3256 = vmatmul.bf16.vlgmr.msra.gmra.mxu2 %v3108_v28  ;;  %v2107_v52 = vpop.f32.mrf.mxu2  ;;  %v2145_v53 = vpop.f32.mrf.mxu3  ;;  %v2330_v48 = vmax.f32 %v2297_v57, 0.0  ;;  %v7909_v57 = vld [vmem:[%s10760_s6 + $0x458] sm:$0xff] }
 0x357   :  { %3491 = vmatpush.bf16.msrb.mxu2 %v7873_v38  ;;  %3506 = vmatpush.bf16.msrb.mxu1 %v7879_v58  ;;  %v10074_v59 = vpack.c.bf16 %v2325_v24, %v2324_v60  ;;  %v2146_v17 = vadd.f32 %v2145_v53, %v2107_v52  ;;  %v7917_v38 = vld [vmem:[%s10760_s6 + $0x498] sm:$0xff]  ;;  %v7916_v24 = vld [vmem:[%s10760_s6 + $0x490] sm:$0xff] }
 0x358   :  { %3269 = vmatmul.bf16.vlgmr.msra.gmra.mxu0 %v3109_v15  ;;  %v7901_v53 = vld [vmem:[%s10760_s6 + $0x418] sm:$0xff] }
 0x359   :  { %3712 = vmatpush.bf16.msrb.mxu0 %v7883_v29  ;;  %v2254_v41 = vadd.f32 %v2146_v17, %v9460_v19  ;;  %v7881_v19 = vld [vmem:[%s10760_s6 + $0x378] sm:$0xff]  ;;  %v3565_v18 = vunpack.c.l.b16 %v10074_v59 }
 0x35a   :  { %3481 = vmatpush.bf16.msrb.mxu3 %v7862_v0  ;;  %v7868_v0 = vld [vmem:[%s10760_s6 + $0x310] sm:$0xff] }
 0x35b   :  { %3492 = vmatpush.bf16.msrb.mxu2 %v7872_v3  ;;  %3507 = vmatpush.bf16.msrb.mxu1 %v7878_v4  ;;  %v2295_v37 = vadd.f32 %v9921_v34, %v2254_v41  ;;  %v3568_v28 = vpack.c.b16 %v3565_v18, %v3565_v18  ;;  %v7895_v3 = vld [vmem:[%s10760_s6 + $0x3e8] sm:$0xff] }
 0x35c   :  { %v2592_v35 = vpop.f32.mrf.mxu0 }
 0x35d   :  { %3713 = vmatpush.bf16.msrb.mxu0 %v7882_v10  ;;  %v2328_v43 = vmax.f32 %v2295_v37, 0.0  ;;  %6582 = vmatmul.msk.bf16.vlgmr.msra.gmra.mxu1 %vm2551_vm4, %v3110_v9  ;;  %v3338_v10 = vpack.c.b16 %v3335_v51, %v3335_v51  ;;  %v2077_v37 = vadd.f32 %v10787_v11, %v10786_v23 }
 0x35e   :  { %3482 = vmatpush.bf16.msrb.mxu3 %v7861_v44  ;;  %v2109_v21 = vpop.f32.mrf.mxu2  ;;  %v2147_v40 = vpop.f32.mrf.mxu3 }
 0x35f   :  { %3493 = vmatpush.bf16.msrb.mxu2 %v7871_v22  ;;  %3508 = vmatpush.bf16.msrb.mxu1 %v7877_v31  ;;  %v10110_v27 = vpack.c.bf16 %v2328_v43, %v2327_v36  ;;  %v2148_v5 = vadd.f32 %v2147_v40, %v2109_v21  ;;  %v10785_v22 = vld [vmem:[#allocation8_spill] sm:$0xff]  ;;  %v7866_v43 = vld [vmem:[%s10760_s6 + $0x300] sm:$0xff] }
 0x360   :  { %v2219_v31 = vadd.f32 %v10785_v22, %v9725_v42  ;;  %v7900_v42 = vld [vmem:[%s10760_s6 + $0x410] sm:$0xff]  ;;  %v7914_v40 = vld [vmem:[%s10760_s6 + $0x480] sm:$0xff] }
 0x361   :  { %3714 = vmatpush.bf16.msrb.mxu0 %v7881_v19  ;;  %v2257_v32 = vadd.f32 %v2148_v5, %v9474_v39  ;;  %v1677_v39 = vadd.f32 %v9743_v54, %v9212_v14  ;;  %v7874_v14 = vld [vmem:[%s10760_s6 + $0x340] sm:$0xff]  ;;  %v2351_v54 = vpack.c.bf16 %v2323_v62, %v2323_v62  ;;  %v2333_v19 = vmax.f32 %v2300_v6, 0.0  ;;  %v7893_v5 = vld [vmem:[%s10760_s6 + $0x3d8] sm:$0xff] }
 0x362   :  { %3483 = vmatpush.bf16.msrb.mxu3 %v7860_v33  ;;  %v10788_v33 = vld [vmem:[#allocation6_spill] sm:$0xff] }
 0x363   :  { %3494 = vmatpush.bf16.msrb.mxu2 %v7870_v46  ;;  %3509 = vmatpush.bf16.msrb.mxu1 %v7876_v8  ;;  %v2298_v58 = vadd.f32 %v9921_v34, %v2257_v32  ;;  %v1715_v17 = vadd.f32 %v9745_v63, %v1677_v39  ;;  %v3337_v41 = vunpack.c.l.b16 %v2351_v54  ;;  %v7915_v63 = vld [vmem:[%s10760_s6 + $0x488] sm:$0xff]  ;;  %v2262_v36 = vadd.f32 %v2077_v37, %v10788_v33  ;;  %v7912_v54 = vld [vmem:[%s10760_s6 + $0x470] sm:$0xff]  ;;  %v7905_v33 = vld [vmem:[%s10760_s6 + $0x438] sm:$0xff] }
 0x364   :  { %v3336_v8 = vunpack.c.h.b16 %v10034_v20  ;;  %v7899_v20 = vld [vmem:[%s10760_s6 + $0x408] sm:$0xff] }
 0x365   :  { %3715 = vmatpush.bf16.msrb.mxu0 %v7880_v47  ;;  %v2331_v29 = vmax.f32 %v2298_v58, 0.0  ;;  %v2252_v35 = vadd.f32 %v2219_v31, %v1715_v17  ;;  %v3340_v46 = vpack.c.b16 %v3337_v41, %v3337_v41  ;;  %v2303_v32 = vadd.f32 %v9916_v26, %v2262_v36  ;;  %v7892_v58 = vld [vmem:[%s10760_s6 + $0x3d0] sm:$0xff]  ;;  %v10790_v17 = vld [vmem:[#allocation7_spill] sm:$0xff]  ;;  %v7890_v41 = vld [vmem:[%s10760_s6 + $0x3c0] sm:$0xff] }
 0x366   :  { %3484 = vmatpush.bf16.msrb.mxu3 %v7859_v2  ;;  %v2112_v60 = vpop.f32.mrf.mxu2  ;;  %v2150_v15 = vpop.f32.mrf.mxu3  ;;  %v3339_v62 = vpack.c.b16 %v3336_v8, %v3336_v8  ;;  %v2306_v6 = vadd.f32 %v9916_v26, %v10790_v17  ;;  %v7896_v26 = vld [vmem:[%s10760_s6 + $0x3f0] sm:$0xff]  ;;  %v7906_v31 = vld [vmem:[%s10760_s6 + $0x440] sm:$0xff] }
 0x367   :  { %3495 = vmatpush.bf16.msrb.mxu2 %v7869_v55  ;;  %3510 = vmatpush.bf16.msrb.mxu1 %v7875_v61  ;;  %v10149_v4 = vpack.c.bf16 %v2331_v29, %v2330_v48  ;;  %v2151_v52 = vadd.f32 %v2150_v15, %v2112_v60  ;;  %v2293_v18 = vadd.f32 %v9671_v49, %v2252_v35  ;;  %v10789_v55 = vld [vmem:[#allocation2_spill] sm:$0xff]  ;;  %v7908_v48 = vld [vmem:[%s10760_s6 + $0x450] sm:$0xff]  ;;  %v7891_v60 = vld [vmem:[%s10760_s6 + $0x3c8] sm:$0xff] }
 0x368   :  { %3716 = vmatmul.bf16.vlgmr.msrb.gmra.mxu0 %v3568_v28  ;;  %v2336_v28 = vmax.f32 %v2303_v32, 0.0  ;;  %v2339_v23 = vmax.f32 %v2306_v6, 0.0  ;;  %v7888_v8 = vld [vmem:[%s10760_s6 + $0x3b0] sm:$0xff]  ;;  %v7918_v17 = vld [vmem:[%s10760_s6 + $0x4a0] sm:$0xff] }
 0x369   :  { %3951 = vmatpush.bf16.msra.mxu0 %v7917_v38  ;;  %v2260_v44 = vadd.f32 %v2151_v52, %v9482_v7  ;;  %v7894_v7 = vld [vmem:[%s10760_s6 + $0x3e0] sm:$0xff]  ;;  %v7913_v38 = vld [vmem:[%s10760_s6 + $0x478] sm:$0xff]  ;;  %v2326_v51 = vmax.f32 %v2293_v18, 0.0  ;;  %v7907_v52 = vld [vmem:[%s10760_s6 + $0x448] sm:$0xff] }
 0x36a   :  { %3485 = vmatpush.bf16.msrb.mxu3 %v7858_v50  ;;  %v7898_v50 = vld [vmem:[%s10760_s6 + $0x400] sm:$0xff]  ;;  %v7928_v32 = vld [vmem:[%s10760_s6 + $0x4f0] sm:$0xff] }
 0x36b   :  { %3496 = vmatpush.bf16.msrb.mxu2 %v7868_v0  ;;  %3511 = vmatpush.bf16.msrb.mxu1 %v7874_v14  ;;  %v2301_v9 = vadd.f32 %v9921_v34, %v2260_v44  ;;  %v7922_v18 = vld [vmem:[%s10760_s6 + $0x4c0] sm:$0xff] }
 0x36d   :  { %3952 = vmatpush.bf16.msra.mxu0 %v7916_v24  ;;  %3486 = vmatmul.bf16.vlgmr.msrb.gmra.mxu3 %v3338_v10  ;;  %v2334_v25 = vmax.f32 %v2301_v9, 0.0  ;;  %v10791_v10 = vld [vmem:[#allocation3_spill] sm:$0xff]  ;;  %v7910_v9 = vld [vmem:[%s10760_s6 + $0x460] sm:$0xff] }
 0x36e   :  { %3721 = vmatpush.bf16.msra.mxu3 %v7895_v3  ;;  %v2114_v12 = vpop.f32.mrf.mxu2  ;;  %v2152_v21 = vpop.f32.mrf.mxu3  ;;  %6715 = vmatmul.msk.bf16.vlgmr.msrb.gmra.mxu1 %vm2551_vm4, %v3340_v46  ;;  %v7897_v3 = vld [vmem:[%s10760_s6 + $0x3f8] sm:$0xff] }
 0x36f   :  { %3736 = vmatpush.bf16.msra.mxu1 %v7901_v53  ;;  %3497 = vmatpush.bf16.msrb.mxu2 %v7867_v16  ;;  %v10186_v47 = vpack.c.bf16 %v2334_v25, %v2333_v19  ;;  %v2153_v2 = vadd.f32 %v2152_v21, %v2114_v12  ;;  %v2353_v53 = vpack.c.bf16 %v2326_v51, %v2326_v51  ;;  %v7911_v16 = vld [vmem:[%s10760_s6 + $0x468] sm:$0xff]  ;;  %v7889_v19 = vld [vmem:[%s10760_s6 + $0x3b8] sm:$0xff]  ;;  %v7904_v12 = vld [vmem:[%s10760_s6 + $0x430] sm:$0xff]  ;;  %v3566_v21 = vunpack.c.h.b16 %v10074_v59 }
 0x370   :  { %v7953_v25 = vld [vmem:[%s10760_s6 + $0x5b8] sm:$0xff]  ;;  %v7903_v59 = vld [vmem:[%s10760_s6 + $0x428] sm:$0xff] }
 0x371   :  { %3953 = vmatpush.bf16.msra.mxu0 %v7915_v63  ;;  %v2263_v61 = vadd.f32 %v2153_v2, %v10789_v55  ;;  %v3567_v63 = vunpack.c.l.b16 %v2353_v53  ;;  %v7929_v2 = vld [vmem:[%s10760_s6 + $0x4f8] sm:$0xff]  ;;  %v7902_v55 = vld [vmem:[%s10760_s6 + $0x420] sm:$0xff]  ;;  %v7947_v53 = vld [vmem:[%s10760_s6 + $0x588] sm:$0xff] }
 0x372   :  { %3722 = vmatpush.bf16.msra.mxu3 %v7894_v7  ;;  %v7931_v7 = vld [vmem:[%s10760_s6 + $0x508] sm:$0xff]  ;;  %v7949_v51 = vld [vmem:[%s10760_s6 + $0x598] sm:$0xff] }
 0x373   :  { %3737 = vmatpush.bf16.msra.mxu1 %v7900_v42  ;;  %3498 = vmatpush.bf16.msrb.mxu2 %v7866_v43  ;;  %v2304_v39 = vadd.f32 %v9921_v34, %v2263_v61  ;;  %v3796_v42 = vunpack.c.h.b16 %v10110_v27  ;;  %v3570_v36 = vpack.c.b16 %v3567_v63, %v3567_v63  ;;  %v7930_v43 = vld [vmem:[%s10760_s6 + $0x500] sm:$0xff]  ;;  %v3795_v61 = vunpack.c.l.b16 %v10110_v27  ;;  %v7939_v27 = vld [vmem:[%s10760_s6 + $0x548] sm:$0xff] }
 0x374   :  { %v4255_v63 = vunpack.c.l.b16 %v10186_v47 }
 0x375   :  { %3954 = vmatpush.bf16.msra.mxu0 %v7914_v40  ;;  %v2337_v29 = vmax.f32 %v2304_v39, 0.0  ;;  %v3799_v46 = vpack.c.b16 %v3796_v42, %v3796_v42  ;;  %v7952_v40 = vld [vmem:[%s10760_s6 + $0x5b0] sm:$0xff]  ;;  %v7934_v42 = vld [vmem:[%s10760_s6 + $0x520] sm:$0xff] }
 0x376   :  { %3723 = vmatpush.bf16.msra.mxu3 %v7893_v5  ;;  %3499 = vmatmul.bf16.vlgmr.msrb.gmra.mxu2 %v3339_v62  ;;  %v2117_v0 = vpop.f32.mrf.mxu2  ;;  %v2155_v14 = vpop.f32.mrf.mxu3  ;;  %v7923_v5 = vld [vmem:[%s10760_s6 + $0x4c8] sm:$0xff]  ;;  %v7950_v62 = vld [vmem:[%s10760_s6 + $0x5a0] sm:$0xff] }
 0x377   :  { %3738 = vmatpush.bf16.msra.mxu1 %v7899_v20  ;;  %3938 = vmatpush.bf16.msra.mxu2 %v7909_v57  ;;  %v10217_v15 = vpack.c.bf16 %v2337_v29, %v2336_v28  ;;  %v2156_v24 = vadd.f32 %v2155_v14, %v2117_v0  ;;  %v3569_v20 = vpack.c.b16 %v3566_v21, %v3566_v21  ;;  %v7951_v57 = vld [vmem:[%s10760_s6 + $0x5a8] sm:$0xff]  ;;  %v7920_v28 = vld [vmem:[%s10760_s6 + $0x4b0] sm:$0xff]  ;;  %v7926_v0 = vld [vmem:[%s10760_s6 + $0x4e0] sm:$0xff] }
 0x378   :  { %v7938_v14 = vld [vmem:[%s10760_s6 + $0x540] sm:$0xff]  ;;  %v7932_v21 = vld [vmem:[%s10760_s6 + $0x510] sm:$0xff] }
 0x379   :  { %3955 = vmatpush.bf16.msra.mxu0 %v7913_v38  ;;  %v2266_v44 = vadd.f32 %v2156_v24, %v10791_v10  ;;  %v7921_v38 = vld [vmem:[%s10760_s6 + $0x4b8] sm:$0xff]  ;;  %v7924_v10 = vld [vmem:[%s10760_s6 + $0x4d0] sm:$0xff] }
 0x37a   :  { %3724 = vmatpush.bf16.msra.mxu3 %v7892_v58  ;;  %v10792_v58 = vld [vmem:[#allocation9_spill] sm:$0xff] }
 0x37b   :  { %3739 = vmatpush.bf16.msra.mxu1 %v7898_v50  ;;  %3939 = vmatpush.bf16.msra.mxu2 %v7908_v48  ;;  %v2307_v22 = vadd.f32 %v9921_v34, %v2266_v44  ;;  %v2296_v39 = vadd.f32 %v9671_v49, %v10792_v58  ;;  %v7927_v50 = vld [vmem:[%s10760_s6 + $0x4e8] sm:$0xff]  ;;  %v3798_v48 = vpack.c.b16 %v3795_v61, %v3795_v61  ;;  %v7936_v44 = vld [vmem:[%s10760_s6 + $0x530] sm:$0xff]  ;;  %v7978_v58 = vld [vmem:[%s10760_s6 + $0x680] sm:$0xff] }
 0x37d   :  { %3956 = vmatpush.bf16.msra.mxu0 %v7912_v54  ;;  %v2340_v11 = vmax.f32 %v2307_v22, 0.0  ;;  %v2329_v29 = vmax.f32 %v2296_v39, 0.0  ;;  %v7948_v54 = vld [vmem:[%s10760_s6 + $0x590] sm:$0xff]  ;;  %v7961_v22 = vld [vmem:[%s10760_s6 + $0x5f8] sm:$0xff]  ;;  %v7955_v39 = vld [vmem:[%s10760_s6 + $0x5c8] sm:$0xff] }
 0x37e   :  { %3725 = vmatpush.bf16.msra.mxu3 %v7891_v60  ;;  %v2119_v34 = vpop.f32.mrf.mxu2  ;;  %v2157_v37 = vpop.f32.mrf.mxu3  ;;  %v7919_v60 = vld [vmem:[%s10760_s6 + $0x4a8] sm:$0xff] }
 0x37f   :  { %3740 = vmatpush.bf16.msra.mxu1 %v7897_v3  ;;  %3940 = vmatpush.bf16.msra.mxu2 %v7907_v52  ;;  %v10248_v35 = vpack.c.bf16 %v2340_v11, %v2339_v23  ;;  %v2355_v24 = vpack.c.bf16 %v2329_v29, %v2329_v29  ;;  %v7925_v3 = vld [vmem:[%s10760_s6 + $0x4d8] sm:$0xff]  ;;  %v7983_v23 = vld [vmem:[%s10760_s6 + $0x6a8] sm:$0xff]  ;;  %v7944_v34 = vld [vmem:[%s10760_s6 + $0x570] sm:$0xff] }
 0x380   :  { %v7937_v52 = vld [vmem:[%s10760_s6 + $0x538] sm:$0xff]  ;;  %v7960_v37 = vld [vmem:[%s10760_s6 + $0x5f0] sm:$0xff]  ;;  %v7954_v29 = vld [vmem:[%s10760_s6 + $0x5c0] sm:$0xff] }
 0x381   :  { %3957 = vmatpush.bf16.msra.mxu0 %v7911_v16  ;;  %v3797_v6 = vunpack.c.l.b16 %v2355_v24  ;;  %v4025_v16 = vunpack.c.l.b16 %v10149_v4 }
 0x382   :  { %3726 = vmatpush.bf16.msra.mxu3 %v7890_v41  ;;  %v7945_v41 = vld [vmem:[%s10760_s6 + $0x578] sm:$0xff] }
 0x383   :  { %3741 = vmatpush.bf16.msra.mxu1 %v7896_v26  ;;  %3941 = vmatpush.bf16.msra.mxu2 %v7906_v31  ;;  %v7946_v26 = vld [vmem:[%s10760_s6 + $0x580] sm:$0xff]  ;;  %v3800_v31 = vpack.c.b16 %v3797_v6, %v3797_v6  ;;  %v4028_v11 = vpack.c.b16 %v4025_v16, %v4025_v16  ;;  %v7972_v16 = vld [vmem:[%s10760_s6 + $0x650] sm:$0xff] }
 0x385   :  { %3958 = vmatpush.bf16.msra.mxu0 %v7910_v9  ;;  %v4258_v9 = vpack.c.b16 %v4255_v63, %v4255_v63  ;;  %v7962_v63 = vld [vmem:[%s10760_s6 + $0x600] sm:$0xff] }
 0x386   :  { %6848 = vmatmul.msk.bf16.vlgmr.msra.gmra.mxu1 %vm2551_vm4, %v3570_v36  ;;  %3727 = vmatpush.bf16.msra.mxu3 %v7889_v19  ;;  %v7982_v19 = vld [vmem:[%s10760_s6 + $0x6a0] sm:$0xff]  ;;  %v7959_v36 = vld [vmem:[%s10760_s6 + $0x5e8] sm:$0xff] }
 0x387   :  { %4168 = vmatpush.bf16.msrb.mxu1 %v7931_v7  ;;  %3942 = vmatpush.bf16.msra.mxu2 %v7905_v33  ;;  %v7935_v7 = vld [vmem:[%s10760_s6 + $0x528] sm:$0xff] }
 0x388   :  { %3959 = vmatmul.bf16.vlgmr.msra.gmra.mxu0 %v3799_v46  ;;  %v7943_v33 = vld [vmem:[%s10760_s6 + $0x568] sm:$0xff]  ;;  %v7981_v46 = vld [vmem:[%s10760_s6 + $0x698] sm:$0xff] }
 0x389   :  { %4398 = vmatpush.bf16.msrb.mxu0 %v7953_v25  ;;  %v2299_v25 = vadd.f32 %v9671_v49, %v9823_v56  ;;  %v7958_v56 = vld [vmem:[%s10760_s6 + $0x5e0] sm:$0xff] }
 0x38a   :  { %3728 = vmatpush.bf16.msra.mxu3 %v7888_v8  ;;  %v7942_v8 = vld [vmem:[%s10760_s6 + $0x560] sm:$0xff] }
 0x38b   :  { %4169 = vmatpush.bf16.msrb.mxu1 %v7930_v43  ;;  %3943 = vmatpush.bf16.msra.mxu2 %v7904_v12  ;;  %v7933_v43 = vld [vmem:[%s10760_s6 + $0x518] sm:$0xff]  ;;  %v2332_v12 = vmax.f32 %v2299_v25, 0.0  ;;  %v2308_v25 = vadd.f32 %v9671_v49, %v9901_v45 }
 0x38d   :  { %4399 = vmatpush.bf16.msrb.mxu0 %v7952_v40  ;;  %3729 = vmatmul.bf16.vlgmr.msra.gmra.mxu3 %v3569_v20  ;;  %v7980_v40 = vld [vmem:[%s10760_s6 + $0x690] sm:$0xff]  ;;  %v2357_v20 = vpack.c.bf16 %v2332_v12, %v2332_v12 }
 0x38e   :  { %3966 = vmatpush.bf16.msrb.mxu3 %v7923_v5  ;;  %v4026_v5 = vunpack.c.h.b16 %v10149_v4  ;;  %v7979_v4 = vld [vmem:[%s10760_s6 + $0x688] sm:$0xff]  ;;  %v8008_v12 = vld [vmem:[%s10760_s6 + $0x770] sm:$0xff] }
 0x38f   :  { %4170 = vmatpush.bf16.msrb.mxu1 %v7929_v2  ;;  %3944 = vmatpush.bf16.msra.mxu2 %v7903_v59  ;;  %v7941_v2 = vld [vmem:[%s10760_s6 + $0x558] sm:$0xff]  ;;  %v4027_v61 = vunpack.c.l.b16 %v2357_v20 }
 0x390   :  { %v7957_v59 = vld [vmem:[%s10760_s6 + $0x5d8] sm:$0xff] }
 0x391   :  { %4400 = vmatpush.bf16.msrb.mxu0 %v7951_v57  ;;  %v7967_v57 = vld [vmem:[%s10760_s6 + $0x628] sm:$0xff] }
 0x392   :  { %3967 = vmatpush.bf16.msrb.mxu3 %v7922_v18  ;;  %v4029_v18 = vpack.c.b16 %v4026_v5, %v4026_v5  ;;  %v7969_v5 = vld [vmem:[%s10760_s6 + $0x638] sm:$0xff] }
 0x393   :  { %4171 = vmatpush.bf16.msrb.mxu1 %v7928_v32  ;;  %3945 = vmatpush.bf16.msra.mxu2 %v7902_v55  ;;  %v7940_v32 = vld [vmem:[%s10760_s6 + $0x550] sm:$0xff] }
 0x394   :  { %v7956_v55 = vld [vmem:[%s10760_s6 + $0x5d0] sm:$0xff] }
 0x395   :  { %4401 = vmatpush.bf16.msrb.mxu0 %v7950_v62  ;;  %v7966_v62 = vld [vmem:[%s10760_s6 + $0x620] sm:$0xff] }
 0x396   :  { %3968 = vmatpush.bf16.msrb.mxu3 %v7921_v38  ;;  %3946 = vmatmul.bf16.vlgmr.msra.gmra.mxu2 %v3798_v48  ;;  %v7975_v38 = vld [vmem:[%s10760_s6 + $0x668] sm:$0xff]  ;;  %v7974_v48 = vld [vmem:[%s10760_s6 + $0x660] sm:$0xff] }
 0x397   :  { %4172 = vmatpush.bf16.msrb.mxu1 %v7927_v50  ;;  %4181 = vmatpush.bf16.msrb.mxu2 %v7939_v27  ;;  %v4030_v50 = vpack.c.b16 %v4027_v61, %v4027_v61  ;;  %v7965_v27 = vld [vmem:[%s10760_s6 + $0x618] sm:$0xff] }
 0x399   :  { %4402 = vmatpush.bf16.msrb.mxu0 %v7949_v51  ;;  %v2302_v51 = vadd.f32 %v9671_v49, %v9853_v1  ;;  %v7964_v1 = vld [vmem:[%s10760_s6 + $0x610] sm:$0xff] }
 0x39a   :  { %3969 = vmatpush.bf16.msrb.mxu3 %v7920_v28  ;;  %v7977_v28 = vld [vmem:[%s10760_s6 + $0x678] sm:$0xff] }
 0x39b   :  { %4173 = vmatpush.bf16.msrb.mxu1 %v7926_v0  ;;  %4182 = vmatpush.bf16.msrb.mxu2 %v7938_v14  ;;  %v4256_v0 = vunpack.c.h.b16 %v10186_v47  ;;  %v7973_v14 = vld [vmem:[%s10760_s6 + $0x658] sm:$0xff]  ;;  %v7976_v47 = vld [vmem:[%s10760_s6 + $0x670] sm:$0xff] }
 0x39d   :  { %4403 = vmatpush.bf16.msrb.mxu0 %v7948_v54  ;;  %v2335_v54 = vmax.f32 %v2302_v51, 0.0 }
 0x39e   :  { %3970 = vmatpush.bf16.msrb.mxu3 %v7919_v60  ;;  %v7989_v60 = vld [vmem:[%s10760_s6 + $0x6d8] sm:$0xff] }
 0x39f   :  { %4174 = vmatpush.bf16.msrb.mxu1 %v7925_v3  ;;  %4183 = vmatpush.bf16.msrb.mxu2 %v7937_v52 }
 0x3a1   :  { %4404 = vmatpush.bf16.msrb.mxu0 %v7947_v53  ;;  %v4486_v53 = vunpack.c.h.b16 %v10217_v15 }
 0x3a2   :  { %3971 = vmatpush.bf16.msrb.mxu3 %v7918_v17  ;;  %v8011_v17 = vld [vmem:[%s10760_s6 + $0x788] sm:$0xff] }
 0x3a3   :  { %4175 = vmatpush.bf16.msrb.mxu1 %v7924_v10  ;;  %4184 = vmatpush.bf16.msrb.mxu2 %v7936_v44  ;;  %v4259_v10 = vpack.c.b16 %v4256_v0, %v4256_v0  ;;  %v7963_v44 = vld [vmem:[%s10760_s6 + $0x608] sm:$0xff]  ;;  %v7984_v0 = vld [vmem:[%s10760_s6 + $0x6b0] sm:$0xff] }
 0x3a5   :  { %6981 = vmatmul.msk.bf16.vlgmr.msrb.gmra.mxu3 %vm2551_vm4, %v3800_v31  ;;  %4405 = vmatpush.bf16.msrb.mxu0 %v7946_v26  ;;  %v4489_v26 = vpack.c.b16 %v4486_v53, %v4486_v53  ;;  %v8010_v31 = vld [vmem:[%s10760_s6 + $0x780] sm:$0xff] }
 0x3a6   :  { %4196 = vmatpush.bf16.msra.mxu3 %v7945_v41  ;;  %4176 = vmatmul.bf16.vlgmr.msrb.gmra.mxu1 %v4028_v11  ;;  %v2359_v41 = vpack.c.bf16 %v2335_v54, %v2335_v54  ;;  %v7987_v11 = vld [vmem:[%s10760_s6 + $0x6c8] sm:$0xff] }
 0x3a7   :  { %4411 = vmatpush.bf16.msra.mxu1 %v7961_v22  ;;  %4185 = vmatpush.bf16.msrb.mxu2 %v7935_v7  ;;  %v7988_v22 = vld [vmem:[%s10760_s6 + $0x6d0] sm:$0xff]  ;;  %v7971_v7 = vld [vmem:[%s10760_s6 + $0x648] sm:$0xff] }
 0x3a8   :  { %4406 = vmatmul.bf16.vlgmr.msrb.gmra.mxu0 %v4258_v9 }
 0x3a9   :  { %4641 = vmatpush.bf16.msra.mxu0 %v7983_v23  ;;  %v4257_v23 = vunpack.c.l.b16 %v2359_v41 }
 0x3aa   :  { %4197 = vmatpush.bf16.msra.mxu3 %v7944_v34  ;;  %v7997_v34 = vld [vmem:[%s10760_s6 + $0x718] sm:$0xff] }
 0x3ab   :  { %4412 = vmatpush.bf16.msra.mxu1 %v7960_v37  ;;  %4186 = vmatpush.bf16.msrb.mxu2 %v7934_v42  ;;  %v2305_v42 = vadd.f32 %v9671_v49, %v9880_v13  ;;  %v7970_v13 = vld [vmem:[%s10760_s6 + $0x640] sm:$0xff] }
 0x3ad   :  { %4642 = vmatpush.bf16.msra.mxu0 %v7982_v19  ;;  %v8009_v19 = vld [vmem:[%s10760_s6 + $0x778] sm:$0xff]  ;;  %v2338_v49 = vmax.f32 %v2305_v42, 0.0 }
 0x3ae   :  { %4198 = vmatpush.bf16.msra.mxu3 %v7943_v33 }
 0x3af   :  { %4413 = vmatpush.bf16.msra.mxu1 %v7959_v36  ;;  %4187 = vmatpush.bf16.msrb.mxu2 %v7933_v43  ;;  %v4904_v36 = vld [vmem:[%s10763_s8 + $0x10] sm:$0x3] }
 0x3b0   :  { %v4919_v45 = vunpack.c.l.b16 %v4904_v36 }
 0x3b1   :  { %4643 = vmatpush.bf16.msra.mxu0 %v7981_v46  ;;  %v4260_v46 = vpack.c.b16 %v4257_v23, %v4257_v23  ;;  %v8002_v23 = vld [vmem:[%s10760_s6 + $0x740] sm:$0xff] }
 0x3b2   :  { %4199 = vmatpush.bf16.msra.mxu3 %v7942_v8  ;;  %v7986_v8 = vld [vmem:[%s10760_s6 + $0x6c0] sm:$0xff]  ;;  %v4922_v61 = vpack.c.b16 %v4919_v45, %v4919_v45  ;;  %v8000_v45 = vld [vmem:[%s10760_s6 + $0x730] sm:$0xff] }
 0x3b3   :  { %4414 = vmatpush.bf16.msra.mxu1 %v7958_v56  ;;  %4188 = vmatpush.bf16.msrb.mxu2 %v7932_v21  ;;  %v7996_v56 = vld [vmem:[%s10760_s6 + $0x710] sm:$0xff]  ;;  %v2341_v21 = vmax.f32 %v2308_v25, 0.0  ;;  %v7990_v25 = vld [vmem:[%s10760_s6 + $0x6e0] sm:$0xff] }
 0x3b5   :  { %4644 = vmatpush.bf16.msra.mxu0 %v7980_v40 }
 0x3b6   :  { %4200 = vmatpush.bf16.msra.mxu3 %v7941_v2  ;;  %4189 = vmatmul.bf16.vlgmr.msrb.gmra.mxu2 %v4029_v18  ;;  %v8113_v2 = vld [vmem:[%s10762_s7] ss:$0 sm:$0xff] }
 0x3b7   :  { %4415 = vmatpush.bf16.msra.mxu1 %v7957_v59  ;;  %4426 = vmatpush.bf16.msra.mxu2 %v7967_v57  ;;  %v10793_v59 = vmov 65535   ;;  %v7985_v57 = vld [vmem:[%s10760_s6 + $0x6b8] sm:$0xff] }
 0x3b8   :  { %v2564_v24 = vpop.f32.mrf.mxu2  ;;  %v2577_v3 = vpop.f32.mrf.mxu3  ;;  %v4931_v20 = vsel %vm4929_vm5, 4294967295, %v10793_v59  ;;  %v7998_v59 = vld [vmem:[%s10760_s6 + $0x720] sm:$0xff] }
 0x3b9   :  { %4645 = vmatpush.bf16.msra.mxu0 %v7979_v4  ;;  %v2578_v52 = vadd.f32 %v2577_v3, %v2564_v24 }
 0x3ba   :  { %4201 = vmatpush.bf16.msra.mxu3 %v7940_v32  ;;  %v2797_v6 = vpop.f32.mrf.mxu1  ;;  %v2361_v32 = vpack.c.bf16 %v2338_v49, %v2338_v49 }
 0x3bb   :  { %4416 = vmatpush.bf16.msra.mxu1 %v7956_v55  ;;  %4427 = vmatpush.bf16.msra.mxu2 %v7966_v62  ;;  %v2591_v40 = vadd.f32 %v10059_v30, %v2578_v52  ;;  %v7995_v30 = vld [vmem:[%s10760_s6 + $0x708] sm:$0xff] }
 0x3bc   :  { %v8007_v62 = vld [vmem:[%s10760_s6 + $0x768] sm:$0xff] }
 0x3bd   :  { %7114 = vmatmul.msk.bf16.vlgmr.msra.gmra.mxu3 %vm2551_vm4, %v4030_v50  ;;  %4646 = vmatpush.bf16.msra.mxu0 %v7978_v58  ;;  %v4932_v58 = vsel %vm4930_vm6, %v4931_v20, 0  ;;  %v2597_v50 = vadd.f32 %v8113_v2, %v2591_v40  ;;  %v7999_v2 = vld [vmem:[%s10760_s6 + $0x728] sm:$0xff]  ;;  %v4716_v20 = vunpack.c.h.b16 %v10248_v35  ;;  %vm5226_vm6 = vcmask 523264  }
 0x3be   :  { %4628 = vmatpush.bf16.msrb.mxu3 %v7975_v38  ;;  %v4934_v24 = vand.u32 %v4932_v58, %v4922_v61 }
 0x3bf   :  { %4417 = vmatpush.bf16.msra.mxu1 %v7955_v39  ;;  %4428 = vmatpush.bf16.msra.mxu2 %v7965_v27  ;;  %v2363_v39 = vpack.c.bf16 %v2341_v21, %v2341_v21 }
 0x3c0   :  { %v2566_v37 = vpop.f32.mrf.mxu2  ;;  %v2579_v9 = vpop.f32.mrf.mxu3 }
 0x3c1   :  { %4647 = vmatpush.bf16.msra.mxu0 %v7977_v28  ;;  %v7968_v28 = vld [vmem:[%s10760_s6 + $0x630] sm:$0xff]  ;;  %v4717_v3 = vunpack.c.l.b16 %v2363_v39 }
 0x3c2   :  { %4629 = vmatpush.bf16.msrb.mxu3 %v7974_v48  ;;  %v2799_v33 = vpop.f32.mrf.mxu1 }
 0x3c3   :  { %4418 = vmatpush.bf16.msra.mxu1 %v7954_v29  ;;  %4429 = vmatpush.bf16.msra.mxu2 %v7964_v1  ;;  %v3027_v43 = vpop.f32.mrf.mxu0  ;;  %v4485_v29 = vunpack.c.l.b16 %v10217_v15  ;;  %v7994_v1 = vld [vmem:[%s10760_s6 + $0x700] sm:$0xff]  ;;  %v4720_v41 = vpack.c.b16 %v4717_v3, %v4717_v3 }
 0x3c4   :  { %v8006_v15 = vld [vmem:[%s10760_s6 + $0x760] sm:$0xff] }
 0x3c5   :  { %4648 = vmatpush.bf16.msra.mxu0 %v7976_v47  ;;  %v4488_v52 = vpack.c.b16 %v4485_v29, %v4485_v29  ;;  %v7993_v47 = vld [vmem:[%s10760_s6 + $0x6f8] sm:$0xff] }
 0x3c6   :  { %4630 = vmatpush.bf16.msrb.mxu3 %v7973_v14  ;;  %4419 = vmatmul.bf16.vlgmr.msra.gmra.mxu1 %v4259_v10  ;;  %v4487_v14 = vunpack.c.l.b16 %v2361_v32  ;;  %v8004_v10 = vld [vmem:[%s10760_s6 + $0x750] sm:$0xff] }
 0x3c7   :  { %4656 = vmatpush.bf16.msrb.mxu1 %v7989_v60  ;;  %4430 = vmatpush.bf16.msra.mxu2 %v7963_v44  ;;  %v8005_v60 = vld [vmem:[%s10760_s6 + $0x758] sm:$0xff] }
 0x3c8   :  { %4649 = vmatmul.bf16.vlgmr.msra.gmra.mxu0 %v4489_v26  ;;  %v2810_v4 = vpop.f32.mrf.mxu2  ;;  %v2823_v18 = vpop.f32.mrf.mxu3  ;;  %v7992_v26 = vld [vmem:[%s10760_s6 + $0x6f0] sm:$0xff] }
 0x3c9   :  { %4886 = vmatpush.bf16.msrb.mxu0 %v8011_v17  ;;  %v2811_v55 = vadd.f32 %v2810_v4, %v2797_v6  ;;  %v4490_v6 = vpack.c.b16 %v4487_v14, %v4487_v14  ;;  %v4719_v4 = vpack.c.b16 %v4716_v20, %v4716_v20 }
 0x3ca   :  { %4631 = vmatpush.bf16.msrb.mxu3 %v7972_v16  ;;  %v3040_v38 = vpop.f32.mrf.mxu1  ;;  %v8013_v16 = vld [vmem:[%s10763_s8 + $0x8] sm:$0xff] }
 0x3cb   :  { %4657 = vmatpush.bf16.msrb.mxu1 %v7988_v22  ;;  %4431 = vmatpush.bf16.msra.mxu2 %v7962_v63  ;;  %v2824_v27 = vadd.f32 %v2823_v18, %v2811_v55  ;;  %v3029_v48 = vpop.f32.mrf.mxu0  ;;  %v3041_v51 = vadd.f32 %v3040_v38, %v3027_v43  ;;  %v8012_v63 = vld [vmem:[%s10763_s8] sm:$0xff] }
 0x3cc   :  { %v4899_v43 = vld [vmem:[%s10764_s1] sm:$0xff] }
 0x3cd   :  { %4887 = vmatpush.bf16.msrb.mxu0 %v8010_v31  ;;  %v2827_v54 = vadd.f32 %v2824_v27, %v2597_v50  ;;  %v8003_v31 = vld [vmem:[%s10760_s6 + $0x748] sm:$0xff] }
 0x3ce   :  { %4632 = vmatpush.bf16.msrb.mxu3 %v7971_v7  ;;  %7247 = vmatmul.msk.bf16.vlgmr.msra.gmra.mxu2 %vm2551_vm4, %v4260_v46  ;;  %v7991_v7 = vld [vmem:[%s10760_s6 + $0x6e8] sm:$0xff]  ;;  %v8001_v46 = vld [vmem:[%s10760_s6 + $0x738] sm:$0xff] }
 0x3cf   :  { %4658 = vmatpush.bf16.msrb.mxu1 %v7987_v11  ;;  %4858 = vmatpush.bf16.msrb.mxu2 %v7997_v34 }
 0x3d0   :  { %v2812_v53 = vpop.f32.mrf.mxu2  ;;  %v2825_v17 = vpop.f32.mrf.mxu3 }
 0x3d1   :  { %4888 = vmatpush.bf16.msrb.mxu0 %v8009_v19 }
 0x3d2   :  { %4633 = vmatpush.bf16.msrb.mxu3 %v7970_v13  ;;  %v3042_v44 = vpop.f32.mrf.mxu1  ;;  %v4715_v13 = vunpack.c.l.b16 %v10248_v35 }
 0x3d3   :  { %4659 = vmatpush.bf16.msrb.mxu1 %v7986_v8  ;;  %4859 = vmatpush.bf16.msrb.mxu2 %v7996_v56  ;;  %v4905_v56 = vpack.c.bf16 %v4899_v43, %v4899_v43 }
 0x3d4   :  { %v4718_v49 = vpack.c.b16 %v4715_v13, %v4715_v13 }
 0x3d5   :  { %4889 = vmatpush.bf16.msrb.mxu0 %v8008_v12  ;;  %v3270_v22 = vpop.f32.mrf.mxu0 }
 0x3d6   :  { %4634 = vmatpush.bf16.msrb.mxu3 %v7969_v5 }
 0x3d7   :  { %4660 = vmatpush.bf16.msrb.mxu1 %v7985_v57  ;;  %4860 = vmatpush.bf16.msrb.mxu2 %v7995_v30 }
 0x3d8   :  { %v3053_v11 = vpop.f32.mrf.mxu3 }
 0x3d9   :  { %4890 = vmatpush.bf16.msrb.mxu0 %v8007_v62  ;;  %v3257_v34 = vpop.f32.mrf.mxu2  ;;  %v3054_v37 = vadd.f32 %v3053_v11, %v3041_v51 }
 0x3da   :  { %4635 = vmatpush.bf16.msrb.mxu3 %v7968_v28  ;;  %v3271_v9 = vadd.f32 %v3270_v22, %v3257_v34  ;;  %v3283_v42 = vpop.f32.mrf.mxu1 }
 0x3db   :  { %4661 = vmatpush.bf16.msrb.mxu1 %v7984_v0  ;;  %4861 = vmatpush.bf16.msrb.mxu2 %v7994_v1  ;;  %v3057_v19 = vadd.f32 %v3054_v37, %v2827_v54 }
 0x3dc   :  { %v3284_v36 = vadd.f32 %v3283_v42, %v3271_v9 }
 0x3dd   :  { %4636 = vmatmul.bf16.vlgmr.msrb.gmra.mxu3 %v4488_v52  ;;  %4891 = vmatpush.bf16.msrb.mxu0 %v8006_v15  ;;  %v3272_v33 = vpop.f32.mrf.mxu0 }
 0x3de   :  { %4871 = vmatpush.bf16.msra.mxu3 %v8005_v60  ;;  %7380 = vmatmul.msk.bf16.vlgmr.msrb.gmra.mxu1 %vm2551_vm4, %v4490_v6  ;;  %v3287_v8 = vadd.f32 %v3284_v36, %v3057_v19 }
 0x3df   :  { %4941 = vmatpush.bf16.msra.mxu1 %v4934_v24  ;;  %4862 = vmatpush.bf16.msrb.mxu2 %v7993_v47 }
 0x3e0   :  { %7513 = vmatmul.msk.bf16.vlgmr.msrb.gmra.mxu0 %vm2551_vm4, %v4720_v41  ;;  %v3055_v12 = vpop.f32.mrf.mxu3 }
 0x3e1   :  { %v3259_v21 = vpop.f32.mrf.mxu2  ;;  %v8030_v12 = vld [vmem:[%s10766_s10 + $0x80] sm:$0xf0] }
 0x3e2   :  { %4872 = vmatpush.bf16.msra.mxu3 %v8004_v10  ;;  %v3285_v40 = vpop.f32.mrf.mxu1  ;;  %v8029_v21 = vld [vmem:[%s10766_s10 + $0x7c] sm:$0xf] }
 0x3e3   :  { %4942 = vmatpush.bf16.msra.mxu1 %v8013_v16  ;;  %4863 = vmatpush.bf16.msrb.mxu2 %v7992_v26 }
 0x3e5   :  { %v3717_v5 = vpop.f32.mrf.mxu0 }
 0x3e6   :  { %4873 = vmatpush.bf16.msra.mxu3 %v8003_v31 }
 0x3e7   :  { %4943 = vmatpush.bf16.msra.mxu1 %v8012_v63  ;;  %4864 = vmatpush.bf16.msrb.mxu2 %v7991_v7 }
 0x3ea   :  { %4874 = vmatpush.bf16.msra.mxu3 %v8002_v23 }
 0x3eb   :  { %4865 = vmatpush.bf16.msrb.mxu2 %v7990_v25  ;;  %v3513_v30 = vpop.f32.mrf.mxu1 }
 0x3ed   :  { %v3719_v57 = vpop.f32.mrf.mxu0 }
 0x3ee   :  { %4875 = vmatpush.bf16.msra.mxu3 %v8001_v46  ;;  %4866 = vmatmul.bf16.vlgmr.msrb.gmra.mxu2 %v4718_v49  ;;  %v8114_v49 = vld [vmem:[%s10765_s9] ss:$0 sm:$0xff] }
 0x3ef   :  { %7522 = vmatmul.msk.bf16.vlgmr.msra.gmra.mxu1 %vm4925_vm7, %v4905_v56  ;;  %vm5318_vm7 = vcmask 31752  }
 0x3f0   :  { %v3487_v18 = vpop.f32.mrf.mxu3 }
 0x3f2   :  { %4876 = vmatpush.bf16.msra.mxu3 %v8000_v45  ;;  %v7585_v45 = vld [vmem:[%s10766_s10 + $0x78] sm:$0xf] }
 0x3f3   :  { %v3515_v32 = vpop.f32.mrf.mxu1  ;;  %v7586_v40 = vor.u32 %v8030_v12, %v7585_v45 }
 0x3f4   :  { %v8026_v32 = vld [vmem:[%s10766_s10 + $0x64] sm:$0xf] }
 0x3f5   :  { %5090 = vmatpush.bf16.msra.mxu2 %v7586_v40 }
 0x3f6   :  { %4877 = vmatpush.bf16.msra.mxu3 %v7999_v2  ;;  %v7593_v2 = vld [vmem:[%s10766_s10 + $0x80] sm:$0xf] }
 0x3f8   :  { %v3489_v55 = vpop.f32.mrf.mxu3 }
 0x3f9   :  { %v3500_v61 = vpop.f32.mrf.mxu2 }
 0x3fa   :  { %4878 = vmatpush.bf16.msra.mxu3 %v7998_v59  ;;  %v3501_v62 = vadd.f32 %v3500_v61, %v3487_v18  ;;  %v8031_v59 = vld [vmem:[%s10766_s10 + $0x88] sm:$0xf0]  ;;  %v7575_v61 = vld [vmem:[%s10766_s10 + $0x6c] sm:$0xf0] }
 0x3fb   :  { %v8027_v18 = vld [vmem:[%s10766_s10 + $0x68] sm:$0xf0] }
 0x3fc   :  { %v3514_v38 = vadd.f32 %v3513_v30, %v3501_v62  ;;  %v7594_v30 = vor.u32 %v8031_v59, %v7593_v2  ;;  %v7581_v62 = vld [vmem:[%s10766_s10 + $0x68] sm:$0xf]  ;;  %v4981_v59 = vld [vmem:[%s10767_s11] sm:$0x7] }
 0x3fd   :  { %4879 = vmatmul.bf16.vlgmr.msra.gmra.mxu3 %v4719_v4  ;;  %v7573_v4 = vld [vmem:[%s10766_s10 + $0x60] sm:$0xf] }
 0x3fe   :  { %v3517_v58 = vadd.f32 %v3514_v38, %v3287_v8  ;;  %v7574_v55 = vor.u32 %v8027_v18, %v7573_v4  ;;  %v8028_v38 = vld [vmem:[%s10766_s10 + $0x70] sm:$0xf0]  ;;  %5116 = vmatpush.bf16.msrb.mxu3 %v7594_v30  ;;  %v4983_v4 = vperm.slane %v4981_v59, 0 }
 0x400   :  { %5091 = vmatpush.bf16.msra.mxu2 %v7574_v55 }
 0x401   :  { %v3502_v50 = vpop.f32.mrf.mxu2 }
 0x402   :  { %v7561_v50 = vld [vmem:[%s10766_s10 + $0x48] sm:$0xf] }
 0x403   :  { %v3743_v39 = vpop.f32.mrf.mxu1 }
 0x405   :  { %v3960_v27 = vpop.f32.mrf.mxu0 }
 0x40b   :  { %v3745_v48 = vpop.f32.mrf.mxu1 }
 0x40c   :  { %v8023_v48 = vld [vmem:[%s10766_s10 + $0x4c] sm:$0xf] }
 0x40d   :  { %v3962_v51 = vpop.f32.mrf.mxu0 }
 0x410   :  { %v3730_v28 = vpop.f32.mrf.mxu3 }
 0x411   :  { %v3731_v29 = vadd.f32 %v3730_v28, %v3717_v5  ;;  %v7587_v5 = vld [vmem:[%s10766_s10 + $0x84] sm:$0xf0]  ;;  %v7563_v28 = vld [vmem:[%s10766_s10 + $0x54] sm:$0xf0] }
 0x412   :  { %v7590_v57 = vor.u32 %v8029_v21, %v7587_v5 }
 0x413   :  { %v3744_v35 = vadd.f32 %v3743_v39, %v3731_v29  ;;  %v7582_v39 = vor.u32 %v8028_v38, %v7581_v62  ;;  %v7569_v29 = vld [vmem:[%s10766_s10 + $0x50] sm:$0xf] }
 0x414   :  { %5103 = vmatpush.bf16.msrb.mxu1 %v7590_v57 }
 0x415   :  { %v3747_v0 = vadd.f32 %v3744_v35, %v3517_v58  ;;  %v7578_v58 = vor.u32 %v8026_v32, %v7575_v61  ;;  %v8025_v35 = vld [vmem:[%s10766_s10 + $0x58] sm:$0xf0]  ;;  %5117 = vmatpush.bf16.msrb.mxu3 %v7582_v39 }
 0x418   :  { %v3732_v1 = vpop.f32.mrf.mxu3  ;;  %5104 = vmatpush.bf16.msrb.mxu1 %v7578_v58 }
 0x419   :  { %v3947_v14 = vpop.f32.mrf.mxu2 }
 0x41a   :  { %v3961_v54 = vadd.f32 %v3960_v27, %v3947_v14  ;;  %v8024_v27 = vld [vmem:[%s10766_s10 + $0x50] sm:$0xf0]  ;;  %v7549_v14 = vld [vmem:[%s10766_s10 + $0x30] sm:$0xf] }
 0x41b   :  { %v7562_v1 = vor.u32 %v8024_v27, %v7561_v50 }
 0x41d   :  { %5092 = vmatpush.bf16.msra.mxu2 %v7562_v1 }
 0x421   :  { %v3949_v24 = vpop.f32.mrf.mxu2 }
 0x422   :  { %v7570_v24 = vor.u32 %v8025_v35, %v7569_v29 }
 0x423   :  { %v4177_v60 = vpop.f32.mrf.mxu1 }
 0x424   :  { %5118 = vmatpush.bf16.msrb.mxu3 %v7570_v24 }
 0x425   :  { %v4407_v15 = vpop.f32.mrf.mxu0 }
 0x428   :  { %v3973_v3 = vpop.f32.mrf.mxu3 }
 0x429   :  { %v3974_v52 = vadd.f32 %v3973_v3, %v3961_v54  ;;  %v8020_v3 = vld [vmem:[%s10766_s10 + $0x34] sm:$0xf] }
 0x42b   :  { %v3977_v47 = vadd.f32 %v3974_v52, %v3747_v0  ;;  %v4179_v53 = vpop.f32.mrf.mxu1  ;;  %v7551_v52 = vld [vmem:[%s10766_s10 + $0x3c] sm:$0xf0] }
 0x42c   :  { %v8022_v53 = vld [vmem:[%s10766_s10 + $0x40] sm:$0xf0] }
 0x42d   :  { %v4409_v17 = vpop.f32.mrf.mxu0 }
 0x430   :  { %v3975_v6 = vpop.f32.mrf.mxu3 }
 0x439   :  { %v4190_v10 = vpop.f32.mrf.mxu2 }
 0x43a   :  { %v4191_v44 = vadd.f32 %v4190_v10, %v4177_v60  ;;  %v7566_v60 = vor.u32 %v8023_v48, %v7563_v28  ;;  %v7554_v10 = vor.u32 %v8020_v3, %v7551_v52 }
 0x43c   :  { %5105 = vmatpush.bf16.msrb.mxu1 %v7566_v60 }
 0x440   :  { %v4203_v16 = vpop.f32.mrf.mxu3  ;;  %5106 = vmatpush.bf16.msrb.mxu1 %v7554_v10 }
 0x441   :  { %v4204_v41 = vadd.f32 %v4203_v16, %v4191_v44  ;;  %v4192_v63 = vpop.f32.mrf.mxu2  ;;  %v7537_v16 = vld [vmem:[%s10766_s10 + $0x18] sm:$0xf] }
 0x442   :  { %v7545_v63 = vld [vmem:[%s10766_s10 + $0x20] sm:$0xf] }
 0x443   :  { %v4420_v22 = vpop.f32.mrf.mxu1  ;;  %v4207_v26 = vadd.f32 %v4204_v41, %v3977_v47  ;;  %v7557_v47 = vld [vmem:[%s10766_s10 + $0x38] sm:$0xf]  ;;  %v8018_v41 = vld [vmem:[%s10766_s10 + $0x20] sm:$0xf0] }
 0x444   :  { %v4421_v31 = vadd.f32 %v4420_v22, %v4407_v15  ;;  %v8021_v15 = vld [vmem:[%s10766_s10 + $0x38] sm:$0xf0]  ;;  %v7558_v44 = vor.u32 %v8022_v53, %v7557_v47 }
 0x445   :  { %v4650_v7 = vpop.f32.mrf.mxu0  ;;  %v7550_v6 = vor.u32 %v8021_v15, %v7549_v14  ;;  %v8017_v22 = vld [vmem:[%s10766_s10 + $0x1c] sm:$0xf] }
 0x446   :  { %5119 = vmatpush.bf16.msrb.mxu3 %v7558_v44 }
 0x447   :  { %5093 = vmatpush.bf16.msra.mxu2 %v7550_v6 }
 0x448   :  { %v4205_v23 = vpop.f32.mrf.mxu3 }
 0x449   :  { %v7538_v23 = vor.u32 %v8018_v41, %v7537_v16 }
 0x44b   :  { %v4422_v11 = vpop.f32.mrf.mxu1  ;;  %5094 = vmatpush.bf16.msra.mxu2 %v7538_v23  ;;  %v8036_v23 = vld [vmem:[%s10769_s12 + $0x20] sm:$0xff] }
 0x44d   :  { %v4652_v34 = vpop.f32.mrf.mxu0 }
 0x451   :  { %v4433_v37 = vpop.f32.mrf.mxu2 }
 0x452   :  { %v4434_v9 = vadd.f32 %v4433_v37, %v4421_v31  ;;  %v7539_v31 = vld [vmem:[%s10766_s10 + $0x24] sm:$0xf0] }
 0x453   :  { %v7542_v11 = vor.u32 %v8017_v22, %v7539_v31 }
 0x454   :  { %v4437_v42 = vadd.f32 %v4434_v9, %v4207_v26 }
 0x455   :  { %5107 = vmatpush.bf16.msrb.mxu1 %v7542_v11 }
 0x459   :  { %v4435_v33 = vpop.f32.mrf.mxu2 }
 0x45b   :  { %v4663_v19 = vpop.f32.mrf.mxu1 }
 0x45d   :  { %v10590_v36 = vpop.f32.mrf.mxu0 }
 0x460   :  { %v4637_v25 = vpop.f32.mrf.mxu3 }
 0x461   :  { %v4651_v43 = vadd.f32 %v4650_v7, %v4637_v25  ;;  %v8019_v7 = vld [vmem:[%s10766_s10 + $0x28] sm:$0xf0] }
 0x462   :  { %v7546_v34 = vor.u32 %v8019_v7, %v7545_v63  ;;  %v8037_v7 = vld [vmem:[%s10769_s12 + $0x28] sm:$0xff] }
 0x463   :  { %v4664_v13 = vadd.f32 %v4663_v19, %v4651_v43  ;;  %v4665_v46 = vpop.f32.mrf.mxu1  ;;  %v7525_v43 = vld [vmem:[%s10766_s10] sm:$0xf]  ;;  %5269 = vmatpush.bf16.msra.mxu0 %v8037_v7 }
 0x464   :  { %5120 = vmatpush.bf16.msrb.mxu3 %v7546_v34  ;;  %v8014_v46 = vld [vmem:[%s10766_s10 + $0x4] sm:$0xf] }
 0x465   :  { %v10592_v8 = vadd.f32 %v4664_v13, %v4437_v42  ;;  %v4895_v56 = vpop.f32.mrf.mxu0  ;;  %v8015_v13 = vld [vmem:[%s10766_s10 + $0x8] sm:$0xf0] }
 0x466   :  { %v7526_v56 = vor.u32 %v8015_v13, %v7525_v43 }
 0x467   :  { %5270 = vmatpush.bf16.msra.mxu0 %v8036_v23 }
 0x468   :  { %v4639_v20 = vpop.f32.mrf.mxu3  ;;  %5095 = vmatpush.bf16.msra.mxu2 %v7526_v56 }
 0x469   :  { %v4984_v20 = vperm.slane %v4981_v59, 1 }
 0x46c   :  { %v4945_v51 = vpop.f32.mrf.mxu1 }
 0x46d   :  { %v4946_v0 = vadd.f32 %v8114_v49, %v4945_v51  ;;  %v8016_v49 = vld [vmem:[%s10766_s10 + $0x10] sm:$0xf0] }
 0x46f   :  { %v4949_v54 = vmax.f32 %v4946_v0, 0.0 }
 0x471   :  { %4951 = vrot.lane.b32.xlu0 %v4949_v54, %s8140_s20  ;;  %v4867_v17 = vpop.f32.mrf.mxu2 }
 0x474   :  { %v4947_v26 = vpop.f32.mrf.mxu1 }
 0x479   :  { %v4869_v37 = vpop.f32.mrf.mxu2 }
 0x480   :  { %v4880_v9 = vpop.f32.mrf.mxu3 }
 0x481   :  { %v4881_v42 = vadd.f32 %v4880_v9, %v4867_v17  ;;  %v4985_v17 = vperm.slane %v4981_v59, 2  ;;  %v8035_v9 = vld [vmem:[%s10769_s12 + $0x18] sm:$0xff] }
 0x482   :  { %5271 = vmatpush.bf16.msra.mxu0 %v8035_v9 }
 0x483   :  { %v4894_v19 = vadd.f32 %v10590_v36, %v4881_v42  ;;  %v7527_v36 = vld [vmem:[%s10766_s10 + $0xc] sm:$0xf0] }
 0x484   :  { %v7530_v45 = vor.u32 %v8014_v46, %v7527_v36 }
 0x485   :  { %v4897_v33 = vadd.f32 %v4894_v19, %v10592_v8  ;;  %v7533_v8 = vld [vmem:[%s10766_s10 + $0x8] sm:$0xf]  ;;  %s8141_s10 = smov 64  }
 0x486   :  { %v7534_v12 = vor.u32 %v8016_v49, %v7533_v8  ;;  %5108 = vmatpush.bf16.msrb.mxu1 %v7530_v45 }
 0x487   :  { %v4898_v21 = vmax.f32 %v4897_v33, 0.0  ;;  %v8034_v33 = vld [vmem:[%s10769_s12 + $0x10] sm:$0xff] }
 0x488   :  { %v4882_v25 = vpop.f32.mrf.mxu3  ;;  %5121 = vmatpush.bf16.msrb.mxu3 %v7534_v12  ;;  %5272 = vmatpush.bf16.msra.mxu0 %v8034_v33 }
 0x4e3   :  { %v4952_v40 = vpop.permute.xlu0 %4951 }
 0x4e4   :  { %v4955_v5 = vsel %vm4954_vm8, %v4898_v21, %v4952_v40 }
 0x4e5   :  { %v4980_v2 = vpack.c.bf16 %v4955_v5, %v4955_v5 }
 0x4e7   :  { %7595 = vmatmul.msk.bf16.vlgmr.msra.gmra.mxu2 %vm2551_vm4, %v4980_v2  ;;  %7596 = vmatmul.msk.bf16.vlgmr.msrb.gmra.mxu1 %vm2551_vm4, %v4980_v2 }
 0x4e8   :  { %7597 = vmatmul.msk.bf16.vlgmr.msrb.gmra.mxu3 %vm2551_vm4, %v4980_v2 }
 0x564   :  { %v5110_v57 = vpop.f32.mrf.mxu1 }
 0x565   :  { %v5111_v30 = vadd.f32 %v5110_v57, %v4984_v20 }
 0x567   :  { %8117 = vtanh.f32 %v5111_v30  ;;  %v7599_v6 = vmul.f32 -1.442695, %v5111_v30 }
 0x56a   :  { %v5097_v18 = vpop.f32.mrf.mxu2 }
 0x56b   :  { %v5098_v32 = vadd.f32 %v5097_v18, %v4983_v4  ;;  %v5123_v55 = vpop.f32.mrf.mxu3  ;;  %v8033_v4 = vld [vmem:[%s10769_s12 + $0x8] sm:$0xff]  ;;  %v8032_v18 = vld [vmem:[%s10769_s12] sm:$0xff] }
 0x56c   :  { %v5112_v61 = vpop.f32.mrf.mxu1  ;;  %v5124_v10 = vadd.f32 %v5123_v55, %v4985_v17  ;;  %5273 = vmatpush.bf16.msra.mxu0 %v8033_v4  ;;  %v8038_v55 = vld [vmem:[%s10770_s14] sm:$0xff] }
 0x56d   :  { %v8118_v62 = vpop.eup %8117  ;;  %8119 = vtanh.f32 %v5098_v32  ;;  %v7598_v50 = vmul.f32 -1.442695, %v5098_v32  ;;  %v8039_v32 = vld [vmem:[%s10770_s14 + $0x8] sm:$0xff] }
 0x56e   :  { %5152 = vrot.lane.b32.xlu1 %v8118_v62, %s8140_s20  ;;  %v7600_v44 = vmul.f32 -1.442695, %v5124_v10  ;;  %5311 = vmatpush.bf16.msrb.mxu2 %v8039_v32 }
 0x56f   :  { %8121 = vpow2.f32 %v7598_v50 }
 0x570   :  { %5274 = vmatpush.bf16.msra.mxu0 %v8032_v18 }
 0x572   :  { %v5099_v38 = vpop.f32.mrf.mxu2  ;;  %5312 = vmatpush.bf16.msrb.mxu2 %v8038_v55 }
 0x573   :  { %v8120_v58 = vpop.eup %8119  ;;  %v5125_v39 = vpop.f32.mrf.mxu3 }
 0x574   :  { %5150 = vrot.lane.b32.xlu0 %v8120_v58, %s8140_s20  ;;  %v8115_v58 = vld [vmem:[%s10768_s13] ss:$0 sm:$0xff]  ;;  %s8142_s13 = smov 127  }
 0x575   :  { %v8122_v27 = vpop.eup %8121 }
 0x576   :  { %v5130_v48 = vadd.f32 1.0, %v8122_v27 }
 0x578   :  { %8123 = vrcp.f32 %v5130_v48  ;;  %v5142_v1 = vand.u32 2147483648, %v5130_v48  ;;  %vm5136_vm10 = vweird.f32 %v5130_v48  ;;  %v5140_v14 = vand.u32 2147483647, %v5130_v48 }
 0x57a   :  { %v5143_v60 = vor.u32 1.1754944e-38, %v5142_v1  ;;  %vm5141_vm12 = vcmp.eq.f32.partialorder %v5140_v14, 8.507059e+37 }
 0x57e   :  { %v8124_v51 = vpop.eup %8123 }
 0x57f   :  { %v5132_v28 = vmul.f32 %v8124_v51, %v5130_v48  ;;  %vm5137_vm9 = vweird.f32 %v8124_v51 }
 0x580   :  { %vm5138_vm11 = vmor %vm5136_vm10, %vm5137_vm9  ;;  %vm5337_vm9 = vcmask 31744  }
 0x581   :  { %v5133_v29 = vsub.f32 1.0, %v5132_v28  ;;  %v8116_v28 = vld [vmem:[%s10771_s15] ss:$0 sm:$0xff] }
 0x583   :  { %v5134_v35 = vmul.f32 %v8124_v51, %v5133_v29 }
 0x585   :  { %v5135_v0 = vadd.f32 %v8124_v51, %v5134_v35 }
 0x587   :  { %v5139_v54 = vsel %vm5138_vm11, %v8124_v51, %v5135_v0 }
 0x588   :  { %v5144_v3 = vsel %vm5141_vm12, %v5143_v60, %v5139_v54 }
 0x5e0   :  { %v5153_v24 = vpop.permute.xlu1 %5152 }
 0x5e6   :  { %v5151_v15 = vpop.permute.xlu0 %5150 }
 0x5e7   :  { %v5154_v52 = vsel %vm4954_vm8, %v5151_v15, %v5153_v24 }
 0x5e8   :  { %v5156_v47 = vmul.f32 %v5154_v52, %v5144_v3 }
 0x5ea   :  { %8125 = vtanh.f32 %v5156_v47 }
 0x5eb   :  { %8127 = vpow2.f32 %v7599_v6 }
 0x5ec   :  { %8129 = vpow2.f32 %v7600_v44 }
 0x5f0   :  { %v8126_v53 = vpop.eup %8125 }
 0x5f1   :  { %5197 = vrot.lane.b32.xlu1 %v8126_v53, %s8141_s10  ;;  %v8128_v16 = vpop.eup %8127 }
 0x5f2   :  { %v5163_v41 = vadd.f32 1.0, %v8128_v16  ;;  %v8130_v22 = vpop.eup %8129 }
 0x5f3   :  { %v5164_v26 = vadd.f32 1.0, %v8130_v22 }
 0x5f4   :  { %8131 = vrcp.f32 %v5163_v41  ;;  %v5176_v43 = vand.u32 2147483648, %v5163_v41  ;;  %vm5170_vm14 = vweird.f32 %v5163_v41  ;;  %v5174_v13 = vand.u32 2147483647, %v5163_v41 }
 0x5f5   :  { %8133 = vrcp.f32 %v5164_v26  ;;  %v5191_v45 = vand.u32 2147483648, %v5164_v26  ;;  %vm5185_vm2 = vweird.f32 %v5164_v26  ;;  %v5189_v21 = vand.u32 2147483647, %v5164_v26 }
 0x5f6   :  { %v5177_v36 = vor.u32 1.1754944e-38, %v5176_v43  ;;  %vm5175_vm0 = vcmp.eq.f32.partialorder %v5174_v13, 8.507059e+37 }
 0x5f7   :  { %v5192_v59 = vor.u32 1.1754944e-38, %v5191_v45  ;;  %vm5190_vm5 = vcmp.eq.f32.partialorder %v5189_v21, 8.507059e+37 }
 0x5fa   :  { %v8132_v31 = vpop.eup %8131 }
 0x5fb   :  { %v5166_v63 = vmul.f32 %v8132_v31, %v5163_v41  ;;  %v8134_v11 = vpop.eup %8133  ;;  %vm5171_vm13 = vweird.f32 %v8132_v31 }
 0x5fc   :  { %v5181_v37 = vmul.f32 %v8134_v11, %v5164_v26  ;;  %vm5172_vm15 = vmor %vm5170_vm14, %vm5171_vm13  ;;  %vm5186_vm1 = vweird.f32 %v8134_v11 }
 0x5fd   :  { %v5167_v34 = vsub.f32 1.0, %v5166_v63  ;;  %vm5187_vm3 = vmor %vm5185_vm2, %vm5186_vm1 }
 0x5fe   :  { %v5182_v19 = vsub.f32 1.0, %v5181_v37 }
 0x5ff   :  { %v5168_v42 = vmul.f32 %v8132_v31, %v5167_v34 }
 0x600   :  { %v5183_v46 = vmul.f32 %v8134_v11, %v5182_v19 }
 0x601   :  { %v5169_v25 = vadd.f32 %v8132_v31, %v5168_v42 }
 0x602   :  { %v5184_v8 = vadd.f32 %v8134_v11, %v5183_v46 }
 0x603   :  { %v5173_v56 = vsel %vm5172_vm15, %v8132_v31, %v5169_v25 }
 0x604   :  { %v5178_v49 = vsel %vm5175_vm0, %v5177_v36, %v5173_v56  ;;  %v5188_v5 = vsel %vm5187_vm3, %v8134_v11, %v5184_v8 }
 0x605   :  { %v5193_v20 = vsel %vm5190_vm5, %v5192_v59, %v5188_v5 }
 0x663   :  { %v5198_v12 = vpop.permute.xlu1 %5197 }
 0x664   :  { %v5200_v40 = vmul.f32 %v5198_v12, %v5178_v49  ;;  %v5201_v57 = vmul.f32 %v5198_v12, %v5193_v20 }
 0x666   :  { %v5214_v2 = vpack.c.bf16 %v5200_v40, %v5200_v40  ;;  %v5215_v30 = vpack.c.bf16 %v5201_v57, %v5201_v57 }
 0x668   :  { %5222 = vrot.lane.b32.xlu2 %v5214_v2, %s8141_s10 }
 0x670   :  { %5224 = vrot.lane.b32.xlu2 %v5215_v30, %s8141_s10 }
 0x6c2   :  { %v5223_v61 = vpop.permute.xlu2 %5222 }
 0x6ca   :  { %v5225_v62 = vpop.permute.xlu2 %5224 }
 0x6cb   :  { %v5227_v38 = vsel %vm5226_vm6, %v5223_v61, %v5225_v62 }
 0x6cc   :  { %7625 = vmatmul.msk.bf16.vlgmr.msra.gmra.mxu0 %vm2551_vm4, %v5227_v38  ;;  %vm5329_vm4 = vcmask 23552  }
 0x749   :  { %v5276_v39 = vpop.f32.mrf.mxu0 }
 0x74a   :  { %v5277_v50 = vadd.f32 %v8115_v58, %v5276_v39 }
 0x74c   :  { %v5280_v27 = vmax.f32 %v5277_v50, 0.0 }
 0x74e   :  { %v5285_v48 = vpack.c.bf16 %v5280_v27, %v5280_v27 }
 0x750   :  { %7634 = vmatmul.msk.bf16.vlgmr.msrb.gmra.mxu2 %vm4954_vm8, %v5285_v48  ;;  %vm5335_vm8 = vcmask 7168  }
 0x751   :  { %v5278_v51 = vpop.f32.mrf.mxu0 }
 0x7d3   :  { %v5314_v29 = vpop.f32.mrf.mxu2 }
 0x7d4   :  { %v5315_v35 = vadd.f32 %v8116_v28, %v5314_v29 }
 0x7d6   :  { %v5319_v0 = vsel %vm5318_vm7, %v5315_v35, -inf }
 0x7d7   :  { %5320 = vmax.xlane.f32.xlu0 %v5319_v0 }
 0x7db   :  { %v5316_v1 = vpop.f32.mrf.mxu2 }
 0x84a   :  { %v5321_v14 = vpop.xlane.xlu0 %5320 }
 0x84b   :  { %v5322_v54 = vsub.f32 %v5315_v35, %v5321_v14 }
 0x84d   :  { %v5323_v60 = vmul.f32 1.442695, %v5322_v54 }
 0x84f   :  { %8135 = vpow2.f32 %v5323_v60 }
 0x855   :  { %v8136_v24 = vpop.eup %8135 }
 0x856   :  { %5326 = vrot.lane.b32.xlu1 %v8136_v24, %s8142_s13 }
 0x8c8   :  { %v5327_v15 = vpop.permute.xlu1 %5326 }
 0x8c9   :  { %v5330_v3 = vsel %vm5329_vm4, %v5327_v15, 0.0 }
 0x8ca   :  { %5331 = vadd.xlane.f32.xlu2 %v5330_v3 }
 0x93d   :  { %v5332_v52 = vpop.xlane.xlu2 %5331 }
 0x93e   :  { %8137 = vrcp.f32 %v5332_v52 }
 0x944   :  { %v8138_v47 = vpop.eup %8137 }
 0x945   :  { %v5334_v53 = vmul.f32 %v8138_v47, %v8136_v24 }
 0x947   :  { %v5336_v17 = vsel %vm5335_vm8, %v5315_v35, %v5334_v53 }
 0x948   :  { %5338 = vst.msk [vmem:[%s10772_s16] sm:$0xff] %vm5337_vm9, %v5336_v17 }

</bundles_post_ra>
